<compile_context>
chip_gen: v7x
topology: tpu7x:2x2x1
jax: 0.10.0
libtpu: 0.0.40
codegen_flags: <defaults>
</compile_context>

<pallas_src>
import functools

import jax
import jax.numpy as jnp
from jax.experimental import pallas as pl
from jax.experimental.pallas import tpu as pltpu


# ---------------------------------------------------------------------------
# Helpers
# ---------------------------------------------------------------------------
def _full_spec(shape):
    """BlockSpec covering the whole array (same block at every grid step)."""
    shape = tuple(int(s) for s in shape)
    return pl.BlockSpec(shape, lambda i: (0,) * len(shape))


def _pick_batch_block(B, T, C, expansion=2, vmem_budget_bytes=8 * 1024 * 1024):
    """Batch-block size for the per-layer grid.

    Big enough to amortise the ~0.35us/step pipeline overhead, small enough to
    stay well inside VMEM, and (for large B) leaving >= 2 grid steps so both
    v7x TensorCores get a share of the "parallel" batch axis.
    """
    per_b = 4 * T * C * (12 + 2 * expansion)        # rough f32 live set / batch
    cap = max(1, vmem_budget_bytes // per_b)
    divisors = [d for d in range(1, B + 1) if B % d == 0 and d <= cap]
    bb = divisors[-1] if divisors else 1
    if bb == B and B > 8:                           # keep >= 2 steps (megacore)
        halves = [d for d in divisors if 2 * d <= B]
        if halves:
            bb = halves[-1]
    return bb


# ---------------------------------------------------------------------------
# Fused SynthEncoderLayer kernel
#   token SynthAttention + channel SynthAttention + SynthMix reweight/proj
#   + LayerNorm + Mlp + LayerNorm, one batch block per grid step.
# ---------------------------------------------------------------------------
def _encoder_layer_kernel(reduce_token, reduce_channel, approx_recip, eps, *refs):
    (x_ref,
     wdt_t_ref, bd_t_ref, w1t_t_ref, w2t_t_ref, wv_t_ref, bv_t_ref,
     wd_c_ref, bd_c_ref, w1t_c_ref, w2t_c_ref, wvt_c_ref, bv_c_ref,
     rw1t_ref, rb1_ref, rw2et_ref, rb2e_ref, rw2ot_ref, rb2o_ref,
     pwt_ref, pb_ref, g1_ref, b1_ref,
     fw1t_ref, fb1_ref, fw2t_ref, fb2_ref, g2_ref, b2_ref,
     o_ref) = refs

    bb, T, C = x_ref.shape
    R_t = wdt_t_ref.shape[1]
    R_c = wd_c_ref.shape[0]

    x = x_ref[...]                                   # (bb, T, C) f32
    x2d = x.reshape(bb * T, C)

    def _softmax_last(e):
        m = jnp.max(e, axis=-1, keepdims=True)
        p = jnp.exp(e - m)
        d = jnp.sum(p, axis=-1, keepdims=True)
        if approx_recip:
            return p * pl.reciprocal(d, approx=True)
        return p / d

    # -- token branch: SynthAttention over the temporal axis ------------------
    e_t = jnp.dot(x2d, wdt_t_ref[...], preferred_element_type=jnp.float32)
    e_t = e_t.reshape(bb, T, R_t) + bd_t_ref[...]                  # (bb, T, R_t)
    y_t = jnp.sum(e_t, axis=-1) * (1.0 / R_t)                      # SE mean
    h_t = jnp.maximum(
        jnp.dot(y_t, w1t_t_ref[...], preferred_element_type=jnp.float32), 0.0)
    gate_t = jax.nn.sigmoid(
        jnp.dot(h_t, w2t_t_ref[...], preferred_element_type=jnp.float32))
    a_t = _softmax_last(e_t * gate_t[:, :, None])                  # (bb, T, R_t)
    if reduce_token > 1:
        wv_b = jnp.broadcast_to(wv_t_ref[...], (bb, R_t, T))
        v_t = jnp.einsum('brt,btc->brc', wv_b, x,
                         preferred_element_type=jnp.float32)
        v_t = v_t + bv_t_ref[...][:, :, None]                      # (bb, R_t, C)
    else:
        v_t = x                                                    # R_t == T
    t2 = jnp.einsum('btr,brc->btc', a_t, v_t,
                    preferred_element_type=jnp.float32)            # (bb, T, C)

    # -- channel branch (r-major layout: no in-kernel transposes) -------------
    wd_b = jnp.broadcast_to(wd_c_ref[...], (bb, R_c, T))
    e_c = jnp.einsum('brt,btc->brc', wd_b, x,
                     preferred_element_type=jnp.float32)
    e_c = e_c + bd_c_ref[...][:, :, None]                          # (bb, R_c, C)
    y_c = jnp.sum(e_c, axis=1) * (1.0 / R_c)                       # (bb, C) SE mean
    h_c = jnp.maximum(
        jnp.dot(y_c, w1t_c_ref[...], preferred_element_type=jnp.float32), 0.0)
    gate_c = jax.nn.sigmoid(
        jnp.dot(h_c, w2t_c_ref[...], preferred_element_type=jnp.float32))
    e_c = e_c * gate_c[:, None, :]
    m_c = jnp.max(e_c, axis=1, keepdims=True)
    p_c = jnp.exp(e_c - m_c)
    d_c = jnp.sum(p_c, axis=1, keepdims=True)
    if approx_recip:
        a_c = p_c * pl.reciprocal(d_c, approx=True)                # (bb, R_c, C)
    else:
        a_c = p_c / d_c
    if reduce_channel > 1:
        v_c = jnp.dot(x2d, wvt_c_ref[...], preferred_element_type=jnp.float32)
        v_c = v_c.reshape(bb, T, R_c) + bv_c_ref[...]              # (bb, T, R_c)
    else:
        v_c = x                                                    # R_c == C
    c2 = jnp.einsum('btr,brc->btc', v_c, a_c,
                    preferred_element_type=jnp.float32)            # (bb, T, C)

    # -- SynthMix reweight: 2-way softmax == sigmoid of logit difference ------
    g = jnp.sum(t2 + c2, axis=-1) * (1.0 / C)                      # (bb, T) gap
    hh = jnp.dot(g, rw1t_ref[...],
                 preferred_element_type=jnp.float32) + rb1_ref[...]
    # TODO(synk): PyTorch nn.GELU defaults to the exact erf form; the tanh
    # approximation (|diff| ~1e-3) is used for a clean EUP lowering.
    hh = jax.nn.gelu(hh, approximate=True)
    a0 = jnp.dot(hh, rw2et_ref[...],
                 preferred_element_type=jnp.float32) + rb2e_ref[...]
    a1 = jnp.dot(hh, rw2ot_ref[...],
                 preferred_element_type=jnp.float32) + rb2o_ref[...]
    w0 = jax.nn.sigmoid(a0 - a1)                                   # token weight
    mixed = w0[:, :, None] * t2 + (1.0 - w0)[:, :, None] * c2      # (bb, T, C)

    # -- proj + residual LayerNorm + FF Mlp + residual LayerNorm --------------
    att = jnp.dot(mixed.reshape(bb * T, C), pwt_ref[...],
                  preferred_element_type=jnp.float32) + pb_ref[...]

    def _ln(v, gamma_ref, beta_ref):
        mu = jnp.sum(v, axis=-1, keepdims=True) * (1.0 / C)
        vc = v - mu
        var = jnp.sum(vc * vc, axis=-1, keepdims=True) * (1.0 / C)
        return vc * jax.lax.rsqrt(var + eps) * gamma_ref[...] + beta_ref[...]

    x1 = _ln(x2d + att, g1_ref, b1_ref)                            # (bb*T, C)

    hf = jnp.dot(x1, fw1t_ref[...],
                 preferred_element_type=jnp.float32) + fb1_ref[...]
    hf = jax.nn.gelu(hf, approximate=True)
    ff = jnp.dot(hf, fw2t_ref[...],
                 preferred_element_type=jnp.float32) + fb2_ref[...]

    out = _ln(x1 + ff, g2_ref, b2_ref)
    o_ref[...] = out.reshape(bb, T, C).astype(o_ref.dtype)


def encoder_layer(x, lp, reduce_token, reduce_channel, *, approx_recip=True,
                  batch_block=None, eps=1e-5):
    """One fused SynthEncoderLayer forward.  x: (B, T, C)."""
    B, T, C = x.shape
    tok, ch = lp["token"], lp["channel"]
    R_t = tok["wd"].shape[0]
    R_c = ch["wd"].shape[0]
    Ch = lp["ff1"][0].shape[0]

    bb = batch_block if batch_block is not None else _pick_batch_block(B, T, C)
    assert B % bb == 0
    grid = (B // bb,)

    rw1, rb1 = lp["rw1"]
    rw2, rb2 = lp["rw2"]
    pw, pb = lp["proj"]
    g1, b1 = lp["norm1"]
    fw1, fb1 = lp["ff1"]
    fw2, fb2 = lp["ff2"]
    g2, b2 = lp["norm2"]

    inputs = [
        x,
        # token SynthAttention
        tok["wd"].T, tok["bd"].reshape(1, R_t), tok["w1"].T, tok["w2"].T,
        tok["wv"], tok["bv"].reshape(1, R_t),
        # channel SynthAttention
        ch["wd"], ch["bd"].reshape(1, R_c), ch["w1"].T, ch["w2"].T,
        ch["wv"].T, ch["bv"].reshape(1, R_c),
        # reweight Mlp (fc2 split into even/odd output rows = token/channel)
        rw1.T, rb1.reshape(1, -1),
        rw2[0::2].T, rb2[0::2].reshape(1, T),
        rw2[1::2].T, rb2[1::2].reshape(1, T),
        # proj, norm1, ff, norm2
        pw.T, pb.reshape(1, C),
        g1.reshape(1, C), b1.reshape(1, C),
        fw1.T, fb1.reshape(1, Ch), fw2.T, fb2.reshape(1, C),
        g2.reshape(1, C), b2.reshape(1, C),
    ]
    in_specs = [pl.BlockSpec((bb, T, C), lambda i: (i, 0, 0))] + \
               [_full_spec(a.shape) for a in inputs[1:]]

    kernel = functools.partial(_encoder_layer_kernel, reduce_token,
                               reduce_channel, approx_recip, eps)
    return pl.pallas_call(
        kernel,
        out_shape=jax.ShapeDtypeStruct((B, T, C), x.dtype),
        grid_spec=pltpu.PrefetchScalarGridSpec(
            num_scalar_prefetch=0, grid=grid,
            in_specs=in_specs,
            out_specs=pl.BlockSpec((bb, T, C), lambda i: (i, 0, 0))),
        compiler_params=pltpu.CompilerParams(
            dimension_semantics=("parallel",)),
    )(*inputs)


# ---------------------------------------------------------------------------
# Stem (l_interp + encoder_emb) and head (norm + fc + interp residual)
# ---------------------------------------------------------------------------
def _stem_kernel(kf_ref, liw_ref, lib_ref, ewt_ref, eb_ref, interp_ref, mem_ref):
    bb, K, J = kf_ref.shape
    W = liw_ref.shape[0]
    C = ewt_ref.shape[1]
    liw_b = jnp.broadcast_to(liw_ref[...], (bb, W, K))
    interp = jnp.einsum('bwk,bkj->bwj', liw_b, kf_ref[...],
                        preferred_element_type=jnp.float32)
    interp = interp + lib_ref[...][:, :, None]                     # (bb, W, J)
    mem = jnp.dot(interp.reshape(bb * W, J), ewt_ref[...],
                  preferred_element_type=jnp.float32) + eb_ref[...]
    interp_ref[...] = interp.astype(interp_ref.dtype)
    mem_ref[...] = mem.reshape(bb, W, C).astype(mem_ref.dtype)


def stem(kf, liw, lib, ew, eb, batch_block):
    B, K, J = kf.shape
    W = liw.shape[0]
    C = ew.shape[0]
    bb = batch_block
    assert B % bb == 0
    inputs = [kf, liw, lib.reshape(1, W), ew.T, eb.reshape(1, C)]
    in_specs = [pl.BlockSpec((bb, K, J), lambda i: (i, 0, 0))] + \
               [_full_spec(a.shape) for a in inputs[1:]]
    return pl.pallas_call(
        _stem_kernel,
        out_shape=(jax.ShapeDtypeStruct((B, W, J), jnp.float32),
                   jax.ShapeDtypeStruct((B, W, C), jnp.float32)),
        grid_spec=pltpu.PrefetchScalarGridSpec(
            num_scalar_prefetch=0, grid=(B // bb,),
            in_specs=in_specs,
            out_specs=[pl.BlockSpec((bb, W, J), lambda i: (i, 0, 0)),
                       pl.BlockSpec((bb, W, C), lambda i: (i, 0, 0))]),
        compiler_params=pltpu.CompilerParams(
            dimension_semantics=("parallel",)),
    )(*inputs)


def _head_kernel(eps, mem_ref, interp_ref, g_ref, b_ref, fwt_ref, fb_ref, o_ref):
    bb, W, C = mem_ref.shape
    J = fwt_ref.shape[1]
    m = mem_ref[...].reshape(bb * W, C)
    mu = jnp.sum(m, axis=-1, keepdims=True) * (1.0 / C)
    mc = m - mu
    var = jnp.sum(mc * mc, axis=-1, keepdims=True) * (1.0 / C)
    mn = mc * jax.lax.rsqrt(var + eps) * g_ref[...] + b_ref[...]
    rec = jnp.dot(mn, fwt_ref[...],
                  preferred_element_type=jnp.float32) + fb_ref[...]
    o_ref[...] = (rec.reshape(bb, W, J) + interp_ref[...]).astype(o_ref.dtype)


def head(mem, interp, ng, nb, fw, fb, batch_block, eps=1e-5):
    B, W, C = mem.shape
    J = fw.shape[0]
    bb = batch_block
    assert B % bb == 0
    inputs = [mem, interp, ng.reshape(1, C), nb.reshape(1, C),
              fw.T, fb.reshape(1, J)]
    in_specs = [pl.BlockSpec((bb, W, C), lambda i: (i, 0, 0)),
                pl.BlockSpec((bb, W, J), lambda i: (i, 0, 0))] + \
               [_full_spec(a.shape) for a in inputs[2:]]
    return pl.pallas_call(
        functools.partial(_head_kernel, eps),
        out_shape=jax.ShapeDtypeStruct((B, W, J), jnp.float32),
        grid_spec=pltpu.PrefetchScalarGridSpec(
            num_scalar_prefetch=0, grid=(B // bb,),
            in_specs=in_specs,
            out_specs=pl.BlockSpec((bb, W, J), lambda i: (i, 0, 0))),
        compiler_params=pltpu.CompilerParams(
            dimension_semantics=("parallel",)),
    )(*inputs)


# ---------------------------------------------------------------------------
# Full model forward (Pallas path).  Dropout layers are identity (inference).
# ---------------------------------------------------------------------------
def pose_refinement_forward(input_seq, params, *, sample_interval=10,
                            reduce_token=4, reduce_channel=8,
                            approx_recip=True, batch_block=None):
    x = input_seq.astype(jnp.float32)
    B = x.shape[0]
    kf = x[:, ::sample_interval, :]              # key-frame slice: tiny XLA glue

    liw, lib = params["l_interp"]                # (W, K), (W,)
    ew, eb = params["emb"]                       # (C, J), (C,)
    W, C = liw.shape[0], ew.shape[0]
    bb = batch_block if batch_block is not None else _pick_batch_block(B, W, C)

    interp, mem = stem(kf, liw, lib, ew, eb, bb)          # (B,W,J), (B,W,C)
    for lp in params["layers"]:
        mem = encoder_layer(mem, lp, reduce_token, reduce_channel,
                            approx_recip=approx_recip, batch_block=bb)
    ng, nb = params["norm"]
    fw, fb = params["fc"]
    return head(mem, interp, ng, nb, fw, fb, bb)          # (B, W, J)


# ---------------------------------------------------------------------------
# Pure-JAX reference (mirrors the PyTorch math; used only for checking)
# ---------------------------------------------------------------------------
def _layernorm_ref(x, gamma, beta, eps=1e-5):
    mu = jnp.mean(x, axis=-1, keepdims=True)
    var = jnp.mean((x - mu) ** 2, axis=-1, keepdims=True)
    return (x - mu) * jax.lax.rsqrt(var + eps) * gamma + beta


def synth_attention_ref(x, p, reduce_factor):
    energy = jnp.einsum('bsd,rd->bsr', x, p["wd"]) + p["bd"]
    y = jnp.mean(energy, axis=-1)
    h = jax.nn.relu(y @ p["w1"].T)
    gate = jax.nn.sigmoid(h @ p["w2"].T)
    energy = energy * gate[..., None]
    attn = jax.nn.softmax(energy, axis=-1)
    if reduce_factor > 1:
        value = jnp.einsum('bsd,rs->brd', x, p["wv"]) + p["bv"][None, :, None]
    else:
        value = x
    return jnp.einsum('bsr,brd->bsd', attn, value)


def synth_mix_ref(x, lp, reduce_token, reduce_channel):
    B, T, C = x.shape
    t2 = synth_attention_ref(x, lp["token"], reduce_token)
    c2 = jnp.transpose(
        synth_attention_ref(jnp.transpose(x, (0, 2, 1)), lp["channel"],
                            reduce_channel), (0, 2, 1))
    a = jnp.mean(t2 + c2, axis=-1)
    rw1, rb1 = lp["rw1"]
    rw2, rb2 = lp["rw2"]
    a = jax.nn.gelu(a @ rw1.T + rb1, approximate=True) @ rw2.T + rb2
    a = jax.nn.softmax(a.reshape(B, T, 2), axis=-1)
    mixed = a[..., 0:1] * t2 + a[..., 1:2] * c2
    pw, pb = lp["proj"]
    return mixed @ pw.T + pb


def encoder_layer_ref(x, lp, reduce_token, reduce_channel):
    att = synth_mix_ref(x, lp, reduce_token, reduce_channel)
    x = _layernorm_ref(x + att, *lp["norm1"])
    w1, b1 = lp["ff1"]
    w2, b2 = lp["ff2"]
    ff = jax.nn.gelu(x @ w1.T + b1, approximate=True) @ w2.T + b2
    return _layernorm_ref(x + ff, *lp["norm2"])


def pose_refinement_forward_ref(input_seq, params, *, sample_interval=10,
                                reduce_token=4, reduce_channel=8):
    x = input_seq.astype(jnp.float32)
    kf = x[:, ::sample_interval, :]
    liw, lib = params["l_interp"]
    interp = jnp.einsum('bkj,wk->bwj', kf, liw) + lib[None, :, None]
    ew, eb = params["emb"]
    mem = interp @ ew.T + eb
    for lp in params["layers"]:
        mem = encoder_layer_ref(mem, lp, reduce_token, reduce_channel)
    ng, nb = params["norm"]
    mem = _layernorm_ref(mem, ng, nb)
    fw, fb = params["fc"]
    return mem @ fw.T + fb + interp


# ---------------------------------------------------------------------------
# Deterministic synthetic parameters (PyTorch nn.Linear layout: (out, in)).
# ---------------------------------------------------------------------------
def _linear_params(key, out_f, in_f):
    kw, kb = jax.random.split(key)
    s = 1.0 / (in_f ** 0.5)
    return (s * jax.random.normal(kw, (out_f, in_f), jnp.float32),
            s * jax.random.normal(kb, (out_f,), jnp.float32))


def _norm_params(key, dim):
    kg, kb = jax.random.split(key)
    return (1.0 + 0.1 * jax.random.normal(kg, (dim,), jnp.float32),
            0.1 * jax.random.normal(kb, (dim,), jnp.float32))


def init_synth_attention_params(key, in_dims, out_dims, reduce_factor):
    R = out_dims // reduce_factor
    k = jax.random.split(key, 4)
    wd, bd = _linear_params(k[0], R, in_dims)                     # dense
    w1 = (1.0 / out_dims ** 0.5) * jax.random.normal(
        k[1], (out_dims // 4, out_dims), jnp.float32)             # se.fc[0]
    w2 = (1.0 / max(out_dims // 4, 1) ** 0.5) * jax.random.normal(
        k[2], (out_dims, out_dims // 4), jnp.float32)             # se.fc[2]
    wv, bv = _linear_params(k[3], R, out_dims)                    # value_reduce
    return {"wd": wd, "bd": bd, "w1": w1, "w2": w2, "wv": wv, "bv": bv}


def init_model_params(key, *, joint_dim, emb_dim, window_size, num_layers,
                      expansion_factor, reduce_token, reduce_channel, step):
    keys = jax.random.split(key, num_layers + 4)
    layers = []
    for i in range(num_layers):
        lk = jax.random.split(keys[i], 9)
        layers.append({
            "token": init_synth_attention_params(lk[0], emb_dim, window_size,
                                                 reduce_token),
            "channel": init_synth_attention_params(lk[1], window_size, emb_dim,
                                                   reduce_channel),
            "rw1": _linear_params(lk[2], window_size // 4, window_size),
            "rw2": _linear_params(lk[3], window_size * 2, window_size // 4),
            "proj": _linear_params(lk[4], emb_dim, emb_dim),
            "ff1": _linear_params(lk[5], emb_dim * expansion_factor, emb_dim),
            "ff2": _linear_params(lk[6], emb_dim, emb_dim * expansion_factor),
            "norm1": _norm_params(lk[7], emb_dim),
            "norm2": _norm_params(lk[8], emb_dim),
        })
    return {
        "l_interp": _linear_params(keys[num_layers], window_size, step + 1),
        "emb": _linear_params(keys[num_layers + 1], emb_dim, joint_dim),
        "layers": layers,
        "norm": _norm_params(keys[num_layers + 2], emb_dim),
        "fc": _linear_params(keys[num_layers + 3], joint_dim, emb_dim),
    }


if __name__ == "__main__":
    key = jax.random.PRNGKey(0)
    kx, kmodel, kseq = jax.random.split(key, 3)

    sample_interval, step = 10, 1
    window_size = sample_interval * step + 1          # 11
    joint_dim, emb_dim = 30, 128                      # 15 joints * 2, d_model
    num_layers, expansion_factor = 2, 2               # small demo (default: 5)
    reduce_token, reduce_channel = 4, 8

    params = init_model_params(
        kmodel, joint_dim=joint_dim, emb_dim=emb_dim, window_size=window_size,
        num_layers=num_layers, expansion_factor=expansion_factor,
        reduce_token=reduce_token, reduce_channel=reduce_channel, step=step)

    # ---- Check A: fused SynthEncoderLayer kernel, exact softmax divide,
    #      multi-step batch grid (B=6, batch_block=3 -> 2 grid steps) ---------
    lp0 = params["layers"][0]
    x0 = jax.random.normal(kx, (6, window_size, emb_dim), jnp.float32)
    out0 = jax.block_until_ready(
        encoder_layer(x0, lp0, reduce_token, reduce_channel,
                      approx_recip=False, batch_block=3))
    ref0 = encoder_layer_ref(x0, lp0, reduce_token, reduce_channel)
    assert out0.shape == x0.shape
    assert jnp.allclose(out0, ref0, atol=2e-3, rtol=2e-3)

    # ---- Check B: full PoseRefinementModel forward (approx EUP reciprocal) --
    input_seq = jax.random.normal(kseq, (2, window_size, joint_dim), jnp.float32)
    fwd = jax.jit(functools.partial(
        pose_refinement_forward, sample_interval=sample_interval,
        reduce_token=reduce_token, reduce_channel=reduce_channel,
        approx_recip=True))
    fwd_ref = jax.jit(functools.partial(
        pose_refinement_forward_ref, sample_interval=sample_interval,
        reduce_token=reduce_token, reduce_channel=reduce_channel))

    out = jax.block_until_ready(fwd(input_seq, params))
    ref = jax.block_until_ready(fwd_ref(input_seq, params))
    assert out.shape == (2, window_size, joint_dim)
    # Loose tolerance: every softmax in the Pallas path uses the approximate
    # EUP reciprocal (~1e-3 rel. error) compounded across both branch softmaxes
    # of all layers; exact-divide math is checked tightly in Check A.
    assert jnp.allclose(out, ref, atol=5e-2, rtol=5e-2)

    print("KERNEL_OK")
</pallas_src>

<mosaic_0001>
module attributes {stable_mosaic.version = 11 : i64} {
  func.func @_encoder_layer_kernel(%arg0: i32, %arg1: memref<3x11x128xf32, #tpu.memory_space<vmem>>, %arg2: memref<128x2xf32, #tpu.memory_space<vmem>>, %arg3: memref<1x2xf32, #tpu.memory_space<vmem>>, %arg4: memref<11x2xf32, #tpu.memory_space<vmem>>, %arg5: memref<2x11xf32, #tpu.memory_space<vmem>>, %arg6: memref<2x11xf32, #tpu.memory_space<vmem>>, %arg7: memref<1x2xf32, #tpu.memory_space<vmem>>, %arg8: memref<16x11xf32, #tpu.memory_space<vmem>>, %arg9: memref<1x16xf32, #tpu.memory_space<vmem>>, %arg10: memref<128x32xf32, #tpu.memory_space<vmem>>, %arg11: memref<32x128xf32, #tpu.memory_space<vmem>>, %arg12: memref<128x16xf32, #tpu.memory_space<vmem>>, %arg13: memref<1x16xf32, #tpu.memory_space<vmem>>, %arg14: memref<11x2xf32, #tpu.memory_space<vmem>>, %arg15: memref<1x2xf32, #tpu.memory_space<vmem>>, %arg16: memref<2x11xf32, #tpu.memory_space<vmem>>, %arg17: memref<1x11xf32, #tpu.memory_space<vmem>>, %arg18: memref<2x11xf32, #tpu.memory_space<vmem>>, %arg19: memref<1x11xf32, #tpu.memory_space<vmem>>, %arg20: memref<128x128xf32, #tpu.memory_space<vmem>>, %arg21: memref<1x128xf32, #tpu.memory_space<vmem>>, %arg22: memref<1x128xf32, #tpu.memory_space<vmem>>, %arg23: memref<1x128xf32, #tpu.memory_space<vmem>>, %arg24: memref<128x256xf32, #tpu.memory_space<vmem>>, %arg25: memref<1x256xf32, #tpu.memory_space<vmem>>, %arg26: memref<256x128xf32, #tpu.memory_space<vmem>>, %arg27: memref<1x128xf32, #tpu.memory_space<vmem>>, %arg28: memref<1x128xf32, #tpu.memory_space<vmem>>, %arg29: memref<1x128xf32, #tpu.memory_space<vmem>>, %arg30: memref<3x11x128xf32, #tpu.memory_space<vmem>>) attributes {dimension_semantics = [#tpu.dimension_semantics<parallel>], iteration_bounds = array<i64: 2>, scalar_prefetch = 0 : i64, scratch_operands = 0 : i64, tpu.core_type = #tpu.core_type<tc>, window_params = [{transform_indices = @transform_0, window_bounds = array<i64: 3, 11, 128>}, {pipeline_mode = #tpu.pipeline_mode<synchronous>, transform_indices = @transform_1, window_bounds = array<i64: 128, 2>}, {pipeline_mode = #tpu.pipeline_mode<synchronous>, transform_indices = @transform_2, window_bounds = array<i64: 1, 2>}, {pipeline_mode = #tpu.pipeline_mode<synchronous>, transform_indices = @transform_3, window_bounds = array<i64: 11, 2>}, {pipeline_mode = #tpu.pipeline_mode<synchronous>, transform_indices = @transform_4, window_bounds = array<i64: 2, 11>}, {pipeline_mode = #tpu.pipeline_mode<synchronous>, transform_indices = @transform_5, window_bounds = array<i64: 2, 11>}, {pipeline_mode = #tpu.pipeline_mode<synchronous>, transform_indices = @transform_6, window_bounds = array<i64: 1, 2>}, {pipeline_mode = #tpu.pipeline_mode<synchronous>, transform_indices = @transform_7, window_bounds = array<i64: 16, 11>}, {pipeline_mode = #tpu.pipeline_mode<synchronous>, transform_indices = @transform_8, window_bounds = array<i64: 1, 16>}, {pipeline_mode = #tpu.pipeline_mode<synchronous>, transform_indices = @transform_9, window_bounds = array<i64: 128, 32>}, {pipeline_mode = #tpu.pipeline_mode<synchronous>, transform_indices = @transform_10, window_bounds = array<i64: 32, 128>}, {pipeline_mode = #tpu.pipeline_mode<synchronous>, transform_indices = @transform_11, window_bounds = array<i64: 128, 16>}, {pipeline_mode = #tpu.pipeline_mode<synchronous>, transform_indices = @transform_12, window_bounds = array<i64: 1, 16>}, {pipeline_mode = #tpu.pipeline_mode<synchronous>, transform_indices = @transform_13, window_bounds = array<i64: 11, 2>}, {pipeline_mode = #tpu.pipeline_mode<synchronous>, transform_indices = @transform_14, window_bounds = array<i64: 1, 2>}, {pipeline_mode = #tpu.pipeline_mode<synchronous>, transform_indices = @transform_15, window_bounds = array<i64: 2, 11>}, {pipeline_mode = #tpu.pipeline_mode<synchronous>, transform_indices = @transform_16, window_bounds = array<i64: 1, 11>}, {pipeline_mode = #tpu.pipeline_mode<synchronous>, transform_indices = @transform_17, window_bounds = array<i64: 2, 11>}, {pipeline_mode = #tpu.pipeline_mode<synchronous>, transform_indices = @transform_18, window_bounds = array<i64: 1, 11>}, {pipeline_mode = #tpu.pipeline_mode<synchronous>, transform_indices = @transform_19, window_bounds = array<i64: 128, 128>}, {pipeline_mode = #tpu.pipeline_mode<synchronous>, transform_indices = @transform_20, window_bounds = array<i64: 1, 128>}, {pipeline_mode = #tpu.pipeline_mode<synchronous>, transform_indices = @transform_21, window_bounds = array<i64: 1, 128>}, {pipeline_mode = #tpu.pipeline_mode<synchronous>, transform_indices = @transform_22, window_bounds = array<i64: 1, 128>}, {pipeline_mode = #tpu.pipeline_mode<synchronous>, transform_indices = @transform_23, window_bounds = array<i64: 128, 256>}, {pipeline_mode = #tpu.pipeline_mode<synchronous>, transform_indices = @transform_24, window_bounds = array<i64: 1, 256>}, {pipeline_mode = #tpu.pipeline_mode<synchronous>, transform_indices = @transform_25, window_bounds = array<i64: 256, 128>}, {pipeline_mode = #tpu.pipeline_mode<synchronous>, transform_indices = @transform_26, window_bounds = array<i64: 1, 128>}, {pipeline_mode = #tpu.pipeline_mode<synchronous>, transform_indices = @transform_27, window_bounds = array<i64: 1, 128>}, {pipeline_mode = #tpu.pipeline_mode<synchronous>, transform_indices = @transform_28, window_bounds = array<i64: 1, 128>}, {transform_indices = @transform_29, window_bounds = array<i64: 3, 11, 128>}]} {
    %c0 = arith.constant 0 : index
    %c0_0 = arith.constant 0 : index
    %c0_1 = arith.constant 0 : index
    %0 = vector.load %arg1[%c0, %c0_0, %c0_1] : memref<3x11x128xf32, #tpu.memory_space<vmem>>, vector<3x11x128xf32>
    %1 = vector.shape_cast %0 : vector<3x11x128xf32> to vector<33x128xf32>
    %c0_2 = arith.constant 0 : index
    %c0_3 = arith.constant 0 : index
    %2 = vector.load %arg2[%c0_2, %c0_3] : memref<128x2xf32, #tpu.memory_space<vmem>>, vector<128x2xf32>
    %cst = arith.constant dense<0.000000e+00> : vector<33x2xf32>
    %3 = tpu.matmul %1, %2, %cst {dimension_numbers = #tpu.dot_dimension_numbers<[1], [0], [0], [1], [0, 0, 1, 1], [], []>} : vector<33x128xf32>, vector<128x2xf32>, vector<33x2xf32> -> vector<33x2xf32>
    %4 = vector.shape_cast %3 : vector<33x2xf32> to vector<3x11x2xf32>
    %c0_4 = arith.constant 0 : index
    %c0_5 = arith.constant 0 : index
    %5 = vector.load %arg3[%c0_4, %c0_5] : memref<1x2xf32, #tpu.memory_space<vmem>>, vector<1x2xf32>
    %6 = vector.shape_cast %5 : vector<1x2xf32> to vector<1x1x2xf32>
    %7 = vector.broadcast %6 : vector<1x1x2xf32> to vector<3x11x2xf32>
    %8 = arith.addf %4, %7 : vector<3x11x2xf32>
    %cst_6 = arith.constant dense<0.000000e+00> : vector<3x11xf32>
    %9 = vector.multi_reduction <add>, %8, %cst_6 [2] : vector<3x11x2xf32> to vector<3x11xf32>
    %cst_7 = arith.constant 5.000000e-01 : f32
    %10 = vector.broadcast %cst_7 : f32 to vector<3x11xf32>
    %11 = arith.mulf %9, %10 : vector<3x11xf32>
    %c0_8 = arith.constant 0 : index
    %c0_9 = arith.constant 0 : index
    %12 = vector.load %arg4[%c0_8, %c0_9] : memref<11x2xf32, #tpu.memory_space<vmem>>, vector<11x2xf32>
    %cst_10 = arith.constant dense<0.000000e+00> : vector<3x2xf32>
    %13 = tpu.matmul %11, %12, %cst_10 {dimension_numbers = #tpu.dot_dimension_numbers<[1], [0], [0], [1], [0, 0, 1, 1], [], []>} : vector<3x11xf32>, vector<11x2xf32>, vector<3x2xf32> -> vector<3x2xf32>
    %cst_11 = arith.constant 0.000000e+00 : f32
    %14 = vector.broadcast %cst_11 : f32 to vector<3x2xf32>
    %15 = arith.maximumf %13, %14 : vector<3x2xf32>
    %c0_12 = arith.constant 0 : index
    %c0_13 = arith.constant 0 : index
    %16 = vector.load %arg5[%c0_12, %c0_13] : memref<2x11xf32, #tpu.memory_space<vmem>>, vector<2x11xf32>
    %cst_14 = arith.constant dense<0.000000e+00> : vector<3x11xf32>
    %17 = tpu.matmul %15, %16, %cst_14 {dimension_numbers = #tpu.dot_dimension_numbers<[1], [0], [0], [1], [0, 0, 1, 1], [], []>} : vector<3x2xf32>, vector<2x11xf32>, vector<3x11xf32> -> vector<3x11xf32>
    %18 = arith.negf %17 : vector<3x11xf32>
    %19 = math.exp %18 : vector<3x11xf32>
    %cst_15 = arith.constant 1.000000e+00 : f32
    %20 = vector.broadcast %cst_15 : f32 to vector<3x11xf32>
    %21 = arith.addf %20, %19 : vector<3x11xf32>
    %22 = arith.divf %20, %21 : vector<3x11xf32>
    %23 = vector.shape_cast %22 : vector<3x11xf32> to vector<3x11x1xf32>
    %24 = vector.broadcast %23 : vector<3x11x1xf32> to vector<3x11x2xf32>
    %25 = arith.mulf %8, %24 : vector<3x11x2xf32>
    %cst_16 = arith.constant dense<0xFF800000> : vector<3x11xf32>
    %26 = vector.multi_reduction <maximumf>, %25, %cst_16 [2] : vector<3x11x2xf32> to vector<3x11xf32>
    %27 = vector.shape_cast %26 : vector<3x11xf32> to vector<3x11x1xf32>
    %28 = vector.broadcast %27 : vector<3x11x1xf32> to vector<3x11x2xf32>
    %29 = arith.subf %25, %28 : vector<3x11x2xf32>
    %30 = math.exp %29 : vector<3x11x2xf32>
    %cst_17 = arith.constant dense<0.000000e+00> : vector<3x11xf32>
    %31 = vector.multi_reduction <add>, %30, %cst_17 [2] : vector<3x11x2xf32> to vector<3x11xf32>
    %32 = vector.shape_cast %31 : vector<3x11xf32> to vector<3x11x1xf32>
    %33 = vector.broadcast %32 : vector<3x11x1xf32> to vector<3x11x2xf32>
    %34 = arith.divf %30, %33 : vector<3x11x2xf32>
    %c0_18 = arith.constant 0 : index
    %c0_19 = arith.constant 0 : index
    %35 = vector.load %arg6[%c0_18, %c0_19] : memref<2x11xf32, #tpu.memory_space<vmem>>, vector<2x11xf32>
    %36 = vector.shape_cast %35 : vector<2x11xf32> to vector<1x2x11xf32>
    %37 = vector.broadcast %36 : vector<1x2x11xf32> to vector<3x2x11xf32>
    "tpu.trace_start"() <{level = 10 : i32, message = "brt,btc->brc"}> : () -> ()
    %cst_20 = arith.constant dense<0.000000e+00> : vector<3x2x128xf32>
    %38 = tpu.matmul %37, %0, %cst_20 {dimension_numbers = #tpu.dot_dimension_numbers<[2], [1], [1], [2], [0, 0, 0, 1, 1, 2], [0], [0]>} : vector<3x2x11xf32>, vector<3x11x128xf32>, vector<3x2x128xf32> -> vector<3x2x128xf32>
    "tpu.trace_stop"() : () -> ()
    %c0_21 = arith.constant 0 : index
    %c0_22 = arith.constant 0 : index
    %39 = vector.load %arg7[%c0_21, %c0_22] : memref<1x2xf32, #tpu.memory_space<vmem>>, vector<1x2xf32>
    %40 = vector.shape_cast %39 : vector<1x2xf32> to vector<1x2x1xf32>
    %41 = vector.broadcast %40 : vector<1x2x1xf32> to vector<3x2x128xf32>
    %42 = arith.addf %38, %41 : vector<3x2x128xf32>
    "tpu.trace_start"() <{level = 10 : i32, message = "btr,brc->btc"}> : () -> ()
    %cst_23 = arith.constant dense<0.000000e+00> : vector<3x11x128xf32>
    %43 = tpu.matmul %34, %42, %cst_23 {dimension_numbers = #tpu.dot_dimension_numbers<[2], [1], [1], [2], [0, 0, 0, 1, 1, 2], [0], [0]>} : vector<3x11x2xf32>, vector<3x2x128xf32>, vector<3x11x128xf32> -> vector<3x11x128xf32>
    "tpu.trace_stop"() : () -> ()
    %c0_24 = arith.constant 0 : index
    %c0_25 = arith.constant 0 : index
    %44 = vector.load %arg8[%c0_24, %c0_25] : memref<16x11xf32, #tpu.memory_space<vmem>>, vector<16x11xf32>
    %45 = vector.shape_cast %44 : vector<16x11xf32> to vector<1x16x11xf32>
    %46 = vector.broadcast %45 : vector<1x16x11xf32> to vector<3x16x11xf32>
    "tpu.trace_start"() <{level = 10 : i32, message = "brt,btc->brc"}> : () -> ()
    %cst_26 = arith.constant dense<0.000000e+00> : vector<3x16x128xf32>
    %47 = tpu.matmul %46, %0, %cst_26 {dimension_numbers = #tpu.dot_dimension_numbers<[2], [1], [1], [2], [0, 0, 0, 1, 1, 2], [0], [0]>} : vector<3x16x11xf32>, vector<3x11x128xf32>, vector<3x16x128xf32> -> vector<3x16x128xf32>
    "tpu.trace_stop"() : () -> ()
    %c0_27 = arith.constant 0 : index
    %c0_28 = arith.constant 0 : index
    %48 = vector.load %arg9[%c0_27, %c0_28] : memref<1x16xf32, #tpu.memory_space<vmem>>, vector<1x16xf32>
    %49 = vector.shape_cast %48 : vector<1x16xf32> to vector<1x16x1xf32>
    %50 = vector.broadcast %49 : vector<1x16x1xf32> to vector<3x16x128xf32>
    %51 = arith.addf %47, %50 : vector<3x16x128xf32>
    %cst_29 = arith.constant dense<0.000000e+00> : vector<3x128xf32>
    %52 = vector.multi_reduction <add>, %51, %cst_29 [1] : vector<3x16x128xf32> to vector<3x128xf32>
    %cst_30 = arith.constant 6.250000e-02 : f32
    %53 = vector.broadcast %cst_30 : f32 to vector<3x128xf32>
    %54 = arith.mulf %52, %53 : vector<3x128xf32>
    %c0_31 = arith.constant 0 : index
    %c0_32 = arith.constant 0 : index
    %55 = vector.load %arg10[%c0_31, %c0_32] : memref<128x32xf32, #tpu.memory_space<vmem>>, vector<128x32xf32>
    %cst_33 = arith.constant dense<0.000000e+00> : vector<3x32xf32>
    %56 = tpu.matmul %54, %55, %cst_33 {dimension_numbers = #tpu.dot_dimension_numbers<[1], [0], [0], [1], [0, 0, 1, 1], [], []>} : vector<3x128xf32>, vector<128x32xf32>, vector<3x32xf32> -> vector<3x32xf32>
    %cst_34 = arith.constant 0.000000e+00 : f32
    %57 = vector.broadcast %cst_34 : f32 to vector<3x32xf32>
    %58 = arith.maximumf %56, %57 : vector<3x32xf32>
    %c0_35 = arith.constant 0 : index
    %c0_36 = arith.constant 0 : index
    %59 = vector.load %arg11[%c0_35, %c0_36] : memref<32x128xf32, #tpu.memory_space<vmem>>, vector<32x128xf32>
    %cst_37 = arith.constant dense<0.000000e+00> : vector<3x128xf32>
    %60 = tpu.matmul %58, %59, %cst_37 {dimension_numbers = #tpu.dot_dimension_numbers<[1], [0], [0], [1], [0, 0, 1, 1], [], []>} : vector<3x32xf32>, vector<32x128xf32>, vector<3x128xf32> -> vector<3x128xf32>
    %61 = arith.negf %60 : vector<3x128xf32>
    %62 = math.exp %61 : vector<3x128xf32>
    %cst_38 = arith.constant 1.000000e+00 : f32
    %63 = vector.broadcast %cst_38 : f32 to vector<3x128xf32>
    %64 = arith.addf %63, %62 : vector<3x128xf32>
    %65 = arith.divf %63, %64 : vector<3x128xf32>
    %66 = vector.shape_cast %65 : vector<3x128xf32> to vector<3x1x128xf32>
    %67 = vector.broadcast %66 : vector<3x1x128xf32> to vector<3x16x128xf32>
    %68 = arith.mulf %51, %67 : vector<3x16x128xf32>
    %cst_39 = arith.constant dense<0xFF800000> : vector<3x128xf32>
    %69 = vector.multi_reduction <maximumf>, %68, %cst_39 [1] : vector<3x16x128xf32> to vector<3x128xf32>
    %70 = vector.shape_cast %69 : vector<3x128xf32> to vector<3x1x128xf32>
    %71 = vector.broadcast %70 : vector<3x1x128xf32> to vector<3x16x128xf32>
    %72 = arith.subf %68, %71 : vector<3x16x128xf32>
    %73 = math.exp %72 : vector<3x16x128xf32>
    %cst_40 = arith.constant dense<0.000000e+00> : vector<3x128xf32>
    %74 = vector.multi_reduction <add>, %73, %cst_40 [1] : vector<3x16x128xf32> to vector<3x128xf32>
    %75 = vector.shape_cast %74 : vector<3x128xf32> to vector<3x1x128xf32>
    %76 = vector.broadcast %75 : vector<3x1x128xf32> to vector<3x16x128xf32>
    %77 = arith.divf %73, %76 : vector<3x16x128xf32>
    %c0_41 = arith.constant 0 : index
    %c0_42 = arith.constant 0 : index
    %78 = vector.load %arg12[%c0_41, %c0_42] : memref<128x16xf32, #tpu.memory_space<vmem>>, vector<128x16xf32>
    %cst_43 = arith.constant dense<0.000000e+00> : vector<33x16xf32>
    %79 = tpu.matmul %1, %78, %cst_43 {dimension_numbers = #tpu.dot_dimension_numbers<[1], [0], [0], [1], [0, 0, 1, 1], [], []>} : vector<33x128xf32>, vector<128x16xf32>, vector<33x16xf32> -> vector<33x16xf32>
    %80 = vector.shape_cast %79 : vector<33x16xf32> to vector<3x11x16xf32>
    %c0_44 = arith.constant 0 : index
    %c0_45 = arith.constant 0 : index
    %81 = vector.load %arg13[%c0_44, %c0_45] : memref<1x16xf32, #tpu.memory_space<vmem>>, vector<1x16xf32>
    %82 = vector.shape_cast %81 : vector<1x16xf32> to vector<1x1x16xf32>
    %83 = vector.broadcast %82 : vector<1x1x16xf32> to vector<3x11x16xf32>
    %84 = arith.addf %80, %83 : vector<3x11x16xf32>
    "tpu.trace_start"() <{level = 10 : i32, message = "btr,brc->btc"}> : () -> ()
    %cst_46 = arith.constant dense<0.000000e+00> : vector<3x11x128xf32>
    %85 = tpu.matmul %84, %77, %cst_46 {dimension_numbers = #tpu.dot_dimension_numbers<[2], [1], [1], [2], [0, 0, 0, 1, 1, 2], [0], [0]>} : vector<3x11x16xf32>, vector<3x16x128xf32>, vector<3x11x128xf32> -> vector<3x11x128xf32>
    "tpu.trace_stop"() : () -> ()
    %86 = arith.addf %43, %85 : vector<3x11x128xf32>
    %cst_47 = arith.constant dense<0.000000e+00> : vector<3x11xf32>
    %87 = vector.multi_reduction <add>, %86, %cst_47 [2] : vector<3x11x128xf32> to vector<3x11xf32>
    %cst_48 = arith.constant 7.812500e-03 : f32
    %88 = vector.broadcast %cst_48 : f32 to vector<3x11xf32>
    %89 = arith.mulf %87, %88 : vector<3x11xf32>
    %c0_49 = arith.constant 0 : index
    %c0_50 = arith.constant 0 : index
    %90 = vector.load %arg14[%c0_49, %c0_50] : memref<11x2xf32, #tpu.memory_space<vmem>>, vector<11x2xf32>
    %cst_51 = arith.constant dense<0.000000e+00> : vector<3x2xf32>
    %91 = tpu.matmul %89, %90, %cst_51 {dimension_numbers = #tpu.dot_dimension_numbers<[1], [0], [0], [1], [0, 0, 1, 1], [], []>} : vector<3x11xf32>, vector<11x2xf32>, vector<3x2xf32> -> vector<3x2xf32>
    %c0_52 = arith.constant 0 : index
    %c0_53 = arith.constant 0 : index
    %92 = vector.load %arg15[%c0_52, %c0_53] : memref<1x2xf32, #tpu.memory_space<vmem>>, vector<1x2xf32>
    %93 = vector.broadcast %92 : vector<1x2xf32> to vector<3x2xf32>
    %94 = arith.addf %91, %93 : vector<3x2xf32>
    %95 = arith.mulf %94, %94 : vector<3x2xf32>
    %96 = arith.mulf %94, %95 : vector<3x2xf32>
    %cst_54 = arith.constant 4.471500e-02 : f32
    %97 = vector.broadcast %cst_54 : f32 to vector<3x2xf32>
    %98 = arith.mulf %97, %96 : vector<3x2xf32>
    %99 = arith.addf %94, %98 : vector<3x2xf32>
    %cst_55 = arith.constant 0.797884583 : f32
    %100 = vector.broadcast %cst_55 : f32 to vector<3x2xf32>
    %101 = arith.mulf %100, %99 : vector<3x2xf32>
    %102 = math.tanh %101 : vector<3x2xf32>
    %cst_56 = arith.constant 1.000000e+00 : f32
    %103 = vector.broadcast %cst_56 : f32 to vector<3x2xf32>
    %104 = arith.addf %103, %102 : vector<3x2xf32>
    %cst_57 = arith.constant 5.000000e-01 : f32
    %105 = vector.broadcast %cst_57 : f32 to vector<3x2xf32>
    %106 = arith.mulf %105, %104 : vector<3x2xf32>
    %107 = arith.mulf %94, %106 : vector<3x2xf32>
    %c0_58 = arith.constant 0 : index
    %c0_59 = arith.constant 0 : index
    %108 = vector.load %arg16[%c0_58, %c0_59] : memref<2x11xf32, #tpu.memory_space<vmem>>, vector<2x11xf32>
    %cst_60 = arith.constant dense<0.000000e+00> : vector<3x11xf32>
    %109 = tpu.matmul %107, %108, %cst_60 {dimension_numbers = #tpu.dot_dimension_numbers<[1], [0], [0], [1], [0, 0, 1, 1], [], []>} : vector<3x2xf32>, vector<2x11xf32>, vector<3x11xf32> -> vector<3x11xf32>
    %c0_61 = arith.constant 0 : index
    %c0_62 = arith.constant 0 : index
    %110 = vector.load %arg17[%c0_61, %c0_62] : memref<1x11xf32, #tpu.memory_space<vmem>>, vector<1x11xf32>
    %111 = vector.broadcast %110 : vector<1x11xf32> to vector<3x11xf32>
    %112 = arith.addf %109, %111 : vector<3x11xf32>
    %c0_63 = arith.constant 0 : index
    %c0_64 = arith.constant 0 : index
    %113 = vector.load %arg18[%c0_63, %c0_64] : memref<2x11xf32, #tpu.memory_space<vmem>>, vector<2x11xf32>
    %cst_65 = arith.constant dense<0.000000e+00> : vector<3x11xf32>
    %114 = tpu.matmul %107, %113, %cst_65 {dimension_numbers = #tpu.dot_dimension_numbers<[1], [0], [0], [1], [0, 0, 1, 1], [], []>} : vector<3x2xf32>, vector<2x11xf32>, vector<3x11xf32> -> vector<3x11xf32>
    %c0_66 = arith.constant 0 : index
    %c0_67 = arith.constant 0 : index
    %115 = vector.load %arg19[%c0_66, %c0_67] : memref<1x11xf32, #tpu.memory_space<vmem>>, vector<1x11xf32>
    %116 = vector.broadcast %115 : vector<1x11xf32> to vector<3x11xf32>
    %117 = arith.addf %114, %116 : vector<3x11xf32>
    %118 = arith.subf %112, %117 : vector<3x11xf32>
    %119 = arith.negf %118 : vector<3x11xf32>
    %120 = math.exp %119 : vector<3x11xf32>
    %cst_68 = arith.constant 1.000000e+00 : f32
    %121 = vector.broadcast %cst_68 : f32 to vector<3x11xf32>
    %122 = arith.addf %121, %120 : vector<3x11xf32>
    %123 = arith.divf %121, %122 : vector<3x11xf32>
    %124 = vector.shape_cast %123 : vector<3x11xf32> to vector<3x11x1xf32>
    %125 = vector.broadcast %124 : vector<3x11x1xf32> to vector<3x11x128xf32>
    %126 = arith.mulf %125, %43 : vector<3x11x128xf32>
    %cst_69 = arith.constant 1.000000e+00 : f32
    %127 = vector.broadcast %cst_69 : f32 to vector<3x11xf32>
    %128 = arith.subf %127, %123 : vector<3x11xf32>
    %129 = vector.shape_cast %128 : vector<3x11xf32> to vector<3x11x1xf32>
    %130 = vector.broadcast %129 : vector<3x11x1xf32> to vector<3x11x128xf32>
    %131 = arith.mulf %130, %85 : vector<3x11x128xf32>
    %132 = arith.addf %126, %131 : vector<3x11x128xf32>
    %133 = vector.shape_cast %132 : vector<3x11x128xf32> to vector<33x128xf32>
    %c0_70 = arith.constant 0 : index
    %c0_71 = arith.constant 0 : index
    %134 = vector.load %arg20[%c0_70, %c0_71] : memref<128x128xf32, #tpu.memory_space<vmem>>, vector<128x128xf32>
    %cst_72 = arith.constant dense<0.000000e+00> : vector<33x128xf32>
    %135 = tpu.matmul %133, %134, %cst_72 {dimension_numbers = #tpu.dot_dimension_numbers<[1], [0], [0], [1], [0, 0, 1, 1], [], []>} : vector<33x128xf32>, vector<128x128xf32>, vector<33x128xf32> -> vector<33x128xf32>
    %c0_73 = arith.constant 0 : index
    %c0_74 = arith.constant 0 : index
    %136 = vector.load %arg21[%c0_73, %c0_74] : memref<1x128xf32, #tpu.memory_space<vmem>>, vector<1x128xf32>
    %137 = vector.broadcast %136 : vector<1x128xf32> to vector<33x128xf32>
    %138 = arith.addf %135, %137 : vector<33x128xf32>
    %139 = arith.addf %1, %138 : vector<33x128xf32>
    %cst_75 = arith.constant dense<0.000000e+00> : vector<33xf32>
    %140 = vector.multi_reduction <add>, %139, %cst_75 [1] : vector<33x128xf32> to vector<33xf32>
    %141 = vector.shape_cast %140 : vector<33xf32> to vector<33x1xf32>
    %cst_76 = arith.constant 7.812500e-03 : f32
    %142 = vector.broadcast %cst_76 : f32 to vector<33x1xf32>
    %143 = arith.mulf %141, %142 : vector<33x1xf32>
    %144 = vector.broadcast %143 : vector<33x1xf32> to vector<33x128xf32>
    %145 = arith.subf %139, %144 : vector<33x128xf32>
    %146 = arith.mulf %145, %145 : vector<33x128xf32>
    %cst_77 = arith.constant dense<0.000000e+00> : vector<33xf32>
    %147 = vector.multi_reduction <add>, %146, %cst_77 [1] : vector<33x128xf32> to vector<33xf32>
    %148 = vector.shape_cast %147 : vector<33xf32> to vector<33x1xf32>
    %cst_78 = arith.constant 7.812500e-03 : f32
    %149 = vector.broadcast %cst_78 : f32 to vector<33x1xf32>
    %150 = arith.mulf %148, %149 : vector<33x1xf32>
    %cst_79 = arith.constant 9.99999974E-6 : f32
    %151 = vector.broadcast %cst_79 : f32 to vector<33x1xf32>
    %152 = arith.addf %150, %151 : vector<33x1xf32>
    %153 = math.rsqrt %152 : vector<33x1xf32>
    %154 = vector.broadcast %153 : vector<33x1xf32> to vector<33x128xf32>
    %155 = arith.mulf %145, %154 : vector<33x128xf32>
    %c0_80 = arith.constant 0 : index
    %c0_81 = arith.constant 0 : index
    %156 = vector.load %arg22[%c0_80, %c0_81] : memref<1x128xf32, #tpu.memory_space<vmem>>, vector<1x128xf32>
    %157 = vector.broadcast %156 : vector<1x128xf32> to vector<33x128xf32>
    %158 = arith.mulf %155, %157 : vector<33x128xf32>
    %c0_82 = arith.constant 0 : index
    %c0_83 = arith.constant 0 : index
    %159 = vector.load %arg23[%c0_82, %c0_83] : memref<1x128xf32, #tpu.memory_space<vmem>>, vector<1x128xf32>
    %160 = vector.broadcast %159 : vector<1x128xf32> to vector<33x128xf32>
    %161 = arith.addf %158, %160 : vector<33x128xf32>
    %c0_84 = arith.constant 0 : index
    %c0_85 = arith.constant 0 : index
    %162 = vector.load %arg24[%c0_84, %c0_85] : memref<128x256xf32, #tpu.memory_space<vmem>>, vector<128x256xf32>
    %cst_86 = arith.constant dense<0.000000e+00> : vector<33x256xf32>
    %163 = tpu.matmul %161, %162, %cst_86 {dimension_numbers = #tpu.dot_dimension_numbers<[1], [0], [0], [1], [0, 0, 1, 1], [], []>} : vector<33x128xf32>, vector<128x256xf32>, vector<33x256xf32> -> vector<33x256xf32>
    %c0_87 = arith.constant 0 : index
    %c0_88 = arith.constant 0 : index
    %164 = vector.load %arg25[%c0_87, %c0_88] : memref<1x256xf32, #tpu.memory_space<vmem>>, vector<1x256xf32>
    %165 = vector.broadcast %164 : vector<1x256xf32> to vector<33x256xf32>
    %166 = arith.addf %163, %165 : vector<33x256xf32>
    %167 = arith.mulf %166, %166 : vector<33x256xf32>
    %168 = arith.mulf %166, %167 : vector<33x256xf32>
    %cst_89 = arith.constant 4.471500e-02 : f32
    %169 = vector.broadcast %cst_89 : f32 to vector<33x256xf32>
    %170 = arith.mulf %169, %168 : vector<33x256xf32>
    %171 = arith.addf %166, %170 : vector<33x256xf32>
    %cst_90 = arith.constant 0.797884583 : f32
    %172 = vector.broadcast %cst_90 : f32 to vector<33x256xf32>
    %173 = arith.mulf %172, %171 : vector<33x256xf32>
    %174 = math.tanh %173 : vector<33x256xf32>
    %cst_91 = arith.constant 1.000000e+00 : f32
    %175 = vector.broadcast %cst_91 : f32 to vector<33x256xf32>
    %176 = arith.addf %175, %174 : vector<33x256xf32>
    %cst_92 = arith.constant 5.000000e-01 : f32
    %177 = vector.broadcast %cst_92 : f32 to vector<33x256xf32>
    %178 = arith.mulf %177, %176 : vector<33x256xf32>
    %179 = arith.mulf %166, %178 : vector<33x256xf32>
    %c0_93 = arith.constant 0 : index
    %c0_94 = arith.constant 0 : index
    %180 = vector.load %arg26[%c0_93, %c0_94] : memref<256x128xf32, #tpu.memory_space<vmem>>, vector<256x128xf32>
    %cst_95 = arith.constant dense<0.000000e+00> : vector<33x128xf32>
    %181 = tpu.matmul %179, %180, %cst_95 {dimension_numbers = #tpu.dot_dimension_numbers<[1], [0], [0], [1], [0, 0, 1, 1], [], []>} : vector<33x256xf32>, vector<256x128xf32>, vector<33x128xf32> -> vector<33x128xf32>
    %c0_96 = arith.constant 0 : index
    %c0_97 = arith.constant 0 : index
    %182 = vector.load %arg27[%c0_96, %c0_97] : memref<1x128xf32, #tpu.memory_space<vmem>>, vector<1x128xf32>
    %183 = vector.broadcast %182 : vector<1x128xf32> to vector<33x128xf32>
    %184 = arith.addf %181, %183 : vector<33x128xf32>
    %185 = arith.addf %161, %184 : vector<33x128xf32>
    %cst_98 = arith.constant dense<0.000000e+00> : vector<33xf32>
    %186 = vector.multi_reduction <add>, %185, %cst_98 [1] : vector<33x128xf32> to vector<33xf32>
    %187 = vector.shape_cast %186 : vector<33xf32> to vector<33x1xf32>
    %cst_99 = arith.constant 7.812500e-03 : f32
    %188 = vector.broadcast %cst_99 : f32 to vector<33x1xf32>
    %189 = arith.mulf %187, %188 : vector<33x1xf32>
    %190 = vector.broadcast %189 : vector<33x1xf32> to vector<33x128xf32>
    %191 = arith.subf %185, %190 : vector<33x128xf32>
    %192 = arith.mulf %191, %191 : vector<33x128xf32>
    %cst_100 = arith.constant dense<0.000000e+00> : vector<33xf32>
    %193 = vector.multi_reduction <add>, %192, %cst_100 [1] : vector<33x128xf32> to vector<33xf32>
    %194 = vector.shape_cast %193 : vector<33xf32> to vector<33x1xf32>
    %cst_101 = arith.constant 7.812500e-03 : f32
    %195 = vector.broadcast %cst_101 : f32 to vector<33x1xf32>
    %196 = arith.mulf %194, %195 : vector<33x1xf32>
    %cst_102 = arith.constant 9.99999974E-6 : f32
    %197 = vector.broadcast %cst_102 : f32 to vector<33x1xf32>
    %198 = arith.addf %196, %197 : vector<33x1xf32>
    %199 = math.rsqrt %198 : vector<33x1xf32>
    %200 = vector.broadcast %199 : vector<33x1xf32> to vector<33x128xf32>
    %201 = arith.mulf %191, %200 : vector<33x128xf32>
    %c0_103 = arith.constant 0 : index
    %c0_104 = arith.constant 0 : index
    %202 = vector.load %arg28[%c0_103, %c0_104] : memref<1x128xf32, #tpu.memory_space<vmem>>, vector<1x128xf32>
    %203 = vector.broadcast %202 : vector<1x128xf32> to vector<33x128xf32>
    %204 = arith.mulf %201, %203 : vector<33x128xf32>
    %c0_105 = arith.constant 0 : index
    %c0_106 = arith.constant 0 : index
    %205 = vector.load %arg29[%c0_105, %c0_106] : memref<1x128xf32, #tpu.memory_space<vmem>>, vector<1x128xf32>
    %206 = vector.broadcast %205 : vector<1x128xf32> to vector<33x128xf32>
    %207 = arith.addf %204, %206 : vector<33x128xf32>
    %208 = vector.shape_cast %207 : vector<33x128xf32> to vector<3x11x128xf32>
    %c0_107 = arith.constant 0 : index
    %c0_108 = arith.constant 0 : index
    %c0_109 = arith.constant 0 : index
    %209 = vector.load %arg30[%c0_107, %c0_108, %c0_109] : memref<3x11x128xf32, #tpu.memory_space<vmem>>, vector<3x11x128xf32>
    tpu.vector_store %arg30[%c0_107, %c0_108, %c0_109], %208 {strides = array<i32>} : memref<3x11x128xf32, #tpu.memory_space<vmem>>, vector<3x11x128xf32>,
    return
  }
  func.func @transform_0(%arg0: i32) -> (i32, i32, i32) {
    %c0_i32 = arith.constant 0 : i32
    %c0_i32_0 = arith.constant 0 : i32
    %c0_i32_1 = arith.constant 0 : i32
    return %arg0, %c0_i32, %c0_i32_0 : i32, i32, i32
  }
  func.func @transform_1(%arg0: i32) -> (i32, i32) {
    %c0_i32 = arith.constant 0 : i32
    %c0_i32_0 = arith.constant 0 : i32
    %c0_i32_1 = arith.constant 0 : i32
    return %c0_i32, %c0_i32_0 : i32, i32
  }
  func.func @transform_2(%arg0: i32) -> (i32, i32) {
    %c0_i32 = arith.constant 0 : i32
    %c0_i32_0 = arith.constant 0 : i32
    %c0_i32_1 = arith.constant 0 : i32
    return %c0_i32, %c0_i32_0 : i32, i32
  }
  func.func @transform_3(%arg0: i32) -> (i32, i32) {
    %c0_i32 = arith.constant 0 : i32
    %c0_i32_0 = arith.constant 0 : i32
    %c0_i32_1 = arith.constant 0 : i32
    return %c0_i32, %c0_i32_0 : i32, i32
  }
  func.func @transform_4(%arg0: i32) -> (i32, i32) {
    %c0_i32 = arith.constant 0 : i32
    %c0_i32_0 = arith.constant 0 : i32
    %c0_i32_1 = arith.constant 0 : i32
    return %c0_i32, %c0_i32_0 : i32, i32
  }
  func.func @transform_5(%arg0: i32) -> (i32, i32) {
    %c0_i32 = arith.constant 0 : i32
    %c0_i32_0 = arith.constant 0 : i32
    %c0_i32_1 = arith.constant 0 : i32
    return %c0_i32, %c0_i32_0 : i32, i32
  }
  func.func @transform_6(%arg0: i32) -> (i32, i32) {
    %c0_i32 = arith.constant 0 : i32
    %c0_i32_0 = arith.constant 0 : i32
    %c0_i32_1 = arith.constant 0 : i32
    return %c0_i32, %c0_i32_0 : i32, i32
  }
  func.func @transform_7(%arg0: i32) -> (i32, i32) {
    %c0_i32 = arith.constant 0 : i32
    %c0_i32_0 = arith.constant 0 : i32
    %c0_i32_1 = arith.constant 0 : i32
    return %c0_i32, %c0_i32_0 : i32, i32
  }
  func.func @transform_8(%arg0: i32) -> (i32, i32) {
    %c0_i32 = arith.constant 0 : i32
    %c0_i32_0 = arith.constant 0 : i32
    %c0_i32_1 = arith.constant 0 : i32
    return %c0_i32, %c0_i32_0 : i32, i32
  }
  func.func @transform_9(%arg0: i32) -> (i32, i32) {
    %c0_i32 = arith.constant 0 : i32
    %c0_i32_0 = arith.constant 0 : i32
    %c0_i32_1 = arith.constant 0 : i32
    return %c0_i32, %c0_i32_0 : i32, i32
  }
  func.func @transform_10(%arg0: i32) -> (i32, i32) {
    %c0_i32 = arith.constant 0 : i32
    %c0_i32_0 = arith.constant 0 : i32
    %c0_i32_1 = arith.constant 0 : i32
    return %c0_i32, %c0_i32_0 : i32, i32
  }
  func.func @transform_11(%arg0: i32) -> (i32, i32) {
    %c0_i32 = arith.constant 0 : i32
    %c0_i32_0 = arith.constant 0 : i32
    %c0_i32_1 = arith.constant 0 : i32
    return %c0_i32, %c0_i32_0 : i32, i32
  }
  func.func @transform_12(%arg0: i32) -> (i32, i32) {
    %c0_i32 = arith.constant 0 : i32
    %c0_i32_0 = arith.constant 0 : i32
    %c0_i32_1 = arith.constant 0 : i32
    return %c0_i32, %c0_i32_0 : i32, i32
  }
  func.func @transform_13(%arg0: i32) -> (i32, i32) {
    %c0_i32 = arith.constant 0 : i32
    %c0_i32_0 = arith.constant 0 : i32
    %c0_i32_1 = arith.constant 0 : i32
    return %c0_i32, %c0_i32_0 : i32, i32
  }
  func.func @transform_14(%arg0: i32) -> (i32, i32) {
    %c0_i32 = arith.constant 0 : i32
    %c0_i32_0 = arith.constant 0 : i32
    %c0_i32_1 = arith.constant 0 : i32
    return %c0_i32, %c0_i32_0 : i32, i32
  }
  func.func @transform_15(%arg0: i32) -> (i32, i32) {
    %c0_i32 = arith.constant 0 : i32
    %c0_i32_0 = arith.constant 0 : i32
    %c0_i32_1 = arith.constant 0 : i32
    return %c0_i32, %c0_i32_0 : i32, i32
  }
  func.func @transform_16(%arg0: i32) -> (i32, i32) {
    %c0_i32 = arith.constant 0 : i32
    %c0_i32_0 = arith.constant 0 : i32
    %c0_i32_1 = arith.constant 0 : i32
    return %c0_i32, %c0_i32_0 : i32, i32
  }
  func.func @transform_17(%arg0: i32) -> (i32, i32) {
    %c0_i32 = arith.constant 0 : i32
    %c0_i32_0 = arith.constant 0 : i32
    %c0_i32_1 = arith.constant 0 : i32
    return %c0_i32, %c0_i32_0 : i32, i32
  }
  func.func @transform_18(%arg0: i32) -> (i32, i32) {
    %c0_i32 = arith.constant 0 : i32
    %c0_i32_0 = arith.constant 0 : i32
    %c0_i32_1 = arith.constant 0 : i32
    return %c0_i32, %c0_i32_0 : i32, i32
  }
  func.func @transform_19(%arg0: i32) -> (i32, i32) {
    %c0_i32 = arith.constant 0 : i32
    %c0_i32_0 = arith.constant 0 : i32
    %c0_i32_1 = arith.constant 0 : i32
    return %c0_i32, %c0_i32_0 : i32, i32
  }
  func.func @transform_20(%arg0: i32) -> (i32, i32) {
    %c0_i32 = arith.constant 0 : i32
    %c0_i32_0 = arith.constant 0 : i32
    %c0_i32_1 = arith.constant 0 : i32
    return %c0_i32, %c0_i32_0 : i32, i32
  }
  func.func @transform_21(%arg0: i32) -> (i32, i32) {
    %c0_i32 = arith.constant 0 : i32
    %c0_i32_0 = arith.constant 0 : i32
    %c0_i32_1 = arith.constant 0 : i32
    return %c0_i32, %c0_i32_0 : i32, i32
  }
  func.func @transform_22(%arg0: i32) -> (i32, i32) {
    %c0_i32 = arith.constant 0 : i32
    %c0_i32_0 = arith.constant 0 : i32
    %c0_i32_1 = arith.constant 0 : i32
    return %c0_i32, %c0_i32_0 : i32, i32
  }
  func.func @transform_23(%arg0: i32) -> (i32, i32) {
    %c0_i32 = arith.constant 0 : i32
    %c0_i32_0 = arith.constant 0 : i32
    %c0_i32_1 = arith.constant 0 : i32
    return %c0_i32, %c0_i32_0 : i32, i32
  }
  func.func @transform_24(%arg0: i32) -> (i32, i32) {
    %c0_i32 = arith.constant 0 : i32
    %c0_i32_0 = arith.constant 0 : i32
    %c0_i32_1 = arith.constant 0 : i32
    return %c0_i32, %c0_i32_0 : i32, i32
  }
  func.func @transform_25(%arg0: i32) -> (i32, i32) {
    %c0_i32 = arith.constant 0 : i32
    %c0_i32_0 = arith.constant 0 : i32
    %c0_i32_1 = arith.constant 0 : i32
    return %c0_i32, %c0_i32_0 : i32, i32
  }
  func.func @transform_26(%arg0: i32) -> (i32, i32) {
    %c0_i32 = arith.constant 0 : i32
    %c0_i32_0 = arith.constant 0 : i32
    %c0_i32_1 = arith.constant 0 : i32
    return %c0_i32, %c0_i32_0 : i32, i32
  }
  func.func @transform_27(%arg0: i32) -> (i32, i32) {
    %c0_i32 = arith.constant 0 : i32
    %c0_i32_0 = arith.constant 0 : i32
    %c0_i32_1 = arith.constant 0 : i32
    return %c0_i32, %c0_i32_0 : i32, i32
  }
  func.func @transform_28(%arg0: i32) -> (i32, i32) {
    %c0_i32 = arith.constant 0 : i32
    %c0_i32_0 = arith.constant 0 : i32
    %c0_i32_1 = arith.constant 0 : i32
    return %c0_i32, %c0_i32_0 : i32, i32
  }
  func.func @transform_29(%arg0: i32) -> (i32, i32, i32) {
    %c0_i32 = arith.constant 0 : i32
    %c0_i32_0 = arith.constant 0 : i32
    %c0_i32_1 = arith.constant 0 : i32
    return %arg0, %c0_i32, %c0_i32_0 : i32, i32, i32
  }
}

</mosaic_0001>

<bundles_post_ra>
// kernel: tpu_custom_call.1
= control target key start
LH: loop header
LB: loop body
LE: loop exit
PB: predicated region body
PF: predicated region fallthrough
CT: control target
= control target key end

     0   :  { %s12144_s6 = smov 1   ;;  %s12145_s10 = smov 2   ;;  %s15672_s0 = inlined_call_operand.smem [shape: u32[30], index: -1, kind: input, shape index: {}] }
   0x1   :  { %s12195_s5 = sld [smem:[%s15672_s0]]   ;;  %s12146_s14 = smov 3  }
   0x2   :  { %s12200_s9 = sld [smem:[%s15672_s0 + %s12144_s6]]   ;;  %s12147_s18 = smov 4  }
   0x3   :  { %s12205_s13 = sld [smem:[%s15672_s0 + %s12145_s10]]   ;;  %s12148_s22 = smov 5  }
   0x4   :  { %s12210_s17 = sld [smem:[%s15672_s0 + %s12146_s14]]   ;;  %s12149_s26 = smov 6  }
   0x5   :  { %s12215_s21 = sld [smem:[%s15672_s0 + %s12147_s18]]   ;;  %s12150_s30 = smov 7  }
   0x6   :  { %s12220_s25 = sld [smem:[%s15672_s0 + %s12148_s22]]   ;;  %s12151_s4 = smov 8  }
   0x7   :  { %s12225_s29 = sld [smem:[%s15672_s0 + %s12149_s26]]   ;;  %s12152_s10 = smov 9  }
   0x8   :  { %s12230_s3 = sld [smem:[%s15672_s0 + %s12150_s30]]   ;;  %s12153_s15 = smov 10  }
   0x9   :  { %s12235_s8 = sld [smem:[%s15672_s0 + %s12151_s4]]   ;;  %s12154_s20 = smov 11  }
   0xa   :  { %s12240_s14 = sld [smem:[%s15672_s0 + %s12152_s10]]   ;;  %s12155_s26 = smov 12  }
   0xb   :  { %s12245_s19 = sld [smem:[%s15672_s0 + %s12153_s15]]   ;;  %s12156_s1 = smov 13  }
   0xc   :  { %s12250_s24 = sld [smem:[%s15672_s0 + %s12154_s20]]   ;;  %s12157_s7 = smov 14  }
   0xd   :  { %s12255_s30 = sld [smem:[%s15672_s0 + %s12155_s26]]   ;;  %s12158_s15 = smov 15  }
   0xe   :  { %s12260_s6 = sld [smem:[%s15672_s0 + %s12156_s1]]   ;;  %s12159_s22 = smov 16  }
   0xf   :  { %s12265_s12 = sld [smem:[%s15672_s0 + %s12157_s7]]   ;;  %s12160_s28 = smov 17  }
  0x10   :  { %s12270_s20 = sld [smem:[%s15672_s0 + %s12158_s15]]   ;;  %s12161_s7 = smov 18  }
  0x11   :  { %s12275_s27 = sld [smem:[%s15672_s0 + %s12159_s22]]   ;;  %s12162_s15 = smov 19  }
  0x12   :  { %s12280_s4 = sld [smem:[%s15672_s0 + %s12160_s28]]   ;;  %s12163_s22 = smov 20  }
  0x13   :  { %s12164_s28 = smov 21  }
  0x15   :  { %15790 = sst [smem:[#allocation17_spill]] %s12265_s12 }
  0x16   :  { %15791 = sst [smem:[#allocation18_spill]] %s12270_s20 }
  0x17   :  { %15792 = sst [smem:[#allocation19_spill]] %s12275_s27 }
  0x18   :  { %15793 = sst [smem:[#allocation20_spill]] %s12280_s4 }
  0x19   :  { %s12285_s12 = sld [smem:[%s15672_s0 + %s12161_s7]]   ;;  %s12165_s7 = smov 22  }
  0x1a   :  { %s12290_s20 = sld [smem:[%s15672_s0 + %s12162_s15]]   ;;  %s12166_s15 = smov 23  }
  0x1b   :  { %s12295_s27 = sld [smem:[%s15672_s0 + %s12163_s22]]   ;;  %s12167_s22 = smov 24  }
  0x1c   :  { %s12300_s4 = sld [smem:[%s15672_s0 + %s12164_s28]]   ;;  %s12168_s28 = smov 25  }
  0x1f   :  { %15794 = sst [smem:[#allocation21_spill]] %s12285_s12 }
  0x20   :  { %15795 = sst [smem:[#allocation22_spill]] %s12290_s20 }
  0x21   :  { %15796 = sst [smem:[#allocation23_spill]] %s12295_s27 }
  0x22   :  { %15797 = sst [smem:[#allocation24_spill]] %s12300_s4 }
  0x23   :  { %s12305_s12 = sld [smem:[%s15672_s0 + %s12165_s7]]   ;;  %s12169_s7 = smov 26  }
  0x24   :  { %s12310_s20 = sld [smem:[%s15672_s0 + %s12166_s15]]   ;;  %s12170_s15 = smov 27  }
  0x25   :  { %s12315_s27 = sld [smem:[%s15672_s0 + %s12167_s22]]   ;;  %s12171_s22 = smov 28  }
  0x26   :  { %s12320_s4 = sld [smem:[%s15672_s0 + %s12168_s28]]   ;;  %s12172_s28 = smov 29  }
  0x29   :  { %15798 = sst [smem:[#allocation25_spill]] %s12305_s12 }
  0x2a   :  { %15799 = sst [smem:[#allocation26_spill]] %s12310_s20 }
  0x2b   :  { %15800 = sst [smem:[#allocation27_spill]] %s12315_s27 }
  0x2c   :  { %15801 = sst [smem:[#allocation28_spill]] %s12320_s4 }
  0x2d   :  { %s12325_s12 = sld [smem:[%s15672_s0 + %s12169_s7]]  }
  0x2e   :  { %s12330_s20 = sld [smem:[%s15672_s0 + %s12170_s15]]  }
  0x2f   :  { %s12335_s27 = sld [smem:[%s15672_s0 + %s12171_s22]]  }
  0x30   :  { %s12340_s4 = sld [smem:[%s15672_s0 + %s12172_s28]]  }
  0x31   :  { %64 = vsyncpa [#allocation3], 0 }
  0x32   :  { %65 = vsyncpa [#allocation5], 0 }
  0x33   :  { %66 = vsyncpa [#allocation8], 0 }
  0x34   :  { %67 = vsyncpa [#allocation11], 0  ;;  %s12342_s7 = smov 0  }
  0x35 LB: > { %s12173_s10 = smov [#allocation4]   ;;  %s10811_s15 = sadd.s32 4294967295, %s12142_s7   ;;  %s12142_s7 = sphi %s12342_s7, %s73_s7  }
  0x36   : > { %s751_s11 = sshll.u32 %s12173_s10, 4  ;;  %p10813_p0 = scmp.ge.s32.totalorder %s12142_s7, 1  ;;  %s12356_s11 = int_to_ptr.vmem [resolvable:$true] %s751_s11 }
  0x37   : > { %p718_p1 = scmp.lt.s32.totalorder %s12142_s7, 3  ;;  %p12352_p2 = scmp.eq.s32.totalorder %s10811_s15, 0 }
  0x38   : > { %s12174_s18 = smov [#allocation7]   ;;  %s12175_s26 = smov [#allocation10]  }
  0x39   : > { %s15802_s0 = scalar_select %p12352_p2, 1, 0 }
  0x3a   : > { %p12358_p3 = pnand %p10813_p0, %p718_p1  ;;  %s772_s22 = sshll.u32 %s12174_s18, 4  ;;  %s12364_s22 = int_to_ptr.vmem [resolvable:$true] %s772_s22 }
  0x3b   : > { %s799_s28 = sshll.u32 %s12175_s26, 4  ;;  %s12176_s1 = smov [#allocation2]   ;;  %s12372_s28 = int_to_ptr.vmem [resolvable:$true] %s799_s28 }
  0x3c   : > { %s15803_s16 = scalar_select %p12358_p3, 1, 0 }
  0x3d   : > { %p11630_p4 = pneg %p12358_p3  ;;  %s12374_s2 = sshll.u32 %s12176_s1, 4  ;;  %s741_s2 = int_to_ptr.vmem [resolvable:$true] %s12374_s2 }
  0x3e   : > { %s11924_s10 = scalar_lea.hbm %s12220_s25, 32 }
  0x3f   : > { %p12368_p5 = pnand %p12352_p2, %p11630_p4  ;;  %p11925_p6 = scmp.ne.s32.totalorder %s12220_s25, %s11924_s10 }
  0x40   : > { %p11931_p10 = scmp.lt.u32.totalorder %s11924_s10, %s12220_s25 }
  0x41   : > { %p12380_p7 = pneg %p12368_p5 }
  0x43   : > { %p11927_p8 = pnand %p12380_p7, %p11925_p6 }
  0x45   : > { %p11928_p9 = pneg %p11927_p8 }
  0x47   : > { %p11933_p11 = pnand %p11931_p10, %p11928_p9 }
  0x49   : > { %11936 = shalt.err (!%p11933_p11)
}
  0x4a   : > { %s11937_s26 = scalar_lea.vmem %s12356_s11, 32  ;;  %p11945_p1 = scmp.lt.s32.totalorder %s12356_s11, %s12356_s11 }
  0x4b   : > { %p11938_p12 = scmp.ne.s32.totalorder %s12356_s11, %s11937_s26  ;;  %p11946_p4 = scmp.lt.s32.totalorder %s11937_s26, %s11937_s26 }
  0x4d   : > { %p11940_p13 = pnand %p11938_p12, %p12380_p7  ;;  %p11947_p2 = por %p11946_p4, %p11945_p1 }
  0x4f   : > { %p11941_p0 = pneg %p11940_p13 }
  0x51   : > { %p11948_p3 = pnand %p11947_p2, %p11941_p0 }
  0x53   : > { %11951 = shalt.err (!%p11948_p3)
}
  0x54   : > { %11636 = dma.hbm_to_vmem [thread:$0]  (!%p12368_p5), %s12220_s25, 32, %s12356_s11, [#allocation5]  }
  0x55   : > { %s11952_s1 = scalar_lea.hbm %s12230_s3, 256 }
  0x56   : > { %p11953_p6 = scmp.ne.s32.totalorder %s12230_s3, %s11952_s1  ;;  %p11959_p10 = scmp.lt.u32.totalorder %s11952_s1, %s12230_s3 }
  0x58   : > { %p11955_p8 = pnand %p11953_p6, %p12380_p7 }
  0x5a   : > { %p11956_p9 = pneg %p11955_p8 }
  0x5c   : > { %p11961_p11 = pnand %p11959_p10, %p11956_p9 }
  0x5e   : > { %11964 = shalt.err (!%p11961_p11)
}
  0x5f   : > { %s11965_s10 = scalar_lea.vmem %s12364_s22, 256  ;;  %p11973_p13 = scmp.lt.s32.totalorder %s12364_s22, %s12364_s22 }
  0x60   : > { %p11966_p2 = scmp.ne.s32.totalorder %s12364_s22, %s11965_s10  ;;  %p11974_p0 = scmp.lt.s32.totalorder %s11965_s10, %s11965_s10 }
  0x62   : > { %p11968_p3 = pnand %p11966_p2, %p12380_p7  ;;  %p11975_p1 = por %p11974_p0, %p11973_p13 }
  0x64   : > { %p11969_p12 = pneg %p11968_p3 }
  0x66   : > { %p11976_p4 = pnand %p11975_p1, %p11969_p12 }
  0x68   : > { %11979 = shalt.err (!%p11976_p4)
}
  0x69   : > { %s12177_s11 = smov 128   ;;  %s12178_s26 = smov 8  }
  0x6a   : > { %11642 = dma.hbm_to_vmem [thread:$0]  (!%p12368_p5), %s12230_s3, 256, %s12364_s22, [#allocation8], %s12177_s11, %s12177_s11, %s12178_s26  }
  0x6b   : > { %s11980_s1 = scalar_lea.hbm %s12245_s19, 512 }
  0x6c   : > { %p11981_p6 = scmp.ne.s32.totalorder %s12245_s19, %s11980_s1  ;;  %p11987_p10 = scmp.lt.u32.totalorder %s11980_s1, %s12245_s19 }
  0x6e   : > { %p11983_p8 = pnand %p11981_p6, %p12380_p7 }
  0x70   : > { %p11984_p9 = pneg %p11983_p8 }
  0x72   : > { %p11989_p11 = pnand %p11987_p10, %p11984_p9 }
  0x74   : > { %11992 = shalt.err (!%p11989_p11)
}
  0x75   : > { %s11993_s10 = scalar_lea.vmem %s12372_s28, 512  ;;  %p12001_p13 = scmp.lt.s32.totalorder %s12372_s28, %s12372_s28 }
  0x76   : > { %p11994_p2 = scmp.ne.s32.totalorder %s12372_s28, %s11993_s10  ;;  %p12002_p0 = scmp.lt.s32.totalorder %s11993_s10, %s11993_s10 }
  0x78   : > { %p11996_p3 = pnand %p11994_p2, %p12380_p7  ;;  %p12003_p1 = por %p12002_p0, %p12001_p13 }
  0x7a   : > { %p11997_p12 = pneg %p11996_p3 }
  0x7c   : > { %p12004_p4 = pnand %p12003_p1, %p11997_p12 }
  0x7e   : > { %12007 = shalt.err (!%p12004_p4)
}
  0x7f   : > { %11648 = dma.hbm_to_vmem [thread:$0]  (!%p12368_p5), %s12245_s19, 512, %s12372_s28, [#allocation11], %s12177_s11, %s12177_s11, %s12178_s26  }
  0x80   : > { %s12008_s22 = scalar_lea.hbm %s12215_s21, 32 }
  0x81   : > { %p12009_p6 = scmp.ne.s32.totalorder %s12215_s21, %s12008_s22  ;;  %p12015_p10 = scmp.lt.u32.totalorder %s12008_s22, %s12215_s21 }
  0x83   : > { %p12011_p8 = pnand %p12009_p6, %p12380_p7 }
  0x85   : > { %p12012_p9 = pneg %p12011_p8 }
  0x87   : > { %p12017_p11 = pnand %p12015_p10, %p12012_p9 }
  0x89   : > { %12020 = shalt.err (!%p12017_p11)
}
  0x8a   : > { %s12021_s1 = scalar_lea.vmem %s741_s2, 32  ;;  %p12029_p13 = scmp.lt.s32.totalorder %s741_s2, %s741_s2 }
  0x8b   : > { %p12022_p2 = scmp.ne.s32.totalorder %s741_s2, %s12021_s1  ;;  %p12030_p0 = scmp.lt.s32.totalorder %s12021_s1, %s12021_s1 }
  0x8d   : > { %p12024_p3 = pnand %p12022_p2, %p12380_p7  ;;  %p12031_p1 = por %p12030_p0, %p12029_p13 }
  0x8f   : > { %p12025_p12 = pneg %p12024_p3 }
  0x91   : > { %p12032_p4 = pnand %p12031_p1, %p12025_p12 }
  0x93   : > { %12035 = shalt.err (!%p12032_p4)
}
  0x94   : > { %11633 = dma.hbm_to_vmem [thread:$0]  (!%p12368_p5), %s12215_s21, 32, %s741_s2, [#allocation3]  }
  0x95   : > { %s12179_s28 = smov [#allocation6]   ;;  %s12180_s26 = smov [#allocation9]  }
  0x96   : > { %s762_s11 = sshll.u32 %s12179_s28, 4  ;;  %s786_s10 = sshll.u32 %s12180_s26, 4  ;;  %s763_s11 = int_to_ptr.vmem [resolvable:$true] %s762_s11  ;;  %s787_s10 = int_to_ptr.vmem [resolvable:$true] %s786_s10 }
  0x97   : > { %s12036_s22 = scalar_lea.hbm %s12225_s29, 16 }
  0x98   : > { %p12037_p6 = scmp.ne.s32.totalorder %s12225_s29, %s12036_s22  ;;  %p12043_p10 = scmp.lt.u32.totalorder %s12036_s22, %s12225_s29 }
  0x9a   : > { %p12039_p8 = pnand %p12037_p6, %p12380_p7 }
  0x9c   : > { %p12040_p9 = pneg %p12039_p8 }
  0x9e   : > { %p12045_p11 = pnand %p12043_p10, %p12040_p9 }
  0xa0   : > { %12048 = shalt.err (!%p12045_p11)
}
  0xa1   : > { %s12049_s1 = scalar_lea.vmem %s763_s11, 16  ;;  %s12056_s2 = scalar_lea.vmem %s763_s11, 32 }
  0xa2   : > { %p12050_p2 = scmp.ne.s32.totalorder %s763_s11, %s12049_s1  ;;  %p12057_p13 = scmp.lt.s32.totalorder %s763_s11, %s763_s11 }
  0xa3   : > { %p12058_p0 = scmp.lt.s32.totalorder %s12056_s2, %s12049_s1 }
  0xa4   : > { %p12052_p3 = pnand %p12050_p2, %p12380_p7 }
  0xa5   : > { %p12059_p1 = por %p12058_p0, %p12057_p13 }
  0xa6   : > { %p12053_p12 = pneg %p12052_p3 }
  0xa8   : > { %p12060_p4 = pnand %p12059_p1, %p12053_p12 }
  0xaa   : > { %12063 = shalt.err (!%p12060_p4)
}
  0xab   : > { %11639 = dma.hbm_to_vmem [thread:$0]  (!%p12368_p5), %s12225_s29, 16, %s763_s11, [#allocation5]  }
  0xac   : > { %s12064_s28 = scalar_lea.hbm %s12235_s8, 16 }
  0xad   : > { %p12065_p6 = scmp.ne.s32.totalorder %s12235_s8, %s12064_s28  ;;  %p12071_p10 = scmp.lt.u32.totalorder %s12064_s28, %s12235_s8 }
  0xaf   : > { %p12067_p8 = pnand %p12065_p6, %p12380_p7 }
  0xb1   : > { %p12068_p9 = pneg %p12067_p8 }
  0xb3   : > { %p12073_p11 = pnand %p12071_p10, %p12068_p9 }
  0xb5   : > { %12076 = shalt.err (!%p12073_p11)
}
  0xb6   : > { %s12077_s26 = scalar_lea.vmem %s787_s10, 16  ;;  %s12084_s22 = scalar_lea.vmem %s787_s10, 32 }
  0xb7   : > { %p12078_p2 = scmp.ne.s32.totalorder %s787_s10, %s12077_s26  ;;  %p12085_p13 = scmp.lt.s32.totalorder %s787_s10, %s787_s10 }
  0xb8   : > { %p12086_p0 = scmp.lt.s32.totalorder %s12084_s22, %s12077_s26 }
  0xb9   : > { %p12080_p3 = pnand %p12078_p2, %p12380_p7 }
  0xba   : > { %p12087_p1 = por %p12086_p0, %p12085_p13 }
  0xbb   : > { %p12081_p12 = pneg %p12080_p3 }
  0xbd   : > { %p12088_p4 = pnand %p12087_p1, %p12081_p12 }
  0xbf   : > { %12091 = shalt.err (!%p12088_p4)
}
  0xc0   : > { %11645 = dma.hbm_to_vmem [thread:$0]  (!%p12368_p5), %s12235_s8, 16, %s787_s10, [#allocation8]  }
  0xc1   : > { %s12181_s11 = smov [#allocation12]   ;;  %s12092_s2 = scalar_lea.hbm %s12255_s30, 16 }
  0xc2   : > { %s816_s1 = sshll.u32 %s12181_s11, 4  ;;  %p12093_p6 = scmp.ne.s32.totalorder %s12255_s30, %s12092_s2  ;;  %s817_s1 = int_to_ptr.vmem [resolvable:$true] %s816_s1 }
  0xc3   : > { %p12099_p10 = scmp.lt.u32.totalorder %s12092_s2, %s12255_s30 }
  0xc4   : > { %p12095_p8 = pnand %p12093_p6, %p12380_p7 }
  0xc6   : > { %p12096_p9 = pneg %p12095_p8 }
  0xc8   : > { %p12101_p11 = pnand %p12099_p10, %p12096_p9 }
  0xca   : > { %12104 = shalt.err (!%p12101_p11)
}
  0xcb   : > { %s12105_s28 = scalar_lea.vmem %s817_s1, 16  ;;  %s12112_s26 = scalar_lea.vmem %s817_s1, 32 }
  0xcc   : > { %p12106_p2 = scmp.ne.s32.totalorder %s817_s1, %s12105_s28  ;;  %p12113_p13 = scmp.lt.s32.totalorder %s817_s1, %s817_s1 }
  0xcd   : > { %p12114_p0 = scmp.lt.s32.totalorder %s12112_s26, %s12105_s28 }
  0xce   : > { %p12108_p3 = pnand %p12106_p2, %p12380_p7 }
  0xcf   : > { %p12115_p1 = por %p12114_p0, %p12113_p13 }
  0xd0   : > { %p12109_p12 = pneg %p12108_p3 }
  0xd2   : > { %p12116_p4 = pnand %p12115_p1, %p12109_p12 }
  0xd4   : > { %12119 = shalt.err (!%p12116_p4)
}
  0xd5   : > { %11651 = dma.hbm_to_vmem [thread:$0]  (!%p12368_p5), %s12255_s30, 16, %s817_s1, [#allocation11]  }
  0xd6   : > { %p15806_p6 = scmp.ne.s32.totalorder %s15803_s16, 0 }
  0xd8   : > { %887 = sbr.rel (%p15806_p6) target bundleno = 4875 (0x130b), region = 136 }
  0xdf   : > { %p15807_p8 = scmp.ne.s32.totalorder %s15802_s0, 0 }
  0xe1   : > { %12125 = dma.done.wait (%p15807_p8), [#allocation3], 32  }
  0xe2   : > { %12127 = vsyncadd (%p15807_p8), [#allocation3], 4294967264 }
  0xe3   : > { %12129 = dma.done.wait (%p15807_p8), [#allocation5], 48  }
  0xe4   : > { %12131 = vsyncadd (%p15807_p8), [#allocation5], 4294967248 }
  0xe5   : > { %12133 = dma.done.wait (%p15807_p8), [#allocation8], 272  }
  0xe6   : > { %12135 = vsyncadd (%p15807_p8), [#allocation8], 4294967024 }
  0xe7   : > { %12137 = dma.done.wait (%p15807_p8), [#allocation11], 528  }
  0xe8   : > { %12139 = vsyncadd (%p15807_p8), [#allocation11], 4294966768  ;;  %s989_s16 = smul.u32 3, %s10811_s15  ;;  %v15679_v0 = vmov 0.0|0.0   ;;  %vm12183_vm0 = vmmov 0   ;;  %v15682_v1 = vmov 0.0   ;;  %v15681_v2 = vlaneseq }
  0xe9   : > { %11386 = vmatprep.subr.bf16.mxu0 %v15679_v0  ;;  %11124 = vmatprep.mubr.msk.f32.mxu0 %vm12183_vm0, %v15682_v1  ;;  %v12185_v3 = vmov 1966171168   ;;  %v1264_v7 = vld [vmem:[%s12200_s9] sm:$0xff]  ;;  %v1265_v8 = vld [vmem:[%s12200_s9 + $0x8] sm:$0xff]  ;;  %v1266_v9 = vld [vmem:[%s12200_s9 + $0x10] sm:$0xff]  ;;  %vm2188_vm1 = vcmask 10240  }
  0xea   : > { %p990_p5 = scmp.lt.s32.totalorder %s989_s16, 5  ;;  %v1017_v4 = vunpack.c.l.s4 %v12185_v3  ;;  %11410 = vmatprep.subr.bf16.mxu1 %v15679_v0  ;;  %11143 = vmatprep.mubr.msk.f32.mxu1 %vm12183_vm0, %v15682_v1  ;;  %v12497_v6 = vshrl.u32 %v15681_v2, 7  ;;  %v11387_v10 = vpack.c.bf16 %v1265_v8, %v1264_v7  ;;  %v1267_v11 = vld [vmem:[%s12200_s9 + $0x18] sm:$0xff]  ;;  %v1268_v14 = vld [vmem:[%s12200_s9 + $0x20] sm:$0xff]  ;;  %v1269_v15 = vld [vmem:[%s12200_s9 + $0x28] sm:$0xff]  ;;  %vm2184_vm2 = vcmask 15360  }
  0xeb   : > { %v11390_v13 = vpack.c.bf16 %v1267_v11, %v1266_v9  ;;  %v11393_v22 = vpack.c.bf16 %v1269_v15, %v1268_v14  ;;  %v1270_v25 = vld [vmem:[%s12200_s9 + $0x30] sm:$0xff]  ;;  %v1271_v26 = vld [vmem:[%s12200_s9 + $0x38] sm:$0xff]  ;;  %v1272_v35 = vld [vmem:[%s12200_s9 + $0x40] sm:$0xff]  ;;  %vm2256_vm3 = vcmask 1042432   ;;  %vm12186_vm4 = vmmov 1   ;;  %s15881_s23 = sld [smem:[#allocation18_spill]] }
  0xec   : > { %s16005_s16 = smov (!%p990_p5, %s989_s16), 5  ;;  %v1018_v5 = vunpack.c.0.s8 %v1017_v4  ;;  %11388 = vmatpush3.bf16.msra.mxu0 %v11387_v10  ;;  %v1273_v36 = vld [vmem:[%s12200_s9 + $0x48] sm:$0xff]  ;;  %v11396_v42 = vpack.c.bf16 %v1271_v26, %v1270_v25  ;;  %v1274_v55 = vld [vmem:[%s12200_s9 + $0x50] sm:$0xff]  ;;  %v1275_v56 = vld [vmem:[%s12200_s9 + $0x58] sm:$0xff]  ;;  %vm2229_vm6 = vcmask 130112   ;;  %vm2249_vm7 = vcmask 1041409  }
  0xed   : > { %s10904_s15 = sshll.u32 %s16005_s16, 4  ;;  %11389 = vmatprep.subr.bf16.mxu0 %v15679_v0  ;;  %v11399_v51 = vpack.c.bf16 %v1273_v36, %v1272_v35  ;;  %v11402_v9 = vpack.c.bf16 %v1275_v56, %v1274_v55  ;;  %v1278_v56 = vld [vmem:[%s12200_s9 + $0x70] sm:$0xff]  ;;  %vm12971_vm5 = vmpackc.low %vm2256_vm3, %vm12186_vm4  ;;  %vm2251_vm8 = vcmask 1042434   ;;  %vm2253_vm9 = vcmask 89088   ;;  %s15883_s18 = sld [smem:[#allocation17_spill]] }
  0xee   : > { %s12507_s0 = scalar_lea.vmem %s12195_s5, %s10904_s15  ;;  %v12510_v12 = vsub.s32 %v1018_v5, %v12497_v6  ;;  %vm2335_vm10 = vcmask 1041408   ;;  %vm4794_vm11 = vcmask 261120   ;;  %vm5521_vm12 = vcmask 130048   ;;  %s15884_s10 = sld [smem:[#allocation20_spill]] }
  0xef   : > { %v12516_v16 = vld [vmem:[%s12507_s0] sm:$0xff]  ;;  %v12519_v17 = vld [vmem:[%s12507_s0 + $0x8] sm:$0x7]  ;;  %v12526_v20 = vld [vmem:[%s12507_s0 + $0x10] sm:$0xff]  ;;  %s15885_s22 = sld [smem:[#allocation22_spill]]  ;;  %s15886_s11 = sld [smem:[#allocation19_spill]] }
  0xf0   : > { %v1015_v18 = vcombine.high %v12516_v16, %v12516_v16  ;;  %v1022_v19 = vrot.slane %v12516_v16, %v12510_v12  ;;  %v1070_v21 = vrot.slane %v12519_v17, %v12510_v12  ;;  %11391 = vmatpush3.bf16.msra.mxu0 %v11390_v13  ;;  %v1087_v23 = vcombine.high %v12526_v20, %v12526_v20  ;;  %v12560_v41 = vld [vmem:[%s12507_s0 + $0x18] sm:$0x7]  ;;  %v12585_v50 = vld [vmem:[%s12507_s0 + $0x20] sm:$0xff]  ;;  %v12637_v26 = vld [vmem:[%s12507_s0 + $0x28] sm:$0x7]  ;;  %s15887_s1 = sld [smem:[#allocation21_spill]] }
  0xf1   : > { %v1094_v24 = vrot.slane %v12526_v20, %v12510_v12  ;;  %11392 = vmatprep.subr.bf16.mxu0 %v15679_v0  ;;  %v1142_v54 = vrot.slane %v12560_v41, %v12510_v12  ;;  %v1166_v3 = vrot.slane %v12585_v50, %v12510_v12  ;;  %s15888_s2 = sld [smem:[#allocation23_spill]]  ;;  %vm7424_vm13 = vcmask 1040384   ;;  %s15922_s28 = sld [smem:[#allocation26_spill]] }
  0xf2   : > { %v1029_v27 = vrot.slane %v1015_v18, %v12510_v12  ;;  %v1030_v28 = vcombine.high %v1022_v19, %v1022_v19  ;;  %v12539_v29 = vrot.slane %v1022_v19, %v12510_v12  ;;  %v1071_v30 = vcombine.high %v1070_v21, %v1070_v21  ;;  %v1276_v19 = vld [vmem:[%s12200_s9 + $0x60] sm:$0xff]  ;;  %s15928_s26 = sld [smem:[#allocation24_spill]]  ;;  %s15929_s0 = sld [smem:[#allocation25_spill]] }
  0xf3   : > { %v12542_v31 = vrot.slane %v1070_v21, %v12510_v12  ;;  %v1101_v32 = vrot.slane %v1087_v23, %v12510_v12  ;;  %v1102_v33 = vcombine.high %v1094_v24, %v1094_v24  ;;  %v12546_v34 = vrot.slane %v1094_v24, %v12510_v12  ;;  %v1277_v21 = vld [vmem:[%s12200_s9 + $0x68] sm:$0xff] }
  0xf4   : > { %15808 = vst [vmem:[#allocation29_spill] sm:$0xff] %v12539_v29  ;;  %v1031_v37 = vcombine.high %v1029_v27, %v1029_v27  ;;  %v12551_v38 = vrot.slane %v1029_v27, %v12510_v12  ;;  %v12554_v39 = vrot.slane %v1030_v28, %v12510_v12  ;;  %v12557_v40 = vrot.slane %v1071_v30, %v12510_v12 }
  0xf5   : > { %15809 = vst [vmem:[#allocation30_spill] sm:$0xff] %v12542_v31  ;;  %15810 = vst [vmem:[#allocation31_spill] sm:$0xff] %v12546_v34  ;;  %11394 = vmatpush3.bf16.msra.mxu0 %v11393_v22  ;;  %v12564_v43 = vcombine.high %v12542_v31, %v12542_v31  ;;  %v12567_v44 = vrot.slane %v1102_v33, %v12510_v12  ;;  %v12571_v45 = vcombine.high %v12546_v34, %v12546_v34 }
  0xf6   : > { %15811 = vst [vmem:[#allocation32_spill] sm:$0xff] %v12551_v38  ;;  %15812 = vst [vmem:[#allocation33_spill] sm:$0xff] %v12554_v39  ;;  %11395 = vmatprep.subr.bf16.mxu0 %v15679_v0  ;;  %v12575_v46 = vrot.slane %v1031_v37, %v12510_v12  ;;  %v1280_v47 = vcombine.low %v12539_v29, %v12554_v39  ;;  %v10834_v48 = vcombine.high %v12539_v29, %v12554_v39 }
  0xf7   : > { %15813 = vst [vmem:[#allocation34_spill] sm:$0xff] %v12557_v40  ;;  %15814 = vst [vmem:[#allocation35_spill] sm:$0xff] %v12564_v43  ;;  %v12582_v49 = vrot.slane %v1101_v32, %v12510_v12  ;;  %v12589_v52 = vcombine.high %v12567_v44, %v12567_v44  ;;  %v1103_v53 = vcombine.high %v1101_v32, %v1101_v32 }
  0xf8   : > { %15815 = vst [vmem:[#allocation36_spill] sm:$0xff] %v12567_v44  ;;  %15816 = vst [vmem:[#allocation37_spill] sm:$0xff] %v12571_v45  ;;  %v1282_v57 = vcombine.low %v12551_v38, %v12575_v46  ;;  %v10835_v58 = vcombine.high %v12551_v38, %v12575_v46  ;;  %v1329_v59 = vcombine.low %v12542_v31, %v12557_v40 }
  0xf9   : > { %15817 = vst [vmem:[#allocation38_spill] sm:$0xff] %v12575_v46  ;;  %15818 = vst [vmem:[#allocation39_spill] sm:$0xff] %v12582_v49  ;;  %v1330_v60 = vcombine.low %v12564_v43, %v12546_v34  ;;  %11397 = vmatpush3.bf16.msra.mxu0 %v11396_v42  ;;  %v1290_v61 = vrot.slane %v1280_v47, %v12510_v12  ;;  %v1297_v62 = vrot.slane %v10834_v48, %v12510_v12 }
  0xfa   : > { %15819 = vst [vmem:[#allocation40_spill] sm:$0xff] %v12589_v52  ;;  %v1331_v63 = vcombine.low %v12567_v44, %v12571_v45  ;;  %11398 = vmatprep.subr.bf16.mxu0 %v15679_v0  ;;  %v1304_v4 = vrot.slane %v1282_v57, %v12510_v12  ;;  %v1311_v5 = vrot.slane %v10835_v58, %v12510_v12  ;;  %v1279_v57 = vld [vmem:[%s12200_s9 + $0x78] sm:$0xff] }
  0xfb   : > { %v1332_v7 = vcombine.low %v12589_v52, %v12582_v49  ;;  %v12615_v8 = vrot.slane %v1103_v53, %v12510_v12  ;;  %v12619_v10 = vcombine.high %v12582_v49, %v12582_v49  ;;  %v1143_v11 = vcombine.high %v1142_v54, %v1142_v54 }
  0xfc   : > { %v1339_v13 = vrot.slane %v1329_v59, %v12510_v12  ;;  %v1346_v14 = vrot.slane %v1330_v60, %v12510_v12  ;;  %v12628_v18 = vrot.slane %v1142_v54, %v12510_v12  ;;  %v1312_v22 = vcombine.low %v1290_v61, %v1297_v62 }
  0xfd   : > { %15820 = vst [vmem:[#allocation41_spill] sm:$0xff] %v12615_v8  ;;  %15821 = vst [vmem:[#allocation42_spill] sm:$0xff] %v12619_v10  ;;  %v12625_v15 = vcombine.high %v12615_v8, %v12615_v8  ;;  %11400 = vmatpush3.bf16.msra.mxu0 %v11399_v51  ;;  %v1353_v23 = vrot.slane %v1331_v63, %v12510_v12  ;;  %v12634_v24 = vrot.slane %v1143_v11, %v12510_v12 }
  0xfe   : > { %15823 = vst [vmem:[#allocation44_spill] sm:$0xff] %v12628_v18  ;;  %v1174_v25 = vcombine.high %v1166_v3, %v1166_v3  ;;  %11401 = vmatprep.subr.bf16.mxu0 %v15679_v0  ;;  %v1313_v27 = vcombine.low %v1304_v4, %v1311_v5  ;;  %v1360_v28 = vrot.slane %v1332_v7, %v12510_v12 }
  0xff   : > { %15822 = vst [vmem:[#allocation43_spill] sm:$0xff] %v12625_v15  ;;  %15824 = vst [vmem:[#allocation45_spill] sm:$0xff] %v12634_v24  ;;  %v12643_v30 = vcombine.high %v12628_v18, %v12628_v18  ;;  %v12646_v32 = vrot.slane %v1166_v3, %v12510_v12  ;;  %v1378_v35 = vcombine.low %v12615_v8, %v12619_v10 }
 0x100   : > { %v12649_v33 = vrot.slane %v1174_v25, %v12510_v12  ;;  %v1379_v36 = vcombine.low %v12625_v15, %v12628_v18  ;;  %v1159_v37 = vcombine.high %v12585_v50, %v12585_v50  ;;  %v11405_v42 = vpack.c.bf16 %v1277_v21, %v1276_v19 }
 0x101   : > { %15825 = vst [vmem:[#allocation46_spill] sm:$0xff] %v12643_v30  ;;  %15826 = vst [vmem:[#allocation47_spill] sm:$0xff] %v12646_v32  ;;  %v1380_v47 = vcombine.low %v12634_v24, %v12643_v30  ;;  %v1214_v48 = vrot.slane %v12637_v26, %v12510_v12  ;;  %11403 = vmatpush3.bf16.msra.mxu0 %v11402_v9  ;;  %v1320_v51 = vrot.slane %v1312_v22, %v12510_v12 }
 0x102   : > { %15827 = vst [vmem:[#allocation48_spill] sm:$0xff] %v12649_v33  ;;  %v1361_v53 = vcombine.low %v1339_v13, %v1346_v14  ;;  %v1381_v54 = vcombine.low %v12646_v32, %v12649_v33  ;;  %v1173_v55 = vrot.slane %v1159_v37, %v12510_v12  ;;  %11404 = vmatprep.subr.bf16.mxu0 %v15679_v0 }
 0x103   : > { %v1327_v58 = vrot.slane %v1313_v27, %v12510_v12  ;;  %v1362_v59 = vcombine.low %v1353_v23, %v1360_v28  ;;  %v1215_v60 = vcombine.high %v1214_v48, %v1214_v48  ;;  %v12670_v61 = vrot.slane %v1214_v48, %v12510_v12 }
 0x104   : > { %v1388_v62 = vrot.slane %v1378_v35, %v12510_v12  ;;  %v1395_v63 = vrot.slane %v1379_v36, %v12510_v12  ;;  %v1175_v3 = vcombine.high %v1173_v55, %v1173_v55  ;;  %v12675_v4 = vrot.slane %v1173_v55, %v12510_v12 }
 0x105   : > { %15828 = vst [vmem:[#allocation49_spill] sm:$0xff] %v12670_v61  ;;  %v1402_v5 = vrot.slane %v1380_v47, %v12510_v12  ;;  %v1409_v7 = vrot.slane %v1381_v54, %v12510_v12  ;;  %v12680_v9 = vrot.slane %v1215_v60, %v12510_v12  ;;  %v10836_v11 = vcombine.high %v12646_v32, %v12649_v33 }
 0x106   : > { %15829 = vst [vmem:[#allocation50_spill] sm:$0xff] %v12675_v4  ;;  %11406 = vmatpush3.bf16.msra.mxu0 %v11405_v42  ;;  %v11408_v13 = vpack.c.bf16 %v1279_v57, %v1278_v56  ;;  %v12685_v14 = vrot.slane %v1175_v3, %v12510_v12  ;;  %v1369_v19 = vrot.slane %v1361_v53, %v12510_v12  ;;  %v10838_v3 = vld [vmem:[%s12205_s13] ss:$0 sm:$0xff] }
 0x107   : > { %15830 = vst [vmem:[#allocation51_spill] sm:$0xff] %v12680_v9  ;;  %11407 = vmatprep.subr.bf16.mxu0 %v15679_v0  ;;  %v1430_v21 = vcombine.low %v12670_v61, %v12680_v9  ;;  %v12691_v22 = vcombine.low %v1320_v51, %v1327_v58  ;;  %v1376_v23 = vrot.slane %v1362_v59, %v12510_v12 }
 0x108   : > { %15831 = vst [vmem:[#allocation52_spill] sm:$0xff] %v12685_v14  ;;  %v1428_v25 = vcombine.low %v12675_v4, %v12685_v14  ;;  %v10837_v27 = vcombine.high %v12675_v4, %v12685_v14  ;;  %v1410_v28 = vcombine.low %v1388_v62, %v1395_v63  ;;  %v1411_v35 = vcombine.low %v1402_v5, %v1409_v7 }
 0x109   : > { %15832 = vst [vmem:[#allocation53_spill] sm:$0xff] %v12691_v22  ;;  %v1437_v36 = vrot.slane %v10836_v11, %v12510_v12  ;;  %v1458_v37 = vrot.slane %v1430_v21, %v12510_v12  ;;  %v12703_v48 = vcombine.low %v1369_v19, %v1376_v23  ;;  %v12717_v59 = vcombine.high %v12670_v61, %v12670_v61 }
 0x10a   : > { %11409 = vmatpush3.bf16.msra.mxu0 %v11408_v13  ;;  %v1444_v42 = vrot.slane %v1428_v25, %v12510_v12  ;;  %v1451_v47 = vrot.slane %v10837_v27, %v12510_v12  ;;  %v1418_v51 = vrot.slane %v1410_v28, %v12510_v12  ;;  %v1425_v53 = vrot.slane %v1411_v35, %v12510_v12 }
 0x10b   : > { %11444 = vmatprep.subr.bf16.mxu0 %v15679_v0  ;;  %15833 = vst [vmem:[#allocation54_spill] sm:$0xff] %v12703_v48  ;;  %15835 = vst [vmem:[#allocation56_spill] sm:$0xff] %v12717_v59  ;;  %v1482_v62 = vrot.slane %v12717_v59, %v12510_v12  ;;  %v1839_v5 = vcombine.high %v10838_v3, %v10838_v3  ;;  %v1846_v7 = vrot.slane %v10838_v3, %v12510_v12 }
 0x10c   : > { %v1459_v54 = vcombine.low %v1437_v36, %v1444_v42  ;;  %v1460_v55 = vcombine.low %v1451_v47, %v1458_v37  ;;  %v12711_v56 = vcombine.low %v1418_v51, %v1425_v53 }
 0x10d   : > { %11125 = vmatmul.mubr.f32.vlgmr.msra.gmra.mrb[0].mxu0 %v12691_v22  ;;  %v12730_v63 = vrot.slane %v1482_v62, %v12510_v12  ;;  %v1853_v11 = vrot.slane %v1839_v5, %v12510_v12  ;;  %v1854_v13 = vcombine.high %v1846_v7, %v1846_v7  ;;  %v12741_v23 = vrot.slane %v1846_v7, %v12510_v12 }
 0x10e   : > { %11127 = vmatprep.mubr.msk.f32.mxu0 %vm12183_vm0, %v15682_v1  ;;  %15834 = vst [vmem:[#allocation55_spill] sm:$0xff] %v12711_v56  ;;  %v1467_v57 = vrot.slane %v1459_v54, %v12510_v12  ;;  %v1474_v58 = vrot.slane %v1460_v55, %v12510_v12 }
 0x10f   : > { %15837 = vst [vmem:[#allocation58_spill] sm:$0xff] %v12730_v63  ;;  %v1855_v19 = vcombine.high %v1853_v11, %v1853_v11  ;;  %v12744_v25 = vrot.slane %v1853_v11, %v12510_v12  ;;  %v12747_v27 = vrot.slane %v1854_v13, %v12510_v12  ;;  %v12757_v53 = vcombine.high %v12741_v23, %v12741_v23 }
 0x110   : > { %v12722_v60 = vcombine.low %v1467_v57, %v1474_v58 }
 0x111   : > { %11128 = vmatmul.mubr.f32.gmra.mrb[2].mxu0 %v12703_v48  ;;  %v12751_v37 = vrot.slane %v1855_v19, %v12510_v12  ;;  %v12761_v54 = vcombine.high %v12744_v25, %v12744_v25  ;;  %v12765_v55 = vcombine.high %v12747_v27, %v12747_v27 }
 0x112   : > { %11130 = vmatprep.mubr.msk.f32.mxu0 %vm12183_vm0, %v15682_v1  ;;  %15836 = vst [vmem:[#allocation57_spill] sm:$0xff] %v12722_v60 }
 0x113   : > { %v12771_v11 = vcombine.high %v12751_v37, %v12751_v37 }
 0x115   : > { %11131 = vmatmul.mubr.f32.gmra.mrb[4].mxu0 %v12711_v56 }
 0x116   : > { %11133 = vmatprep.mubr.msk.f32.mxu0 %vm12183_vm0, %v15682_v1 }
 0x119   : > { %11134 = vmatmul.mubr.f32.gmra.mrb[6].mxu0 %v12722_v60 }
 0x11a   : > { %11136 = vmatprep.mubr.msk.f32.mxu0 %vm12183_vm0, %v15682_v1 }
 0x11d   : > { %11137 = vmatmul.mubr.f32.gmra.mrb[8].mxu0 %v12730_v63 }
 0x11e   : > { %11240 = vmatprep.mubr.msk.f32.mxu0 %vm12183_vm0, %v15682_v1 }
 0x1e0   : > { %v1561_v21 = vpop.f32.mrb[0].mxu0 }
 0x1e1   : > { %v1590_v28 = vcombine.high %v1561_v21, %v1561_v21  ;;  %v1597_v35 = vrot.slane %v1561_v21, %v12510_v12  ;;  %v11126_v36 = vpop.f32.mrb[1].mxu0 }
 0x1e3   : > { %v1604_v42 = vrot.slane %v1590_v28, %v12510_v12  ;;  %v1605_v47 = vcombine.high %v1597_v35, %v1597_v35  ;;  %v1613_v51 = vrot.slane %v1597_v35, %v12510_v12 }
 0x1e4   : > { %v1566_v57 = vpop.f32.mrb[2].mxu0 }
 0x1e5   : > { %v1606_v58 = vcombine.high %v1604_v42, %v1604_v42  ;;  %v1620_v62 = vrot.slane %v1604_v42, %v12510_v12  ;;  %v1627_v3 = vrot.slane %v1605_v47, %v12510_v12  ;;  %v1635_v5 = vcombine.high %v1613_v51, %v1613_v51  ;;  %v11129_v7 = vpop.f32.mrb[3].mxu0 }
 0x1e6   : > { %v12774_v13 = vadd.f32 %v12741_v23, %v1613_v51  ;;  %v1639_v19 = vcombine.high %v1566_v57, %v1566_v57  ;;  %v1646_v21 = vrot.slane %v1566_v57, %v12510_v12 }
 0x1e7   : > { %v1634_v28 = vrot.slane %v1606_v58, %v12510_v12  ;;  %v1636_v35 = vcombine.high %v1620_v62, %v1620_v62  ;;  %v1637_v36 = vcombine.high %v1627_v3, %v1627_v3  ;;  %v12779_v42 = vadd.f32 %v12747_v27, %v1627_v3 }
 0x1e8   : > { %v12782_v47 = vadd.f32 %v12757_v53, %v1635_v5  ;;  %v12785_v7 = vadd.f32 %v12744_v25, %v1620_v62  ;;  %v1653_v0 = vrot.slane %v1639_v19, %v12510_v12  ;;  %v1654_v51 = vcombine.high %v1646_v21, %v1646_v21  ;;  %v1571_v2 = vpop.f32.mrb[4].mxu0 }
 0x1e9   : > { %v1638_v1 = vcombine.high %v1634_v28, %v1634_v28  ;;  %v12789_v57 = vadd.f32 %v12765_v55, %v1637_v36  ;;  %v12792_v58 = vadd.f32 %v12751_v37, %v1634_v28  ;;  %v12795_v3 = vadd.f32 %v12761_v54, %v1636_v35  ;;  %v11132_v9 = vpop.f32.mrb[5].mxu0 }
 0x1ea   : > { %v1655_v62 = vcombine.high %v1653_v0, %v1653_v0  ;;  %v1662_v59 = vrot.slane %v1646_v21, %v12510_v12  ;;  %v1669_v19 = vrot.slane %v1653_v0, %v12510_v12  ;;  %v1676_v35 = vrot.slane %v1654_v51, %v12510_v12 }
 0x1eb   : > { %v12802_v61 = vadd.f32 %v12771_v11, %v1638_v1  ;;  %v1688_v36 = vcombine.high %v1571_v2, %v1571_v2  ;;  %v15841_v38 = vcombine.low %v12785_v7, %v12792_v58 }
 0x1ec   : > { %v1683_v9 = vrot.slane %v1655_v62, %v12510_v12  ;;  %v1684_v49 = vcombine.high %v1662_v59, %v1662_v59  ;;  %v1685_v5 = vcombine.high %v1669_v19, %v1669_v19  ;;  %v12811_v18 = vadd.f32 %v12741_v23, %v1662_v59  ;;  %v1576_v21 = vpop.f32.mrb[6].mxu0 }
 0x1ed   : > { %v1686_v0 = vcombine.high %v1676_v35, %v1676_v35  ;;  %v12814_v1 = vadd.f32 %v12747_v27, %v1676_v35  ;;  %v12817_v30 = vadd.f32 %v12747_v27, %v1669_v19  ;;  %v11135_v15 = vpop.f32.mrb[7].mxu0  ;;  %v1695_v59 = vrot.slane %v1571_v2, %v12510_v12 }
 0x1ee   : > { %v1687_v28 = vcombine.high %v1683_v9, %v1683_v9  ;;  %v12820_v51 = vadd.f32 %v12757_v53, %v1683_v9  ;;  %v12823_v62 = vadd.f32 %v12765_v55, %v1685_v5  ;;  %v1702_v35 = vrot.slane %v1688_v36, %v12510_v12 }
 0x1ef   : > { %v12827_v24 = vadd.f32 %v12741_v23, %v1686_v0  ;;  %v1737_v10 = vcombine.high %v1576_v21, %v1576_v21  ;;  %v1744_v19 = vrot.slane %v1576_v21, %v12510_v12  ;;  %v1703_v8 = vcombine.high %v1695_v59, %v1695_v59 }
 0x1f0   : > { %v1711_v15 = vrot.slane %v1695_v59, %v12510_v12  ;;  %v12833_v52 = vadd.f32 %v12744_v25, %v1687_v28  ;;  %v1581_v9 = vpop.f32.mrb[8].mxu0  ;;  %v12836_v5 = vadd.f32 %v12757_v53, %v1684_v49  ;;  %v1704_v45 = vcombine.high %v1702_v35, %v1702_v35 }
 0x1f1   : > { %v1718_v2 = vrot.slane %v1702_v35, %v12510_v12  ;;  %v1751_v0 = vrot.slane %v1737_v10, %v12510_v12  ;;  %v1752_v34 = vcombine.high %v1744_v19, %v1744_v19  ;;  %v11138_v36 = vpop.f32.mrb[9].mxu0  ;;  %v1725_v44 = vrot.slane %v1703_v8, %v12510_v12 }
 0x1f2   : > { %v1733_v21 = vcombine.high %v1711_v15, %v1711_v15  ;;  %v12842_v43 = vadd.f32 %v12751_v37, %v1711_v15  ;;  %v1760_v28 = vrot.slane %v1744_v19, %v12510_v12  ;;  %v1732_v59 = vrot.slane %v1704_v45, %v12510_v12 }
 0x1f3   : > { %v1734_v40 = vcombine.high %v1718_v2, %v1718_v2  ;;  %v12847_v49 = vadd.f32 %v12747_v27, %v1718_v2  ;;  %v1753_v31 = vcombine.high %v1751_v0, %v1751_v0  ;;  %v1735_v35 = vcombine.high %v1725_v44, %v1725_v44 }
 0x1f4   : > { %v12850_v10 = vadd.f32 %v12761_v54, %v1725_v44  ;;  %v12853_v36 = vadd.f32 %v12771_v11, %v1733_v21  ;;  %v2036_v8 = vcombine.low %v12833_v52, %v12842_v43  ;;  %v1736_v15 = vcombine.high %v1732_v59, %v1732_v59 }
 0x1f5   : > { %v12858_v19 = vadd.f32 %v12741_v23, %v1734_v40  ;;  %v1767_v45 = vrot.slane %v1751_v0, %v12510_v12  ;;  %v1774_v2 = vrot.slane %v1752_v34, %v12510_v12  ;;  %v12863_v14 = vadd.f32 %v12741_v23, %v1735_v35 }
 0x1f6   : > { %v1781_v44 = vrot.slane %v1753_v31, %v12510_v12  ;;  %v1782_v33 = vcombine.high %v1760_v28, %v1760_v28  ;;  %v12867_v21 = vadd.f32 %v12757_v53, %v1760_v28  ;;  %v12870_v46 = vadd.f32 %v12747_v27, %v1736_v15 }
 0x1f7   : > { %v1783_v4 = vcombine.high %v1767_v45, %v1767_v45  ;;  %v1784_v32 = vcombine.high %v1774_v2, %v1774_v2  ;;  %v12873_v40 = vadd.f32 %v12765_v55, %v1774_v2  ;;  %v12879_v35 = vadd.f32 %v12761_v54, %v1767_v45 }
 0x1f8   : > { %v1785_v0 = vcombine.high %v1781_v44, %v1781_v44  ;;  %v12876_v34 = vadd.f32 %v12744_v25, %v1782_v33  ;;  %v12882_v31 = vadd.f32 %v12771_v11, %v1781_v44  ;;  %v1792_v2 = vrot.slane %v1581_v9, %v12510_v12 }
 0x1f9   : > { %v12885_v28 = vadd.f32 %v12751_v37, %v1784_v32  ;;  %v12888_v15 = vadd.f32 %v12741_v23, %v1783_v4  ;;  %v2107_v55 = vcombine.low %v12867_v21, %v12873_v40  ;;  %v2011_v25 = vcombine.low %v12811_v18, %v12814_v1 }
 0x1fa   : > { %15838 = vst [vmem:[#allocation59_spill] sm:$0xff] %v12882_v31  ;;  %v2109_v33 = vcombine.low %v12879_v35, %v12882_v31  ;;  %v2025_v54 = vrot.slane %v12836_v5, %v12510_v12  ;;  %v1965_v32 = vcombine.low %v12795_v3, %v12802_v61  ;;  %v1799_v23 = vrot.slane %v1792_v2, %v12510_v12 }
 0x1fb   : > { %v2108_v4 = vcombine.low %v12876_v34, %v12885_v28  ;;  %v15839_v37 = vcombine.low %v12774_v13, %v12779_v42  ;;  %v15840_v9 = vcombine.low %v12782_v47, %v12789_v57  ;;  %v2018_v44 = vrot.slane %v2011_v25, %v12510_v12 }
 0x1fc   : > { %v1986_v39 = vrot.slane %v15841_v38, %v12510_v12  ;;  %v1993_v2 = vrot.slane %v1965_v32, %v12510_v12  ;;  %v2034_v29 = vcombine.low %v12827_v24, %v12817_v30  ;;  %v2037_v25 = vcombine.low %v12850_v10, %v12853_v36 }
 0x1fd   : > { %v1972_v11 = vrot.slane %v15839_v37, %v12510_v12  ;;  %v1979_v45 = vrot.slane %v15840_v9, %v12510_v12  ;;  %v12921_v37 = vadd.f32 %v12757_v53, %v1799_v23  ;;  %v2035_v9 = vcombine.low %v12820_v51, %v12823_v62 }
 0x1fe   : > { %v2026_v60 = vcombine.low %v2018_v44, %v2025_v54  ;;  %v1995_v56 = vcombine.low %v1986_v39, %v1993_v2  ;;  %v2044_v48 = vrot.slane %v2034_v29, %v12510_v12  ;;  %v2058_v38 = vrot.slane %v2036_v8, %v12510_v12 }
 0x1ff   : > { %v1994_v63 = vcombine.low %v1972_v11, %v1979_v45  ;;  %v2051_v22 = vrot.slane %v2035_v9, %v12510_v12  ;;  %v2065_v23 = vrot.slane %v2037_v25, %v12510_v12  ;;  %v12933_v11 = vadd.f32 %v12757_v53, %v1732_v59 }
 0x200   : > { %v2033_v45 = vrot.slane %v2026_v60, %v12510_v12  ;;  %v2009_v31 = vrot.slane %v1995_v56, %v12510_v12  ;;  %v2083_v39 = vcombine.low %v12863_v14, %v12847_v49  ;;  %v2106_v29 = vcombine.low %v12858_v19, %v12870_v46 }
 0x201   : > { %v2002_v32 = vrot.slane %v1994_v63, %v12510_v12  ;;  %v2066_v8 = vcombine.low %v2044_v48, %v2051_v22  ;;  %v2067_v54 = vcombine.low %v2058_v38, %v2065_v23  ;;  %v2097_v63 = vrot.slane %v12933_v11, %v12510_v12 }
 0x202   : > { %v2123_v44 = vrot.slane %v2107_v55, %v12510_v12  ;;  %v2189_v53 = vsel %vm2188_vm1, %v2033_v45, 0.0  ;;  %v2090_v60 = vrot.slane %v2083_v39, %v12510_v12  ;;  %v2116_v56 = vrot.slane %v2106_v29, %v12510_v12 }
 0x203   : > { %v2010_v59 = vcombine.low %v2002_v32, %v2009_v31  ;;  %2190 = vadd.xlane.f32.xlu0 %v2189_v53  ;;  %v2074_v2 = vrot.slane %v2066_v8, %v12510_v12  ;;  %v2081_v9 = vrot.slane %v2067_v54, %v12510_v12  ;;  %v2130_v22 = vrot.slane %v2108_v4, %v12510_v12 }
 0x204   : > { %v2137_v48 = vrot.slane %v2109_v33, %v12510_v12  ;;  %v2098_v25 = vcombine.low %v2090_v60, %v2097_v63  ;;  %v2138_v38 = vcombine.low %v2116_v56, %v2123_v44  ;;  %v12952_v55 = vadd.f32 %v12747_v27, %v1785_v0  ;;  %v2210_v60 = vld [vmem:[%s12210_s17] sm:$0xff]  ;;  %v2211_v56 = vld [vmem:[%s12210_s17 + $0x8] sm:$0x7] }
 0x205   : > { %v2082_v23 = vcombine.low %v2074_v2, %v2081_v9  ;;  %v2185_v32 = vsel %vm2184_vm2, %v2010_v59, 0.0  ;;  %v2169_v39 = vrot.slane %v12921_v37, %v12510_v12  ;;  %v11411_v2 = vpack.c.bf16 %v2211_v56, %v2210_v60 }
 0x206   : > { %v2139_v31 = vcombine.low %v2130_v22, %v2137_v48  ;;  %v2155_v45 = vcombine.low %v12888_v15, %v12952_v55  ;;  %v2105_v33 = vrot.slane %v2098_v25, %v12510_v12  ;;  %v2146_v27 = vrot.slane %v2138_v38, %v12510_v12 }
 0x207   : > { %2186 = vadd.xlane.f32.xlu0 %v2185_v32  ;;  %v2192_v4 = vsel %vm2184_vm2, %v2082_v23, 0.0  ;;  %v15842_v9 = vmov 0  ;;  %11413 = vmatpush3.bf16.msk.msra.mxu1 %vm12971_vm5, %v11411_v2  ;;  %v15845_v22 = vmov 0.0   ;;  %v15846_v25 = vlaneseq }
 0x208   : > { %v2153_v0 = vrot.slane %v2139_v31, %v12510_v12  ;;  %2193 = vadd.xlane.f32.xlu1 %v2192_v4  ;;  %v2162_v29 = vrot.slane %v2155_v45, %v12510_v12  ;;  %v2195_v63 = vsel %vm2188_vm1, %v2105_v33, 0.0  ;;  %v15843_v9 = vsel %vm12971_vm5, 4294967295, %v15842_v9  ;;  %11146 = vmatprep.subr.mxu1 %v15845_v22 }
 0x209   : > { %15844 = vst [vmem:[#allocation60_spill] sm:$0xff] %v15843_v9  ;;  %v2219_v38 = vand.u32 127, %v15846_v25 }
 0x20a   : > { %v2154_v8 = vcombine.low %v2146_v27, %v2153_v0  ;;  %v2170_v54 = vcombine.low %v2162_v29, %v2169_v39 }
 0x20b   : > { %v2224_v32 = vadd.s32 4294967288, %v2219_v38  ;;  %v12980_v45 = vsub.s32 %v2219_v38, %v12497_v6 }
 0x20c   : > { %v2198_v44 = vsel %vm2184_vm2, %v2154_v8, 0.0  ;;  %2196 = vadd.xlane.f32.xlu1 %v2195_v63  ;;  %v2177_v53 = vrot.slane %v2170_v54, %v12510_v12 }
 0x20d   : > { %2199 = vadd.xlane.f32.xlu0 %v2198_v44  ;;  %15847 = vst [vmem:[#allocation61_spill] sm:$0xff] %v12980_v45  ;;  %v12983_v0 = vsub.s32 %v2224_v32, %v12497_v6 }
 0x20e   : > { %v2201_v59 = vsel %vm2188_vm1, %v2177_v53, 0.0 }
 0x20f   : > { %15848 = vst [vmem:[#allocation62_spill] sm:$0xff] %v12983_v0 }
 0x210   : > { %2202 = vadd.xlane.f32.xlu1 %v2201_v59 }
 0x290   : > { %v2191_v48 = vpop.xlane.xlu0 %2190 }
 0x291   : > { %v2205_v8 = vmul.f32 0.5, %v2191_v48 }
 0x293   : > { %v2228_v56 = vrot.slane %v2205_v8, %v12983_v0 }
 0x294   : > { %v2187_v23 = vpop.xlane.xlu0 %2186 }
 0x295   : > { %v2194_v31 = vpop.xlane.xlu1 %2193  ;;  %v2204_v39 = vmul.f32 0.5, %v2187_v23 }
 0x296   : > { %v2206_v4 = vmul.f32 0.5, %v2194_v31 }
 0x297   : > { %v2223_v44 = vrot.slane %v2204_v39, %v12980_v45  ;;  %v2331_v39 = vld [vmem:[#allocation2] sm:$0x3] }
 0x298   : > { %v2234_v53 = vrot.slane %v2206_v4, %v12980_v45  ;;  %v15849_v4 = vmov 0.0|0.0  }
 0x299   : > { %v2197_v33 = vpop.xlane.xlu1 %2196  ;;  %v2230_v48 = vsel %vm2229_vm6, %v2228_v56, %v2223_v44 }
 0x29a   : > { %v2200_v27 = vpop.xlane.xlu0 %2199  ;;  %v2207_v29 = vmul.f32 0.5, %v2197_v33 }
 0x29b   : > { %v2208_v63 = vmul.f32 0.5, %v2200_v27 }
 0x29c   : > { %v2238_v54 = vrot.slane %v2207_v29, %v12983_v0 }
 0x29d   : > { %v2203_v59 = vpop.xlane.xlu1 %2202  ;;  %v2243_v25 = vrot.slane %v2208_v63, %v12980_v45 }
 0x29e   : > { %v2209_v60 = vmul.f32 0.5, %v2203_v59  ;;  %v2239_v2 = vsel %vm2229_vm6, %v2238_v54, %v2234_v53  ;;  %v13005_v59 = vsub.s32 1, %v12497_v6 }
 0x29f   : > { %v2250_v31 = vsel %vm2249_vm7, %v2239_v2, %v2230_v48 }
 0x2a0   : > { %v2247_v38 = vrot.slane %v2209_v60, %v12983_v0  ;;  %v13008_v60 = vsub.s32 0, %v12497_v6 }
 0x2a2   : > { %v2248_v23 = vsel %vm2229_vm6, %v2247_v38, %v2243_v25  ;;  %v13013_v38 = vsub.s32 2, %v12497_v6 }
 0x2a3   : > { %v2252_v32 = vsel %vm2251_vm8, %v2248_v23, %v2250_v31  ;;  %v13018_v23 = vpack.c.bf16 %v12519_v17, %v12516_v16  ;;  %v3705_v31 = vld [vmem:[#allocation4] sm:$0x3]  ;;  %v13036_v16 = vpack.c.bf16 %v12637_v26, %v12585_v50  ;;  %v13047_v17 = vsub.s32 3, %v12497_v6 }
 0x2a4   : > { %11144 = vmatmul.mubr.msk.f32.vlgmr.msra.gmra.mrb[0].mxu1 %vm2253_vm9, %v2252_v32  ;;  %15850 = vst [vmem:[#allocation63_spill] sm:$0xff] %v13013_v38  ;;  %v13025_v32 = vpack.c.bf16 %v12560_v41, %v12526_v20  ;;  %v13050_v20 = vsub.s32 4, %v12497_v6  ;;  %v13053_v41 = vsub.s32 5, %v12497_v6  ;;  %v13056_v50 = vsub.s32 6, %v12497_v6 }
 0x2a5   : > { %11148 = vmatprep.mubr.msk.f32.mxu1 %vm12183_vm0, %v15845_v22  ;;  %11147 = vmatpush3.msk.msra.mxu1 %vm2335_vm10, %v2331_v39  ;;  %15851 = vst [vmem:[#allocation64_spill] sm:$0xff] %v13018_v23  ;;  %15853 = vst [vmem:[#allocation66_spill] sm:$0xff] %v13036_v16  ;;  %v13059_v26 = vsub.s32 7, %v12497_v6 }
 0x2a6   : > { %11414 = vmatprep.subr.bf16.mxu1 %v15849_v4  ;;  %15852 = vst [vmem:[#allocation65_spill] sm:$0xff] %v13025_v32  ;;  %15854 = vst [vmem:[#allocation67_spill] sm:$0xff] %v13047_v17 }
 0x2a7   : > { %15855 = vst [vmem:[#allocation68_spill] sm:$0xff] %v13050_v20  ;;  %15856 = vst [vmem:[#allocation69_spill] sm:$0xff] %v13053_v41 }
 0x2a8   : > { %15857 = vst [vmem:[#allocation70_spill] sm:$0xff] %v13056_v50 }
 0x377   : > { %v2326_v33 = vpop.f32.mrb[0].mxu1 }
 0x378   : > { %v2330_v27 = vmax.f32 %v2326_v33, 0.0  ;;  %v11145_v29 = vpop.f32.mrb[1].mxu1 }
 0x37a   : > { %11149 = vmatmul.mubr.msk.f32.vlgmr.msra.gmra.mrb[2].mxu1 %vm2184_vm2, %v2330_v27 }
 0x37b   : > { %11155 = vmatprep.mubr.msk.f32.mxu1 %vm12183_vm0, %v15845_v22  ;;  %11417 = vmatpush3.bf16.msk.msra.mxu1 %vm12971_vm5, %v13018_v23 }
 0x37c   : > { %11418 = vmatprep.subr.bf16.mxu1 %v15849_v4 }
 0x37e   : > { %11156 = vmatmul.mubr.msk.f32.vlgmr.msra.gmra.mrb[4].mxu1 %vm2253_vm9, %v3705_v31 }
 0x37f   : > { %11421 = vmatpush3.bf16.msk.msra.mxu1 %vm12971_vm5, %v13025_v32  ;;  %11162 = vmatprep.mubr.msk.f32.mxu1 %vm12183_vm0, %v15845_v22 }
 0x380   : > { %11422 = vmatprep.subr.bf16.mxu1 %v15849_v4 }
 0x382   : > { %11163 = vmatmul.mubr.msk.f32.vlgmr.msra.gmra.mrb[6].mxu1 %vm2253_vm9, %v3705_v31 }
 0x383   : > { %11425 = vmatpush3.bf16.msk.msra.mxu1 %vm12971_vm5, %v13036_v16  ;;  %11169 = vmatprep.mubr.msk.f32.mxu1 %vm12183_vm0, %v15845_v22 }
 0x386   : > { %11170 = vmatmul.mubr.msk.f32.vlgmr.msra.gmra.mrb[8].mxu1 %vm2253_vm9, %v3705_v31 }
 0x44d   : > { %v2405_v8 = vpop.f32.mrb[2].mxu1 }
 0x44e   : > { %v10843_v54 = vmul.f32 -1.442695, %v2405_v8  ;;  %v11150_v63 = vpop.f32.mrb[3].mxu1 }
 0x450   : > { %11720 = vpow2.f32 %v10843_v54 }
 0x45a   : > { %v11721_v44 = vpop.eup %11720 }
 0x45b   : > { %v2412_v53 = vadd.f32 1.0, %v11721_v44 }
 0x45d   : > { %11722 = vrcp.f32 %v2412_v53 }
 0x467   : > { %v11723_v56 = vpop.eup %11722 }
 0x468   : > { %v2429_v2 = vrot.slane %v11723_v56, %v13005_v59  ;;  %v2418_v25 = vrot.slane %v11723_v56, %v13008_v60  ;;  %v2440_v48 = vrot.slane %v11723_v56, %v13013_v38 }
 0x46a   : > { %2431 = vbcast.lane.b32.xlu1 %v2429_v2, 256  ;;  %2420 = vbcast.lane.b32.xlu0 %v2418_v25, 256 }
 0x46e   : > { %2424 = vbcast.lane.b32.xlu1 %v2418_v25, 264  ;;  %2435 = vbcast.lane.b32.xlu0 %v2429_v2, 264 }
 0x472   : > { %2442 = vbcast.lane.b32.xlu1 %v2440_v48, 256 }
 0x476   : > { %2446 = vbcast.lane.b32.xlu1 %v2440_v48, 264 }
 0x4dc   : > { %v2432_v39 = vpop.permute.xlu1 %2431  ;;  %v13061_v33 = vpop.permute.xlu0 %2420 }
 0x4dd   : > { %v2501_v27 = vrot.slane %v2432_v39, %v13008_v60  ;;  %v2505_v29 = vrot.slane %v2432_v39, %v13005_v59  ;;  %v2509_v8 = vrot.slane %v2432_v39, %v13013_v38  ;;  %v2513_v54 = vrot.slane %v2432_v39, %v13047_v17 }
 0x4de   : > { %v2517_v63 = vrot.slane %v2432_v39, %v13050_v20  ;;  %v2521_v44 = vrot.slane %v2432_v39, %v13053_v41  ;;  %v2525_v53 = vrot.slane %v2432_v39, %v13056_v50  ;;  %v2529_v6 = vrot.slane %v2432_v39, %v13059_v26 }
 0x4df   : > { %v13072_v56 = vmul.f32 %v2501_v27, %v12827_v24  ;;  %v13075_v2 = vmul.f32 %v2505_v29, %v12817_v30  ;;  %v13078_v25 = vmul.f32 %v2509_v8, %v12820_v51  ;;  %v13081_v48 = vmul.f32 %v2513_v54, %v12823_v62 }
 0x4e0   : > { %v2425_v31 = vpop.permute.xlu1 %2424  ;;  %v13083_v45 = vpop.permute.xlu0 %2435  ;;  %v13086_v0 = vmul.f32 %v2517_v63, %v12833_v52  ;;  %v13089_v39 = vmul.f32 %v2521_v44, %v12842_v43  ;;  %v13092_v24 = vmul.f32 %v2525_v53, %v12850_v10  ;;  %v13095_v30 = vmul.f32 %v2529_v6, %v12853_v36 }
 0x4e1   : > { %v2489_v51 = vrot.slane %v2425_v31, %v13008_v60  ;;  %v2493_v62 = vrot.slane %v2425_v31, %v13005_v59  ;;  %v2497_v27 = vrot.slane %v2425_v31, %v13013_v38  ;;  %v2533_v29 = vrot.slane %v13083_v45, %v13008_v60 }
 0x4e2   : > { %v2537_v52 = vrot.slane %v13083_v45, %v13005_v59  ;;  %v2757_v43 = vcombine.low %v13072_v56, %v13075_v2  ;;  %v2758_v10 = vcombine.low %v13078_v25, %v13081_v48  ;;  %v2759_v53 = vcombine.low %v13086_v0, %v13089_v39 }
 0x4e3   : > { %v13109_v36 = vmul.f32 %v2489_v51, %v12811_v18  ;;  %v13114_v54 = vmul.f32 %v2493_v62, %v12814_v1  ;;  %v13117_v63 = vmul.f32 %v2497_v27, %v12836_v5  ;;  %v2760_v6 = vcombine.low %v13092_v24, %v13095_v30 }
 0x4e4   : > { %v13119_v44 = vpop.permute.xlu1 %2442  ;;  %v13126_v18 = vmul.f32 %v2533_v29, %v12863_v14  ;;  %v13129_v31 = vmul.f32 %v2537_v52, %v12847_v49  ;;  %v2767_v1 = vrot.slane %v2757_v43, %v12510_v12  ;;  %v2774_v51 = vrot.slane %v2758_v10, %v12510_v12 }
 0x4e5   : > { %v2781_v5 = vrot.slane %v2759_v53, %v12510_v12  ;;  %v2788_v62 = vrot.slane %v2760_v6, %v12510_v12  ;;  %v2457_v27 = vrot.slane %v13061_v33, %v13008_v60  ;;  %v2461_v8 = vrot.slane %v13061_v33, %v13005_v59 }
 0x4e6   : > { %v2789_v22 = vcombine.low %v2767_v1, %v2774_v51  ;;  %v2465_v14 = vrot.slane %v13061_v33, %v13013_v38  ;;  %v2469_v49 = vrot.slane %v13061_v33, %v13047_v17  ;;  %v2473_v29 = vrot.slane %v13061_v33, %v13050_v20 }
 0x4e7   : > { %v2790_v43 = vcombine.low %v2781_v5, %v2788_v62  ;;  %v2477_v10 = vrot.slane %v13061_v33, %v13053_v41  ;;  %v2481_v53 = vrot.slane %v13061_v33, %v13056_v50  ;;  %v2485_v6 = vrot.slane %v13061_v33, %v13059_v26 }
 0x4e8   : > { %v2447_v52 = vpop.permute.xlu1 %2446  ;;  %v2797_v16 = vrot.slane %v2789_v22, %v12510_v12  ;;  %v13157_v5 = vmul.f32 %v2457_v27, %v12774_v13  ;;  %v13160_v62 = vmul.f32 %v2461_v8, %v12779_v42  ;;  %v13163_v9 = vmul.f32 %v2465_v14, %v12782_v47 }
 0x4e9   : > { %v2577_v1 = vrot.slane %v2447_v52, %v13008_v60  ;;  %v2581_v51 = vrot.slane %v2447_v52, %v13005_v59  ;;  %v2585_v4 = vrot.slane %v2447_v52, %v13013_v38  ;;  %v2804_v32 = vrot.slane %v2790_v43, %v12510_v12 }
 0x4ea   : > { %v2734_v33 = vcombine.low %v13109_v36, %v13114_v54  ;;  %v13174_v22 = vmul.f32 %v2469_v49, %v12789_v57  ;;  %v13177_v27 = vmul.f32 %v2473_v29, %v12785_v7  ;;  %v13180_v42 = vmul.f32 %v2477_v10, %v12792_v58 }
 0x4eb   : > { %v13168_v23 = vmul.f32 %v2577_v1, %v12888_v15  ;;  %v13171_v52 = vmul.f32 %v2581_v51, %v12952_v55  ;;  %v2805_v13 = vcombine.low %v2797_v16, %v2804_v32  ;;  %v13183_v47 = vmul.f32 %v2481_v53, %v12795_v3 }
 0x4ec   : > { %v2806_v15 = vcombine.low %v13126_v18, %v13129_v31  ;;  %v13188_v8 = vmul.f32 %v2485_v6, %v12802_v61  ;;  %v2685_v57 = vcombine.low %v13157_v5, %v13160_v62  ;;  %v2686_v55 = vcombine.low %v13163_v9, %v13174_v22 }
 0x4ed   : > { %15858 = vst [vmem:[#allocation71_spill] sm:$0xff] %v13183_v47  ;;  %v13195_v7 = vmul.f32 %v2585_v4, %v12921_v37  ;;  %v2878_v58 = vcombine.low %v13168_v23, %v13171_v52  ;;  %v2913_v3 = vsel %vm2184_vm2, %v2805_v13, -inf  ;;  %v2687_v32 = vcombine.low %v13177_v27, %v13180_v42 }
 0x4ee   : > { %15859 = vst [vmem:[#allocation72_spill] sm:$0xff] %v13188_v8  ;;  %2914 = vmax.xlane.f32.xlu1 %v2913_v3  ;;  %v2688_v61 = vcombine.low %v13183_v47, %v13188_v8  ;;  %v2695_v16 = vrot.slane %v2685_v57, %v12510_v12  ;;  %v2702_v14 = vrot.slane %v2686_v55, %v12510_v12 }
 0x4ef   : > { %v2545_v37 = vrot.slane %v13119_v44, %v13008_v60  ;;  %v2709_v4 = vrot.slane %v2687_v32, %v12510_v12  ;;  %v2741_v49 = vrot.slane %v2734_v33, %v12510_v12  ;;  %v2549_v29 = vrot.slane %v13119_v44, %v13005_v59 }
 0x4f0   : > { %v2553_v43 = vrot.slane %v13119_v44, %v13013_v38  ;;  %v2716_v10 = vrot.slane %v2688_v61, %v12510_v12  ;;  %v2717_v53 = vcombine.low %v2695_v16, %v2702_v14  ;;  %v2557_v6 = vrot.slane %v13119_v44, %v13047_v17 }
 0x4f1   : > { %v2561_v1 = vrot.slane %v13119_v44, %v13050_v20  ;;  %v2748_v51 = vrot.slane %v13117_v63, %v12510_v12  ;;  %v2565_v33 = vrot.slane %v13119_v44, %v13053_v41  ;;  %v2569_v13 = vrot.slane %v13119_v44, %v13056_v50 }
 0x4f2   : > { %v2573_v57 = vrot.slane %v13119_v44, %v13059_v26  ;;  %v2718_v55 = vcombine.low %v2709_v4, %v2716_v10  ;;  %v2725_v3 = vrot.slane %v2717_v53, %v12510_v12  ;;  %v13229_v32 = vmul.f32 %v2545_v37, %v12858_v19 }
 0x4f3   : > { %v13232_v61 = vmul.f32 %v2549_v29, %v12870_v46  ;;  %v2749_v16 = vcombine.low %v2741_v49, %v2748_v51  ;;  %v13235_v14 = vmul.f32 %v2553_v43, %v12867_v21  ;;  %v13238_v8 = vmul.f32 %v2557_v6, %v12873_v40  ;;  %v15860_v46 = vld [vmem:[#allocation59_spill] sm:$0xff] }
 0x4f4   : > { %v13241_v47 = vmul.f32 %v2561_v1, %v12876_v34  ;;  %v2732_v44 = vrot.slane %v2718_v55, %v12510_v12  ;;  %v13245_v4 = vmul.f32 %v2565_v33, %v12885_v28  ;;  %v13248_v19 = vmul.f32 %v2569_v13, %v12879_v35 }
 0x4f5   : > { %v13251_v37 = vmul.f32 %v2573_v57, %v15860_v46  ;;  %v2829_v21 = vcombine.low %v13229_v32, %v13232_v61  ;;  %v2830_v40 = vcombine.low %v13235_v14, %v13238_v8  ;;  %v2885_v34 = vrot.slane %v2878_v58, %v12510_v12 }
 0x4f6   : > { %v2892_v49 = vrot.slane %v13195_v7, %v12510_v12  ;;  %v15861_v28 = vrot.slane %v13083_v45, %v13013_v38  ;;  %v2733_v29 = vcombine.low %v2725_v3, %v2732_v44  ;;  %v2831_v43 = vcombine.low %v13241_v47, %v13245_v4 }
 0x4f7   : > { %v2832_v10 = vcombine.low %v13248_v19, %v13251_v37  ;;  %v2756_v53 = vrot.slane %v2749_v16, %v12510_v12  ;;  %v2839_v58 = vrot.slane %v2829_v21, %v12510_v12  ;;  %v2846_v6 = vrot.slane %v2830_v40, %v12510_v12 }
 0x4f8   : > { %v13264_v35 = vmul.f32 %v15861_v28, %v12933_v11  ;;  %v2893_v1 = vcombine.low %v2885_v34, %v2892_v49  ;;  %v2907_v51 = vsel %vm2184_vm2, %v2733_v29, -inf  ;;  %v2853_v45 = vrot.slane %v2831_v43, %v12510_v12 }
 0x4f9   : > { %v2860_v11 = vrot.slane %v2832_v10, %v12510_v12  ;;  %v2813_v33 = vrot.slane %v2806_v15, %v12510_v12  ;;  %2908 = vmax.xlane.f32.xlu0 %v2907_v51  ;;  %v2861_v13 = vcombine.low %v2839_v58, %v2846_v6  ;;  %v2910_v46 = vsel %vm2188_vm1, %v2756_v53, -inf }
 0x4fa   : > { %v2900_v57 = vrot.slane %v2893_v1, %v12510_v12  ;;  %v2820_v3 = vrot.slane %v13264_v35, %v12510_v12 }
 0x4fb   : > { %v2862_v55 = vcombine.low %v2853_v45, %v2860_v11  ;;  %v2869_v16 = vrot.slane %v2861_v13, %v12510_v12 }
 0x4fc   : > { %v2922_v44 = vsel %vm2188_vm1, %v2900_v57, -inf  ;;  %v2821_v40 = vcombine.low %v2813_v33, %v2820_v3 }
 0x4fd   : > { %v2876_v21 = vrot.slane %v2862_v55, %v12510_v12  ;;  %2923 = vmax.xlane.f32.xlu1 %v2922_v44  ;;  %2911 = vmax.xlane.f32.xlu0 %v2910_v46 }
 0x4fe   : > { %v2828_v49 = vrot.slane %v2821_v40, %v12510_v12 }
 0x4ff   : > { %v2877_v15 = vcombine.low %v2869_v16, %v2876_v21 }
 0x500   : > { %v2916_v28 = vsel %vm2188_vm1, %v2828_v49, -inf }
 0x501   : > { %v2919_v34 = vsel %vm2184_vm2, %v2877_v15, -inf }
 0x502   : > { %2920 = vmax.xlane.f32.xlu0 %v2919_v34 }
 0x506   : > { %2917 = vmax.xlane.f32.xlu0 %v2916_v28 }
 0x57b   : > { %v2915_v29 = vpop.xlane.xlu1 %2914 }
 0x57c   : > { %v2978_v43 = vrot.slane %v2915_v29, %v13008_v60  ;;  %v2982_v10 = vrot.slane %v2915_v29, %v13005_v59  ;;  %v2986_v53 = vrot.slane %v2915_v29, %v13013_v38  ;;  %v2990_v6 = vrot.slane %v2915_v29, %v13047_v17 }
 0x57d   : > { %v2994_v1 = vrot.slane %v2915_v29, %v13050_v20  ;;  %v2998_v33 = vrot.slane %v2915_v29, %v13053_v41  ;;  %v3002_v44 = vrot.slane %v2915_v29, %v13056_v50 }
 0x57e   : > { %v3107_v58 = vsub.f32 %v13072_v56, %v2978_v43  ;;  %v3108_v51 = vsub.f32 %v13075_v2, %v2982_v10  ;;  %v3109_v45 = vsub.f32 %v13078_v25, %v2986_v53  ;;  %v3110_v13 = vsub.f32 %v13081_v48, %v2990_v6 }
 0x57f   : > { %v3111_v57 = vsub.f32 %v13086_v0, %v2994_v1  ;;  %v3006_v2 = vrot.slane %v2915_v29, %v13059_v26  ;;  %v3112_v25 = vsub.f32 %v13089_v39, %v2998_v33  ;;  %v13318_v6 = vsub.f32 %v13092_v24, %v3002_v44 }
 0x580   : > { %v3151_v11 = vmul.f32 1.442695, %v3107_v58  ;;  %v3153_v3 = vmul.f32 1.442695, %v3108_v51  ;;  %v3155_v16 = vmul.f32 1.442695, %v3109_v45 }
 0x581   : > { %v3157_v48 = vmul.f32 1.442695, %v3110_v13  ;;  %v3159_v40 = vmul.f32 1.442695, %v3111_v57  ;;  %v13328_v24 = vsub.f32 %v13095_v30, %v3006_v2  ;;  %v13331_v57 = vmul.f32 1.442695, %v3112_v25 }
 0x582   : > { %11724 = vpow2.f32 %v3151_v11 }
 0x583   : > { %11726 = vpow2.f32 %v3153_v3 }
 0x584   : > { %11728 = vpow2.f32 %v3155_v16 }
 0x585   : > { %11730 = vpow2.f32 %v3157_v48 }
 0x586   : > { %v13298_v55 = vpop.xlane.xlu0 %2908  ;;  %11732 = vpow2.f32 %v3159_v40 }
 0x587   : > { %v2934_v56 = vrot.slane %v13298_v55, %v13008_v60  ;;  %v2938_v49 = vrot.slane %v13298_v55, %v13005_v59  ;;  %v2942_v1 = vrot.slane %v13298_v55, %v13013_v38  ;;  %v2946_v3 = vrot.slane %v13298_v55, %v13047_v17 }
 0x588   : > { %v2950_v16 = vrot.slane %v13298_v55, %v13050_v20  ;;  %v2954_v30 = vrot.slane %v13298_v55, %v13053_v41 }
 0x589   : > { %v3096_v28 = vsub.f32 %v13157_v5, %v2934_v56  ;;  %v2962_v56 = vrot.slane %v13298_v55, %v13059_v26 }
 0x58a   : > { %v2924_v46 = vpop.xlane.xlu1 %2923  ;;  %v2912_v21 = vpop.xlane.xlu0 %2911 }
 0x58b   : > { %v2966_v0 = vrot.slane %v2912_v21, %v13008_v60  ;;  %v2970_v15 = vrot.slane %v2912_v21, %v13005_v59  ;;  %v2974_v34 = vrot.slane %v2912_v21, %v13013_v38  ;;  %v3054_v29 = vrot.slane %v2924_v46, %v13008_v60 }
 0x58c   : > { %v3058_v39 = vrot.slane %v2924_v46, %v13005_v59  ;;  %v3062_v58 = vrot.slane %v2924_v46, %v13013_v38  ;;  %v3129_v33 = vmul.f32 1.442695, %v3096_v28 }
 0x58d   : > { %v3104_v43 = vsub.f32 %v13109_v36, %v2966_v0  ;;  %v3105_v10 = vsub.f32 %v13114_v54, %v2970_v15  ;;  %v3106_v53 = vsub.f32 %v13117_v63, %v2974_v34  ;;  %v3097_v36 = vsub.f32 %v13160_v62, %v2938_v49 }
 0x58e   : > { %v3126_v54 = vsub.f32 %v13168_v23, %v3054_v29  ;;  %v3127_v63 = vsub.f32 %v13171_v52, %v3058_v39  ;;  %v3128_v13 = vsub.f32 %v13195_v7, %v3062_v58  ;;  %v3098_v62 = vsub.f32 %v13163_v9, %v2942_v1  ;;  %v13338_v52 = vpop.eup %11724  ;;  %v15863_v58 = vld [vmem:[#allocation72_spill] sm:$0xff] }
 0x58f   : > { %v13322_v51 = vpop.xlane.xlu0 %2920  ;;  %v3145_v5 = vmul.f32 1.442695, %v3104_v43  ;;  %v3147_v45 = vmul.f32 1.442695, %v3105_v10  ;;  %v3149_v11 = vmul.f32 1.442695, %v3106_v53  ;;  %v2958_v7 = vrot.slane %v13298_v55, %v13056_v50  ;;  %v13346_v44 = vpop.eup %11726 }
 0x590   : > { %v3189_v2 = vmul.f32 1.442695, %v3126_v54  ;;  %v3191_v46 = vmul.f32 1.442695, %v3127_v63  ;;  %v3131_v9 = vmul.f32 1.442695, %v3097_v36  ;;  %v13348_v25 = vpop.eup %11728  ;;  %v3099_v15 = vsub.f32 %v13174_v22, %v2946_v3 }
 0x591   : > { %11734 = vpow2.f32 %v3145_v5  ;;  %v3193_v21 = vmul.f32 1.442695, %v3128_v13  ;;  %v3100_v55 = vsub.f32 %v13177_v27, %v2950_v16  ;;  %v3133_v34 = vmul.f32 1.442695, %v3098_v62  ;;  %v13358_v39 = vpop.eup %11730  ;;  %v15862_v10 = vld [vmem:[#allocation71_spill] sm:$0xff] }
 0x592   : > { %11736 = vpow2.f32 %v3147_v45  ;;  %v3101_v43 = vsub.f32 %v13180_v42, %v2954_v30  ;;  %v3102_v53 = vsub.f32 %v15862_v10, %v2958_v7  ;;  %v3103_v1 = vsub.f32 %v15863_v58, %v2962_v56  ;;  %v13363_v22 = vpop.eup %11732 }
 0x593   : > { %v2918_v23 = vpop.xlane.xlu0 %2917  ;;  %11738 = vpow2.f32 %v3149_v11  ;;  %v3030_v11 = vrot.slane %v13322_v51, %v13013_v38  ;;  %v3034_v36 = vrot.slane %v13322_v51, %v13047_v17  ;;  %v3137_v54 = vmul.f32 1.442695, %v3100_v55 }
 0x594   : > { %11740 = vpow2.f32 %v3129_v33  ;;  %v3010_v48 = vrot.slane %v2918_v23, %v13008_v60  ;;  %v3014_v40 = vrot.slane %v2918_v23, %v13005_v59  ;;  %v3018_v0 = vrot.slane %v2918_v23, %v13013_v38 }
 0x595   : > { %11742 = vpow2.f32 %v3189_v2  ;;  %v3038_v33 = vrot.slane %v13322_v51, %v13050_v20  ;;  %v3042_v13 = vrot.slane %v13322_v51, %v13053_v41  ;;  %v3139_v3 = vmul.f32 1.442695, %v3101_v43 }
 0x596   : > { %11744 = vpow2.f32 %v3191_v46  ;;  %v3115_v49 = vsub.f32 %v13126_v18, %v3010_v48  ;;  %v3116_v28 = vsub.f32 %v13129_v31, %v3014_v40  ;;  %v3117_v29 = vsub.f32 %v13264_v35, %v3018_v0 }
 0x597   : > { %11746 = vpow2.f32 %v3193_v21  ;;  %v3022_v18 = vrot.slane %v13322_v51, %v13008_v60  ;;  %v3026_v31 = vrot.slane %v13322_v51, %v13005_v59  ;;  %v3135_v35 = vmul.f32 1.442695, %v3099_v15 }
 0x598   : > { %v3167_v27 = vmul.f32 1.442695, %v3115_v49  ;;  %v3169_v5 = vmul.f32 1.442695, %v3116_v28  ;;  %v3171_v45 = vmul.f32 1.442695, %v3117_v29  ;;  %11748 = vpow2.f32 %v3131_v9 }
 0x599   : > { %11750 = vpow2.f32 %v3133_v34  ;;  %v3046_v62 = vrot.slane %v13322_v51, %v13056_v50  ;;  %v3141_v23 = vmul.f32 1.442695, %v3102_v53  ;;  %v3050_v56 = vrot.slane %v13322_v51, %v13059_v26 }
 0x59a   : > { %11752 = vpow2.f32 %v3167_v27  ;;  %v3118_v2 = vsub.f32 %v13229_v32, %v3022_v18  ;;  %v3143_v46 = vmul.f32 1.442695, %v3103_v1  ;;  %v3119_v9 = vsub.f32 %v13232_v61, %v3026_v31 }
 0x59b   : > { %v13369_v42 = vpop.eup %11734  ;;  %11754 = vpow2.f32 %v3169_v5  ;;  %v3120_v0 = vsub.f32 %v13235_v14, %v3030_v11  ;;  %v3163_v15 = vmul.f32 1.442695, %v13318_v6  ;;  %v3165_v51 = vmul.f32 1.442695, %v13328_v24 }
 0x59c   : > { %v13375_v63 = vpop.eup %11736  ;;  %11756 = vpow2.f32 %v3171_v45  ;;  %v3121_v55 = vsub.f32 %v13238_v8, %v3034_v36  ;;  %v3122_v61 = vsub.f32 %v13241_v47, %v3038_v33  ;;  %v3123_v28 = vsub.f32 %v13245_v4, %v3042_v13 }
 0x59d   : > { %v13381_v16 = vpop.eup %11738  ;;  %v3277_v30 = vcombine.low %v13369_v42, %v13375_v63  ;;  %11758 = vpow2.f32 %v3135_v35  ;;  %v3124_v29 = vsub.f32 %v13248_v19, %v3046_v62  ;;  %v3173_v14 = vmul.f32 1.442695, %v3118_v2 }
 0x59e   : > { %v13387_v7 = vpop.eup %11740  ;;  %11760 = vpow2.f32 %v3137_v54  ;;  %v3291_v48 = vrot.slane %v13381_v16, %v12510_v12  ;;  %v3125_v6 = vsub.f32 %v13251_v37, %v3050_v56  ;;  %v3175_v8 = vmul.f32 1.442695, %v3119_v9 }
 0x59f   : > { %v3284_v21 = vrot.slane %v3277_v30, %v12510_v12  ;;  %v13396_v40 = vpop.eup %11742  ;;  %11762 = vpow2.f32 %v3139_v3  ;;  %v3177_v4 = vmul.f32 1.442695, %v3120_v0  ;;  %v3179_v37 = vmul.f32 1.442695, %v3121_v55 }
 0x5a0   : > { %v13401_v32 = vpop.eup %11744  ;;  %11764 = vpow2.f32 %v3141_v23  ;;  %v3301_v27 = vcombine.low %v13348_v25, %v13358_v39  ;;  %v3181_v5 = vmul.f32 1.442695, %v3122_v61  ;;  %v3183_v18 = vmul.f32 1.442695, %v3123_v28 }
 0x5a1   : > { %v3292_v34 = vcombine.low %v3284_v21, %v3291_v48  ;;  %v13405_v49 = vpop.eup %11746  ;;  %11766 = vpow2.f32 %v3143_v46  ;;  %v3421_v19 = vcombine.low %v13396_v40, %v13401_v32  ;;  %v3185_v31 = vmul.f32 1.442695, %v3124_v29 }
 0x5a2   : > { %15864 = vst [vmem:[#allocation59_spill] sm:$0xff] %v13405_v49  ;;  %v13409_v43 = vpop.eup %11748  ;;  %11768 = vpow2.f32 %v13331_v57  ;;  %v3300_v57 = vcombine.low %v13338_v52, %v13346_v44  ;;  %v3187_v54 = vmul.f32 1.442695, %v3125_v6  ;;  %v3317_v2 = vrot.slane %v3301_v27, %v12510_v12 }
 0x5a3   : > { %v3299_v24 = vrot.slane %v3292_v34, %v12510_v12  ;;  %v13414_v47 = vpop.eup %11750  ;;  %v3228_v10 = vcombine.low %v13387_v7, %v13409_v43  ;;  %11770 = vpow2.f32 %v3163_v15  ;;  %v3428_v33 = vrot.slane %v3421_v19, %v12510_v12 }
 0x5a4   : > { %v13420_v53 = vpop.eup %11752  ;;  %11772 = vpow2.f32 %v3165_v51  ;;  %v3310_v56 = vrot.slane %v3300_v57, %v12510_v12  ;;  %v3435_v46 = vrot.slane %v13405_v49, %v12510_v12 }
 0x5a5   : > { %v3453_v58 = vsel %vm2188_vm1, %v3299_v24, 0.0  ;;  %v13423_v1 = vpop.eup %11754  ;;  %11774 = vpow2.f32 %v3173_v14  ;;  %v3238_v36 = vrot.slane %v3228_v10, %v12510_v12 }
 0x5a6   : > { %3454 = vadd.xlane.f32.xlu1 %v3453_v58  ;;  %v13429_v45 = vpop.eup %11756  ;;  %11776 = vpow2.f32 %v3175_v8  ;;  %v3349_v35 = vcombine.low %v13420_v53, %v13423_v1  ;;  %v3436_v51 = vcombine.low %v3428_v33, %v3435_v46  ;;  %v3332_v10 = vcombine.low %v3310_v56, %v3317_v2 }
 0x5a7   : > { %v13433_v11 = vpop.eup %11758  ;;  %11778 = vpow2.f32 %v3177_v4  ;;  %v3363_v23 = vrot.slane %v13429_v45, %v12510_v12 }
 0x5a8   : > { %v13437_v13 = vpop.eup %11760  ;;  %v3229_v3 = vcombine.low %v13414_v47, %v13433_v11  ;;  %11780 = vpow2.f32 %v3179_v37  ;;  %v3356_v62 = vrot.slane %v3349_v35, %v12510_v12  ;;  %v3443_v57 = vrot.slane %v3436_v51, %v12510_v12 }
 0x5a9   : > { %v13444_v30 = vpop.eup %11762  ;;  %11782 = vpow2.f32 %v3181_v5 }
 0x5aa   : > { %v13450_v9 = vpop.eup %11764  ;;  %v3230_v21 = vcombine.low %v13437_v13, %v13444_v30  ;;  %v3245_v48 = vrot.slane %v3229_v3, %v12510_v12  ;;  %11784 = vpow2.f32 %v3183_v18  ;;  %v3364_v0 = vcombine.low %v3356_v62, %v3363_v23 }
 0x5ab   : > { %v13455_v15 = vpop.eup %11766  ;;  %11786 = vpow2.f32 %v3185_v31  ;;  %v3340_v3 = vrot.slane %v3332_v10, %v12510_v12  ;;  %v3465_v46 = vsel %vm2188_vm1, %v3443_v57, 0.0 }
 0x5ac   : > { %v13457_v55 = vpop.eup %11768  ;;  %v3231_v61 = vcombine.low %v13450_v9, %v13455_v15  ;;  %v3252_v34 = vrot.slane %v3230_v21, %v12510_v12  ;;  %v3260_v28 = vcombine.low %v3238_v36, %v3245_v48  ;;  %11788 = vpow2.f32 %v3187_v54 }
 0x5ad   : > { %v13462_v29 = vpop.eup %11770  ;;  %v3302_v14 = vcombine.low %v13363_v22, %v13457_v55  ;;  %v3371_v6 = vrot.slane %v3364_v0, %v12510_v12 }
 0x5ae   : > { %v13467_v24 = vpop.eup %11772  ;;  %v3259_v8 = vrot.slane %v3231_v61, %v12510_v12  ;;  %v3268_v18 = vrot.slane %v3260_v28, %v12510_v12 }
 0x5af   : > { %v13470_v4 = vpop.eup %11774  ;;  %v3303_v19 = vcombine.low %v13462_v29, %v13467_v24  ;;  %v3324_v58 = vrot.slane %v3302_v14, %v12510_v12  ;;  %v3459_v37 = vsel %vm2188_vm1, %v3371_v6, 0.0 }
 0x5b0   : > { %v13477_v27 = vpop.eup %11776  ;;  %v3261_v5 = vcombine.low %v3252_v34, %v3259_v8  ;;  %3460 = vadd.xlane.f32.xlu1 %v3459_v37 }
 0x5b1   : > { %v13480_v31 = vpop.eup %11778  ;;  %v3331_v35 = vrot.slane %v3303_v19, %v12510_v12  ;;  %v3372_v36 = vcombine.low %v13470_v4, %v13477_v27 }
 0x5b2   : > { %v13485_v54 = vpop.eup %11780  ;;  %v3275_v33 = vrot.slane %v3261_v5, %v12510_v12 }
 0x5b3   : > { %v13489_v62 = vpop.eup %11782  ;;  %v3333_v23 = vcombine.low %v3324_v58, %v3331_v35  ;;  %v3373_v56 = vcombine.low %v13480_v31, %v13485_v54  ;;  %v3382_v2 = vrot.slane %v3372_v36, %v12510_v12 }
 0x5b4   : > { %v13495_v21 = vpop.eup %11784  ;;  %v3276_v48 = vcombine.low %v3268_v18, %v3275_v33  ;;  %3466 = vadd.xlane.f32.xlu1 %v3465_v46  ;;  %v10844_v33 = vld [vmem:[#allocation6] ss:$0 sm:$0xff] }
 0x5b5   : > { %v13497_v0 = vpop.eup %11786  ;;  %v3347_v51 = vrot.slane %v3333_v23, %v12510_v12  ;;  %v3374_v61 = vcombine.low %v13489_v62, %v13495_v21  ;;  %v3389_v34 = vrot.slane %v3373_v56, %v12510_v12 }
 0x5b6   : > { %v13503_v28 = vpop.eup %11788  ;;  %v3450_v14 = vsel %vm2184_vm2, %v3276_v48, 0.0 }
 0x5b7   : > { %3451 = vadd.xlane.f32.xlu0 %v3450_v14  ;;  %v3348_v6 = vcombine.low %v3340_v3, %v3347_v51  ;;  %v3375_v8 = vcombine.low %v13497_v0, %v13503_v28  ;;  %v3396_v10 = vrot.slane %v3374_v61, %v12510_v12  ;;  %v3404_v19 = vcombine.low %v3382_v2, %v3389_v34  ;;  %v13514_v3 = vpop.f32.mrb[4].mxu1  ;;  %v10860_v51 = vld [vmem:[#allocation9] ss:$0 sm:$0xff] }
 0x5b8   : > { %v11157_v23 = vpop.f32.mrb[5].mxu1 }
 0x5b9   : > { %v3403_v58 = vrot.slane %v3375_v8, %v12510_v12  ;;  %v3456_v37 = vsel %vm2184_vm2, %v3348_v6, 0.0  ;;  %v3412_v5 = vrot.slane %v3404_v19, %v12510_v12  ;;  %v13516_v56 = vpop.f32.mrb[6].mxu1 }
 0x5ba   : > { %v11164_v2 = vpop.f32.mrb[7].mxu1 }
 0x5bb   : > { %3457 = vadd.xlane.f32.xlu0 %v3456_v37  ;;  %v3405_v57 = vcombine.low %v3396_v10, %v3403_v58  ;;  %v13518_v46 = vpop.f32.mrb[8].mxu1 }
 0x5bc   : > { %v11171_v48 = vpop.f32.mrb[9].mxu1 }
 0x5bd   : > { %v3419_v18 = vrot.slane %v3405_v57, %v12510_v12 }
 0x5bf   : > { %v3420_v35 = vcombine.low %v3412_v5, %v3419_v18 }
 0x5c1   : > { %v3462_v36 = vsel %vm2184_vm2, %v3420_v35, 0.0 }
 0x5c2   : > { %3463 = vadd.xlane.f32.xlu0 %v3462_v36 }
 0x5c5   : > { %4436 = vbcast.lane.b32.xlu1 %v10860_v51, 256 }
 0x5c9   : > { %4440 = vbcast.lane.b32.xlu1 %v10860_v51, 264 }
 0x5d8   : > { %3712 = vbcast.lane.b32.xlu0 %v10844_v33, 256 }
 0x633   : > { %v3455_v61 = vpop.xlane.xlu1 %3454 }
 0x634   : > { %v3509_v34 = vrot.slane %v3455_v61, %v13008_v60  ;;  %v3513_v14 = vrot.slane %v3455_v61, %v13005_v59  ;;  %v3517_v8 = vrot.slane %v3455_v61, %v13013_v38 }
 0x636   : > { %11790 = vrcp.f32 %v3509_v34 }
 0x637   : > { %11792 = vrcp.f32 %v3513_v14 }
 0x638   : > { %11794 = vrcp.f32 %v3517_v8 }
 0x63d   : > { %v3461_v6 = vpop.xlane.xlu1 %3460 }
 0x63e   : > { %v3553_v10 = vrot.slane %v3461_v6, %v13008_v60  ;;  %v3557_v19 = vrot.slane %v3461_v6, %v13005_v59  ;;  %v3561_v58 = vrot.slane %v3461_v6, %v13013_v38 }
 0x640   : > { %11796 = vrcp.f32 %v3553_v10  ;;  %v11791_v18 = vpop.eup %11790 }
 0x641   : > { %v13526_v37 = vpop.xlane.xlu1 %3466  ;;  %11798 = vrcp.f32 %v3557_v19  ;;  %v11793_v23 = vpop.eup %11792  ;;  %v3656_v14 = vmul.f32 %v11791_v18, %v13369_v42 }
 0x642   : > { %v3597_v57 = vrot.slane %v13526_v37, %v13008_v60  ;;  %11800 = vrcp.f32 %v3561_v58  ;;  %v3658_v6 = vmul.f32 %v11793_v23, %v13375_v63  ;;  %v11795_v19 = vpop.eup %11794 }
 0x644   : > { %v3452_v5 = vpop.xlane.xlu0 %3451  ;;  %11802 = vrcp.f32 %v3597_v57 }
 0x645   : > { %v3477_v35 = vrot.slane %v3452_v5, %v13008_v60  ;;  %v3481_v36 = vrot.slane %v3452_v5, %v13005_v59  ;;  %v3485_v33 = vrot.slane %v3452_v5, %v13013_v38  ;;  %v3489_v2 = vrot.slane %v3452_v5, %v13047_v17 }
 0x646   : > { %v3493_v48 = vrot.slane %v3452_v5, %v13050_v20  ;;  %v3497_v51 = vrot.slane %v3452_v5, %v13053_v41  ;;  %v3501_v34 = vrot.slane %v3452_v5, %v13056_v50  ;;  %v3505_v8 = vrot.slane %v3452_v5, %v13059_v26 }
 0x647   : > { %11804 = vrcp.f32 %v3477_v35  ;;  %v3993_v35 = vcombine.low %v3656_v14, %v3658_v6  ;;  %v13547_v5 = vmul.f32 %v11795_v19, %v13381_v16 }
 0x648   : > { %11806 = vrcp.f32 %v3481_v36  ;;  %v3458_v61 = vpop.xlane.xlu0 %3457 }
 0x649   : > { %11808 = vrcp.f32 %v3485_v33  ;;  %v3521_v10 = vrot.slane %v3458_v61, %v13008_v60  ;;  %v3525_v58 = vrot.slane %v3458_v61, %v13005_v59  ;;  %v3529_v36 = vrot.slane %v3458_v61, %v13013_v38 }
 0x64a   : > { %11810 = vrcp.f32 %v3489_v2  ;;  %v11797_v57 = vpop.eup %11796  ;;  %v3533_v42 = vrot.slane %v3458_v61, %v13047_v17  ;;  %v3537_v18 = vrot.slane %v3458_v61, %v13050_v20  ;;  %v3545_v16 = vrot.slane %v3458_v61, %v13056_v50 }
 0x64b   : > { %11812 = vrcp.f32 %v3493_v48  ;;  %v11799_v33 = vpop.eup %11798  ;;  %v3541_v48 = vrot.slane %v3458_v61, %v13053_v41  ;;  %v3549_v6 = vrot.slane %v3458_v61, %v13059_v26  ;;  %v13563_v19 = vmul.f32 %v11797_v57, %v13420_v53 }
 0x64c   : > { %11814 = vrcp.f32 %v3497_v51  ;;  %v13544_v63 = vpop.eup %11800 }
 0x64d   : > { %11816 = vrcp.f32 %v3501_v34 }
 0x64e   : > { %11818 = vrcp.f32 %v3505_v8  ;;  %v13552_v2 = vpop.eup %11802  ;;  %v4000_v8 = vrot.slane %v3993_v35, %v12510_v12 }
 0x64f   : > { %11820 = vrcp.f32 %v3521_v10  ;;  %v13550_v23 = vpop.xlane.xlu0 %3463 }
 0x650   : > { %11822 = vrcp.f32 %v3525_v58  ;;  %v13566_v58 = vmul.f32 %v11799_v33, %v13423_v1  ;;  %v3565_v34 = vrot.slane %v13550_v23, %v13008_v60  ;;  %v3569_v61 = vrot.slane %v13550_v23, %v13005_v59 }
 0x651   : > { %v11805_v14 = vpop.eup %11804  ;;  %11824 = vrcp.f32 %v3529_v36  ;;  %v3573_v53 = vrot.slane %v13550_v23, %v13013_v38 }
 0x652   : > { %v11807_v10 = vpop.eup %11806  ;;  %11826 = vrcp.f32 %v3533_v42  ;;  %v3640_v51 = vmul.f32 %v11805_v14, %v13387_v7 }
 0x653   : > { %v11809_v49 = vpop.eup %11808  ;;  %11828 = vrcp.f32 %v3537_v18  ;;  %v13573_v36 = vpop.permute.xlu0 %3712  ;;  %v3642_v35 = vmul.f32 %v11807_v10, %v13409_v43  ;;  %v3581_v10 = vrot.slane %v13550_v23, %v13050_v20 }
 0x654   : > { %v11811_v42 = vpop.eup %11810  ;;  %11830 = vrcp.f32 %v3541_v48  ;;  %v3786_v7 = vadd.f32 %v13514_v3, %v13573_v36  ;;  %v13582_v1 = vadd.f32 %v13516_v56, %v13573_v36  ;;  %v3644_v33 = vmul.f32 %v11809_v49, %v13414_v47 }
 0x655   : > { %v11813_v57 = vpop.eup %11812  ;;  %11832 = vrcp.f32 %v3545_v16  ;;  %v3646_v18 = vmul.f32 %v11811_v42, %v13433_v11  ;;  %v3944_v14 = vcombine.low %v3640_v51, %v3642_v35  ;;  %v3577_v48 = vrot.slane %v13550_v23, %v13047_v17 }
 0x656   : > { %v11815_v43 = vpop.eup %11814  ;;  %11834 = vrcp.f32 %v3549_v6  ;;  %11172 = vmatprep.subr.msk.mxu1 %vm2335_vm10, %v3786_v7  ;;  %v3648_v3 = vmul.f32 %v11813_v57, %v13437_v13  ;;  %v3585_v16 = vrot.slane %v13550_v23, %v13053_v41  ;;  %v3589_v6 = vrot.slane %v13550_v23, %v13056_v50 }
 0x657   : > { %v11817_v56 = vpop.eup %11816  ;;  %11836 = vrcp.f32 %v3565_v34  ;;  %11173 = vmatpush3.msk.msra.mxu1 %vm2335_vm10, %v3786_v7  ;;  %v3650_v49 = vmul.f32 %v11815_v43, %v13444_v30  ;;  %v3945_v47 = vcombine.low %v3644_v33, %v3646_v18  ;;  %v3954_v11 = vrot.slane %v3944_v14, %v12510_v12 }
 0x658   : > { %v11819_v51 = vpop.eup %11818  ;;  %11838 = vrcp.f32 %v3569_v61  ;;  %v3652_v35 = vmul.f32 %v11817_v56, %v13450_v9  ;;  %11177 = vmatprep.subr.msk.mxu1 %vm2335_vm10, %v13582_v1  ;;  %v3593_v57 = vrot.slane %v13550_v23, %v13059_v26  ;;  %v4007_v61 = vrot.slane %v13547_v5, %v12510_v12 }
 0x659   : > { %v11821_v13 = vpop.eup %11820  ;;  %11840 = vrcp.f32 %v3573_v53  ;;  %v3654_v30 = vmul.f32 %v11819_v51, %v13455_v15  ;;  %v3946_v34 = vcombine.low %v3648_v3, %v3650_v49  ;;  %v3961_v42 = vrot.slane %v3945_v47, %v12510_v12 }
 0x65a   : > { %v11823_v7 = vpop.eup %11822  ;;  %11842 = vrcp.f32 %v3577_v48  ;;  %v3662_v9 = vmul.f32 %v11821_v13, %v13338_v52  ;;  %v4008_v43 = vcombine.low %v4000_v8, %v4007_v61  ;;  %v4158_v5 = vcombine.low %v13563_v19, %v13566_v58 }
 0x65b   : > { %v11825_v33 = vpop.eup %11824  ;;  %11844 = vrcp.f32 %v3581_v10  ;;  %v3947_v18 = vcombine.low %v3652_v35, %v3654_v30  ;;  %v3968_v53 = vrot.slane %v3946_v34, %v12510_v12  ;;  %v3976_v14 = vcombine.low %v3954_v11, %v3961_v42 }
 0x65c   : > { %v11827_v15 = vpop.eup %11826  ;;  %11846 = vrcp.f32 %v3585_v16  ;;  %v3664_v3 = vmul.f32 %v11823_v7, %v13346_v44  ;;  %v3666_v56 = vmul.f32 %v11825_v33, %v13348_v25  ;;  %v15865_v44 = vrot.slane %v13526_v37, %v13005_v59 }
 0x65d   : > { %v11829_v23 = vpop.eup %11828  ;;  %11848 = vrcp.f32 %v3589_v6  ;;  %v3975_v52 = vrot.slane %v3947_v18, %v12510_v12  ;;  %v3668_v48 = vmul.f32 %v11827_v15, %v13358_v39  ;;  %v3984_v49 = vrot.slane %v3976_v14, %v12510_v12 }
 0x65e   : > { %v11831_v10 = vpop.eup %11830  ;;  %11850 = vrcp.f32 %v3593_v57  ;;  %v3670_v47 = vmul.f32 %v11829_v23, %v13363_v22  ;;  %v4109_v8 = vcombine.low %v3662_v9, %v3664_v3  ;;  %v3682_v39 = vmul.f32 %v13544_v63, %v13429_v45 }
 0x65f   : > { %v11833_v11 = vpop.eup %11832  ;;  %11852 = vrcp.f32 %v15865_v44  ;;  %v3977_v25 = vcombine.low %v3968_v53, %v3975_v52  ;;  %v3672_v51 = vmul.f32 %v11831_v10, %v13457_v55  ;;  %v4110_v19 = vcombine.low %v3666_v56, %v3668_v48 }
 0x660   : > { %v11835_v58 = vpop.eup %11834  ;;  %v15866_v16 = vrot.slane %v13526_v37, %v13013_v38  ;;  %v3674_v22 = vmul.f32 %v11833_v11, %v13462_v29  ;;  %v4119_v6 = vrot.slane %v4109_v8, %v12510_v12  ;;  %v4015_v7 = vrot.slane %v4008_v43, %v12510_v12 }
 0x661   : > { %v11837_v35 = vpop.eup %11836  ;;  %v3991_v13 = vrot.slane %v3977_v25, %v12510_v12  ;;  %v3676_v30 = vmul.f32 %v11835_v58, %v13467_v24  ;;  %v4111_v34 = vcombine.low %v3670_v47, %v3672_v51  ;;  %v4126_v55 = vrot.slane %v4110_v19, %v12510_v12 }
 0x662   : > { %11854 = vrcp.f32 %v15866_v16  ;;  %v11839_v42 = vpop.eup %11838  ;;  %v4165_v45 = vrot.slane %v4158_v5, %v12510_v12  ;;  %v3684_v37 = vmul.f32 %v11837_v35, %v13470_v4  ;;  %v3930_v24 = vadd.f32 %v13518_v46, %v13573_v36 }
 0x663   : > { %v11841_v63 = vpop.eup %11840  ;;  %v3992_v57 = vcombine.low %v3984_v49, %v3991_v13  ;;  %v4112_v29 = vcombine.low %v3674_v22, %v3676_v30  ;;  %v4133_v61 = vrot.slane %v4111_v34, %v12510_v12  ;;  %v4141_v9 = vcombine.low %v4119_v6, %v4126_v55  ;;  %v15868_v13 = vld [vmem:[#allocation64_spill] sm:$0xff] }
 0x664   : > { %v11843_v33 = vpop.eup %11842  ;;  %v4172_v18 = vrot.slane %v3682_v39, %v12510_v12  ;;  %v3686_v53 = vmul.f32 %v11839_v42, %v13477_v27  ;;  %v3688_v14 = vmul.f32 %v11841_v63, %v13480_v31  ;;  %v15871_v63 = vld [vmem:[#allocation66_spill] sm:$0xff] }
 0x665   : > { %v11845_v15 = vpop.eup %11844  ;;  %11174 = vmatprep.mubr.msk.f32.mxu1 %vm2184_vm2, %v3992_v57  ;;  %v4140_v4 = vrot.slane %v4112_v29, %v12510_v12  ;;  %v3690_v43 = vmul.f32 %v11843_v33, %v13485_v54  ;;  %v4149_v31 = vrot.slane %v4141_v9, %v12510_v12  ;;  %v3700_v54 = vmul.f32 %v13552_v2, %v13396_v40  ;;  %v15867_v40 = vld [vmem:[#allocation59_spill] sm:$0xff] }
 0x666   : > { %v11847_v3 = vpop.eup %11846  ;;  %11175 = vmatmul.mubr.msk.f32.vlgmr.msra.gmra.mrb[10].mxu1 %vm2184_vm2, %v4015_v7  ;;  %v4173_v56 = vcombine.low %v4165_v45, %v4172_v18  ;;  %v3692_v23 = vmul.f32 %v11845_v15, %v13489_v62  ;;  %v4274_v46 = vcombine.low %v3684_v37, %v3686_v53  ;;  %v4428_v7 = vld [vmem:[#allocation7] sm:$0xff]  ;;  %v4429_v45 = vld [vmem:[#allocation7 + $0x8] sm:$0xff]  ;;  %v15870_v37 = vld [vmem:[#allocation65_spill] sm:$0xff]  ;;  %v15872_v57 = vmov 0.0|0.0  }
 0x667   : > { %v11849_v36 = vpop.eup %11848  ;;  %11178 = vmatpush3.msk.msra.mxu1 %vm2335_vm10, %v13582_v1  ;;  %v4142_v27 = vcombine.low %v4133_v61, %v4140_v4  ;;  %v3694_v5 = vmul.f32 %v11847_v3, %v13495_v21  ;;  %v4275_v52 = vcombine.low %v3688_v14, %v3690_v43  ;;  %v15873_v29 = vmov 0.0   ;;  %v4697_v61 = vld [vmem:[%s12240_s14] sm:$0xff]  ;;  %v4698_v9 = vld [vmem:[%s12240_s14 + $0x8] sm:$0xff]  ;;  %v4700_v18 = vld [vmem:[%s12240_s14 + $0x18] sm:$0xff] }
 0x668   : > { %v11851_v48 = vpop.eup %11850  ;;  %11182 = vmatprep.subr.msk.mxu1 %vm2335_vm10, %v3930_v24  ;;  %v3696_v10 = vmul.f32 %v11849_v36, %v13497_v0  ;;  %v4284_v62 = vrot.slane %v4274_v46, %v12510_v12  ;;  %v4180_v25 = vrot.slane %v4173_v56, %v12510_v12  ;;  %v11445_v33 = vpack.c.bf16 %v4698_v9, %v4697_v61  ;;  %v4701_v14 = vld [vmem:[%s12240_s14 + $0x20] sm:$0xff]  ;;  %v4702_v15 = vld [vmem:[%s12240_s14 + $0x28] sm:$0xff]  ;;  %v4703_v43 = vld [vmem:[%s12240_s14 + $0x30] sm:$0xff] }
 0x669   : > { %v11853_v49 = vpop.eup %11852  ;;  %v4156_v47 = vrot.slane %v4142_v27, %v12510_v12  ;;  %v3698_v1 = vmul.f32 %v11851_v48, %v13503_v28  ;;  %v4276_v8 = vcombine.low %v3692_v23, %v3694_v5  ;;  %v4291_v11 = vrot.slane %v4275_v52, %v12510_v12  ;;  %v4704_v3 = vld [vmem:[%s12240_s14 + $0x38] sm:$0xff]  ;;  %v4705_v23 = vld [vmem:[%s12240_s14 + $0x40] sm:$0xff]  ;;  %v4706_v46 = vld [vmem:[%s12240_s14 + $0x48] sm:$0xff] }
 0x66a   : > { %v3702_v44 = vmul.f32 %v11853_v49, %v13401_v32  ;;  %11446 = vmatpush3.bf16.msra.mxu0 %v11445_v33  ;;  %v11451_v4 = vpack.c.bf16 %v4702_v15, %v4701_v14  ;;  %v11454_v56 = vpack.c.bf16 %v4704_v3, %v4703_v43  ;;  %v11457_v36 = vpack.c.bf16 %v4706_v46, %v4705_v23  ;;  %v4707_v27 = vld [vmem:[%s12240_s14 + $0x50] sm:$0xff]  ;;  %v4709_v52 = vld [vmem:[%s12240_s14 + $0x60] sm:$0xff]  ;;  %v4710_v48 = vld [vmem:[%s12240_s14 + $0x68] sm:$0xff] }
 0x66b   : > { %v4157_v51 = vcombine.low %v4149_v31, %v4156_v47  ;;  %v4277_v19 = vcombine.low %v3696_v10, %v3698_v1  ;;  %v4298_v0 = vrot.slane %v4276_v8, %v12510_v12  ;;  %v4306_v39 = vcombine.low %v4284_v62, %v4291_v11  ;;  %11447 = vmatprep.subr.bf16.mxu0 %v15872_v57  ;;  %v4708_v31 = vld [vmem:[%s12240_s14 + $0x58] sm:$0xff]  ;;  %v4711_v10 = vld [vmem:[%s12240_s14 + $0x70] sm:$0xff] }
 0x66c   : > { %v11855_v21 = vpop.eup %11854  ;;  %v4323_v58 = vcombine.low %v3700_v54, %v3702_v44  ;;  %v11460_v5 = vpack.c.bf16 %v4708_v31, %v4707_v27  ;;  %v11463_v54 = vpack.c.bf16 %v4710_v48, %v4709_v52  ;;  %v4712_v62 = vld [vmem:[%s12240_s14 + $0x78] sm:$0xff] }
 0x66d   : > { %v3704_v2 = vmul.f32 %v11855_v21, %v15867_v40  ;;  %11179 = vmatprep.mubr.msk.f32.mxu1 %vm2184_vm2, %v4157_v51  ;;  %v4305_v28 = vrot.slane %v4277_v19, %v12510_v12  ;;  %v4314_v6 = vrot.slane %v4306_v39, %v12510_v12  ;;  %v11466_v49 = vpack.c.bf16 %v4712_v62, %v4711_v10  ;;  %v4437_v21 = vpop.permute.xlu1 %4436  ;;  %v4790_v46 = vld [vmem:[#allocation10] sm:$0xff]  ;;  %v4792_v10 = vld [vmem:[#allocation10 + $0x10] sm:$0xff]  ;;  %v4793_v62 = vld [vmem:[#allocation10 + $0x18] sm:$0xff] }
 0x66e   : > { %11180 = vmatmul.mubr.msk.f32.vlgmr.msra.gmra.mrb[12].mxu1 %vm2184_vm2, %v4180_v25  ;;  %v4330_v16 = vrot.slane %v4323_v58, %v12510_v12 }
 0x66f   : > { %v4337_v32 = vrot.slane %v3704_v2, %v12510_v12  ;;  %11183 = vmatpush3.msk.msra.mxu1 %vm2335_vm10, %v3930_v24  ;;  %v4307_v22 = vcombine.low %v4298_v0, %v4305_v28  ;;  %v4699_v24 = vld [vmem:[%s12240_s14 + $0x10] sm:$0xff] }
 0x670   : > { %11428 = vmatprep.subr.msk.bf16.mxu1 %vm12971_vm5, %v15868_v13  ;;  %v11448_v53 = vpack.c.bf16 %v4700_v18, %v4699_v24 }
 0x671   : > { %v4338_v35 = vcombine.low %v4330_v16, %v4337_v32  ;;  %v4321_v34 = vrot.slane %v4307_v22, %v12510_v12  ;;  %v4441_v40 = vpop.permute.xlu1 %4440 }
 0x672   : > { %11449 = vmatpush3.bf16.msra.mxu0 %v11448_v53 }
 0x673   : > { %v4345_v55 = vrot.slane %v4338_v35, %v12510_v12  ;;  %v4322_v42 = vcombine.low %v4314_v6, %v4321_v34  ;;  %11450 = vmatprep.subr.bf16.mxu0 %v15872_v57 }
 0x675   : > { %11184 = vmatprep.mubr.msk.f32.mxu1 %vm2184_vm2, %v4322_v42 }
 0x676   : > { %11185 = vmatmul.mubr.msk.f32.vlgmr.msra.gmra.mrb[14].mxu1 %vm2184_vm2, %v4345_v55  ;;  %11452 = vmatpush3.bf16.msra.mxu0 %v11451_v4 }
 0x677   : > { %11431 = vmatpush3.bf16.msk.msra.mxu1 %vm12971_vm5, %v15868_v13  ;;  %11191 = vmatprep.mubr.msk.f32.mxu1 %vm2253_vm9, %v4428_v7 }
 0x678   : > { %11434 = vmatprep.subr.msk.bf16.mxu1 %vm12971_vm5, %v15870_v37  ;;  %11453 = vmatprep.subr.bf16.mxu0 %v15872_v57 }
 0x67a   : > { %11192 = vmatmul.mubr.msk.f32.vlgmr.msra.gmra.mrb[16].mxu1 %vm2253_vm9, %v4429_v45  ;;  %11455 = vmatpush3.bf16.msra.mxu0 %v11454_v56 }
 0x67b   : > { %11437 = vmatpush3.bf16.msk.msra.mxu1 %vm12971_vm5, %v15870_v37  ;;  %11198 = vmatprep.mubr.msk.f32.mxu1 %vm2253_vm9, %v4428_v7 }
 0x67c   : > { %11440 = vmatprep.subr.msk.bf16.mxu1 %vm12971_vm5, %v15871_v63  ;;  %11456 = vmatprep.subr.bf16.mxu0 %v15872_v57 }
 0x67e   : > { %11199 = vmatmul.mubr.msk.f32.vlgmr.msra.gmra.mrb[18].mxu1 %vm2253_vm9, %v4429_v45  ;;  %11458 = vmatpush3.bf16.msra.mxu0 %v11457_v36  ;;  %v4791_v36 = vld [vmem:[#allocation10 + $0x8] sm:$0xff] }
 0x67f   : > { %11443 = vmatpush3.bf16.msk.msra.mxu1 %vm12971_vm5, %v15871_v63  ;;  %11205 = vmatprep.mubr.msk.f32.mxu1 %vm2253_vm9, %v4428_v7  ;;  %v11469_v52 = vpack.c.bf16 %v4791_v36, %v4790_v46 }
 0x680   : > { %11474 = vmatprep.subr.bf16.mxu1 %v15872_v57  ;;  %11459 = vmatprep.subr.bf16.mxu0 %v15872_v57 }
 0x682   : > { %11206 = vmatmul.mubr.msk.f32.vlgmr.msra.gmra.mrb[20].mxu1 %vm2253_vm9, %v4429_v45  ;;  %11461 = vmatpush3.bf16.msra.mxu0 %v11460_v5 }
 0x683   : > { %11286 = vmatprep.mubr.msk.f32.mxu1 %vm12183_vm0, %v15873_v29  ;;  %11462 = vmatprep.subr.bf16.mxu0 %v15872_v57 }
 0x686   : > { %11464 = vmatpush3.bf16.msra.mxu0 %v11463_v54 }
 0x687   : > { %11465 = vmatprep.subr.bf16.mxu0 %v15872_v57 }
 0x68a   : > { %11467 = vmatpush3.bf16.msra.mxu0 %v11466_v49  ;;  %v11472_v49 = vpack.c.bf16 %v4793_v62, %v4792_v10 }
 0x68b   : > { %11468 = vmatprep.subr.bf16.mxu0 %v15872_v57 }
 0x739   : > { %v13724_v47 = vpop.f32.mrb[10].mxu1 }
 0x73a   : > { %v13726_v1 = vpop.f32.mrb[11].mxu1 }
 0x741   : > { %v13728_v8 = vpop.f32.mrb[12].mxu1 }
 0x742   : > { %v13730_v11 = vpop.f32.mrb[13].mxu1 }
 0x749   : > { %v13732_v44 = vpop.f32.mrb[14].mxu1 }
 0x74a   : > { %v13734_v25 = vpop.f32.mrb[15].mxu1 }
 0x74d   : > { %v11193_v2 = vpop.f32.mrb[16].mxu1 }
 0x74e   : > { %v13736_v51 = vadd.f32 %v11193_v2, %v4441_v40  ;;  %v4514_v19 = vpop.f32.mrb[17].mxu1  ;;  %v4990_v2 = vld [vmem:[%s12250_s24 + $0x10] sm:$0xff] }
 0x74f   : > { %v13738_v0 = vadd.f32 %v4514_v19, %v4437_v21 }
 0x751   : > { %v4673_v58 = vadd.f32 %v13736_v51, %v13738_v0  ;;  %v11200_v39 = vpop.f32.mrb[18].mxu1 }
 0x752   : > { %v13742_v28 = vadd.f32 %v11200_v39, %v4441_v40  ;;  %v4589_v16 = vpop.f32.mrb[19].mxu1 }
 0x753   : > { %v4674_v32 = vrot.slane %v4673_v58, 4  ;;  %v13744_v22 = vadd.f32 %v4589_v16, %v4437_v21  ;;  %v4992_v16 = vld [vmem:[%s12250_s24 + $0x20] sm:$0xff] }
 0x755   : > { %v4675_v6 = vadd.f32 %v4674_v32, %v4673_v58  ;;  %v4680_v35 = vadd.f32 %v13742_v28, %v13744_v22  ;;  %v11207_v13 = vpop.f32.mrb[20].mxu1  ;;  %v4991_v58 = vld [vmem:[%s12250_s24 + $0x18] sm:$0xff]  ;;  %v4993_v32 = vld [vmem:[%s12250_s24 + $0x28] sm:$0xff] }
 0x756   : > { %v13748_v34 = vadd.f32 %v11207_v13, %v4441_v40  ;;  %v4664_v55 = vpop.f32.mrb[21].mxu1  ;;  %v4989_v40 = vld [vmem:[%s12250_s24 + $0x8] sm:$0xff]  ;;  %v11478_v39 = vpack.c.bf16 %v4991_v58, %v4990_v2  ;;  %v4995_v13 = vld [vmem:[%s12250_s24 + $0x38] sm:$0xff] }
 0x757   : > { %v4676_v42 = vrot.slane %v4675_v6, 2  ;;  %v4681_v7 = vrot.slane %v4680_v35, 4  ;;  %v13750_v45 = vadd.f32 %v4664_v55, %v4437_v21  ;;  %v4988_v21 = vld [vmem:[%s12250_s24] sm:$0xff] }
 0x758   : > { %v11475_v19 = vpack.c.bf16 %v4989_v40, %v4988_v21 }
 0x759   : > { %v4682_v37 = vadd.f32 %v4681_v7, %v4680_v35  ;;  %v4687_v63 = vadd.f32 %v13748_v34, %v13750_v45  ;;  %v4677_v61 = vadd.f32 %v4676_v42, %v4675_v6  ;;  %v11481_v6 = vpack.c.bf16 %v4993_v32, %v4992_v16  ;;  %v4994_v35 = vld [vmem:[%s12250_s24 + $0x30] sm:$0xff]  ;;  %v4996_v42 = vld [vmem:[%s12250_s24 + $0x40] sm:$0xff]  ;;  %v4997_v7 = vld [vmem:[%s12250_s24 + $0x48] sm:$0xff] }
 0x75a   : > { %11476 = vmatpush3.bf16.msra.mxu1 %v11475_v19  ;;  %v11484_v55 = vpack.c.bf16 %v4995_v13, %v4994_v35 }
 0x75b   : > { %v4683_v9 = vrot.slane %v4682_v37, 2  ;;  %v4688_v33 = vrot.slane %v4687_v63, 4  ;;  %v4678_v53 = vrot.slane %v4677_v61, 1  ;;  %11477 = vmatprep.subr.bf16.mxu1 %v15872_v57 }
 0x75d   : > { %v4684_v24 = vadd.f32 %v4683_v9, %v4682_v37  ;;  %v4689_v18 = vadd.f32 %v4688_v33, %v4687_v63  ;;  %v4679_v3 = vadd.f32 %v4678_v53, %v4677_v61  ;;  %v11487_v37 = vpack.c.bf16 %v4997_v7, %v4996_v42  ;;  %v4998_v63 = vld [vmem:[%s12250_s24 + $0x50] sm:$0xff]  ;;  %v4999_v61 = vld [vmem:[%s12250_s24 + $0x58] sm:$0xff]  ;;  %v5000_v33 = vld [vmem:[%s12250_s24 + $0x60] sm:$0xff] }
 0x75e   : > { %11479 = vmatpush3.bf16.msra.mxu1 %v11478_v39  ;;  %v11490_v9 = vpack.c.bf16 %v4999_v61, %v4998_v63  ;;  %v5002_v53 = vld [vmem:[%s12250_s24 + $0x70] sm:$0xff] }
 0x75f   : > { %v4685_v14 = vrot.slane %v4684_v24, 1  ;;  %v4690_v15 = vrot.slane %v4689_v18, 2  ;;  %v4694_v31 = vmul.f32 0.0625, %v4679_v3  ;;  %11480 = vmatprep.subr.bf16.mxu1 %v15872_v57  ;;  %v15876_v3 = vld [vmem:[#allocation55_spill] sm:$0xff] }
 0x761   : > { %v4686_v4 = vadd.f32 %v4685_v14, %v4684_v24  ;;  %v4691_v43 = vadd.f32 %v4690_v15, %v4689_v18  ;;  %v5001_v24 = vld [vmem:[%s12250_s24 + $0x68] sm:$0xff]  ;;  %v5003_v14 = vld [vmem:[%s12250_s24 + $0x78] sm:$0xff] }
 0x762   : > { %11482 = vmatpush3.bf16.msra.mxu1 %v11481_v6  ;;  %v11493_v18 = vpack.c.bf16 %v5001_v24, %v5000_v33  ;;  %v11496_v15 = vpack.c.bf16 %v5003_v14, %v5002_v53 }
 0x763   : > { %v4692_v56 = vrot.slane %v4691_v43, 1  ;;  %v4695_v23 = vmul.f32 0.0625, %v4686_v4  ;;  %11483 = vmatprep.subr.bf16.mxu1 %v15872_v57  ;;  %v15874_v4 = vld [vmem:[#allocation53_spill] sm:$0xff] }
 0x765   : > { %v4693_v27 = vadd.f32 %v4692_v56, %v4691_v43  ;;  %v4716_v48 = vsel %vm2249_vm7, %v4695_v23, %v4694_v31  ;;  %v15875_v43 = vld [vmem:[#allocation54_spill] sm:$0xff]  ;;  %v15877_v56 = vld [vmem:[#allocation57_spill] sm:$0xff]  ;;  %v10872_v31 = vld [vmem:[#allocation12] ss:$0 sm:$0xff] }
 0x766   : > { %11485 = vmatpush3.bf16.msra.mxu1 %v11484_v55  ;;  %v15878_v23 = vld [vmem:[#allocation58_spill] sm:$0xff] }
 0x767   : > { %v4696_v5 = vmul.f32 0.0625, %v4693_v27  ;;  %11486 = vmatprep.subr.bf16.mxu1 %v15872_v57 }
 0x769   : > { %v4717_v54 = vsel %vm2251_vm8, %v4696_v5, %v4716_v48  ;;  %v5355_v48 = vrot.slane %v10872_v31, %v12510_v12 }
 0x76a   : > { %11241 = vmatmul.mubr.f32.vlgmr.msra.gmra.mrb[10].mxu0 %v4717_v54  ;;  %11488 = vmatpush3.bf16.msra.mxu1 %v11487_v37 }
 0x76b   : > { %11470 = vmatpush3.bf16.msra.mxu0 %v11469_v52  ;;  %11251 = vmatprep.mubr.msk.f32.mxu0 %vm12183_vm0, %v15873_v29  ;;  %v5348_v52 = vcombine.high %v10872_v31, %v10872_v31  ;;  %v5363_v21 = vcombine.high %v5355_v48, %v5355_v48  ;;  %v13802_v40 = vrot.slane %v5355_v48, %v12510_v12 }
 0x76c   : > { %11471 = vmatprep.subr.bf16.mxu0 %v15872_v57  ;;  %11489 = vmatprep.subr.bf16.mxu1 %v15872_v57 }
 0x76d   : > { %v13810_v32 = vrot.slane %v5363_v21, %v12510_v12  ;;  %v13814_v6 = vcombine.high %v13802_v40, %v13802_v40 }
 0x76e   : > { %11491 = vmatpush3.bf16.msra.mxu1 %v11490_v9 }
 0x76f   : > { %11473 = vmatpush3.bf16.msra.mxu0 %v11472_v49  ;;  %11492 = vmatprep.subr.bf16.mxu1 %v15872_v57  ;;  %v5362_v49 = vrot.slane %v5348_v52, %v12510_v12  ;;  %v13827_v9 = vcombine.high %v13810_v32, %v13810_v32 }
 0x771   : > { %v5364_v39 = vcombine.high %v5362_v49, %v5362_v49  ;;  %v13807_v16 = vrot.slane %v5362_v49, %v12510_v12 }
 0x772   : > { %11494 = vmatpush3.bf16.msra.mxu1 %v11493_v18 }
 0x773   : > { %11495 = vmatprep.subr.bf16.mxu1 %v15872_v57  ;;  %v13819_v63 = vrot.slane %v5364_v39, %v12510_v12  ;;  %v13823_v61 = vcombine.high %v13807_v16, %v13807_v16 }
 0x776   : > { %11497 = vmatpush3.bf16.msra.mxu1 %v11496_v15  ;;  %v13834_v15 = vcombine.high %v13819_v63, %v13819_v63 }
 0x777   : > { %11514 = vmatprep.subr.bf16.mxu1 %v15872_v57 }
 0x779   : > { %11287 = vmatmul.mubr.f32.vlgmr.msra.gmra.mrb[22].mxu1 %v15874_v4 }
 0x77a   : > { %11289 = vmatprep.mubr.msk.f32.mxu1 %vm12183_vm0, %v15873_v29 }
 0x77d   : > { %11290 = vmatmul.mubr.f32.gmra.mrb[24].mxu1 %v15875_v43 }
 0x77e   : > { %11292 = vmatprep.mubr.msk.f32.mxu1 %vm12183_vm0, %v15873_v29 }
 0x781   : > { %11293 = vmatmul.mubr.f32.gmra.mrb[26].mxu1 %v15876_v3 }
 0x782   : > { %11295 = vmatprep.mubr.msk.f32.mxu1 %vm12183_vm0, %v15873_v29 }
 0x785   : > { %11296 = vmatmul.mubr.f32.gmra.mrb[28].mxu1 %v15877_v56 }
 0x786   : > { %11298 = vmatprep.mubr.msk.f32.mxu1 %vm12183_vm0, %v15873_v29 }
 0x789   : > { %11299 = vmatmul.mubr.f32.gmra.mrb[30].mxu1 %v15878_v23 }
 0x78a   : > { %11371 = vmatprep.mubr.msk.f32.mxu1 %vm12183_vm0, %v15873_v29 }
 0x83d   : > { %v4785_v46 = vpop.f32.mrb[10].mxu0 }
 0x83e   : > { %v4789_v36 = vmax.f32 %v4785_v46, 0.0  ;;  %v11242_v27 = vpop.f32.mrb[11].mxu0 }
 0x840   : > { %11252 = vmatmul.mubr.msk.f32.vlgmr.msra.gmra.mrb[12].mxu0 %vm4794_vm11, %v4789_v36 }
 0x84c   : > { %v5070_v5 = vpop.f32.mrb[22].mxu1 }
 0x84d   : > { %v5099_v54 = vcombine.high %v5070_v5, %v5070_v5  ;;  %v5106_v10 = vrot.slane %v5070_v5, %v12510_v12  ;;  %v11288_v62 = vpop.f32.mrb[23].mxu1 }
 0x84f   : > { %v5113_v2 = vrot.slane %v5099_v54, %v12510_v12  ;;  %v5114_v19 = vcombine.high %v5106_v10, %v5106_v10  ;;  %v5122_v58 = vrot.slane %v5106_v10, %v12510_v12 }
 0x850   : > { %v5075_v35 = vpop.f32.mrb[24].mxu1 }
 0x851   : > { %v5115_v13 = vcombine.high %v5113_v2, %v5113_v2  ;;  %v5129_v55 = vrot.slane %v5113_v2, %v12510_v12  ;;  %v5136_v42 = vrot.slane %v5114_v19, %v12510_v12  ;;  %v5144_v7 = vcombine.high %v5122_v58, %v5122_v58  ;;  %v11291_v37 = vpop.f32.mrb[25].mxu1 }
 0x852   : > { %v5405_v33 = vadd.f32 %v13802_v40, %v5122_v58  ;;  %v5148_v3 = vcombine.high %v5075_v35, %v5075_v35  ;;  %v5155_v52 = vrot.slane %v5075_v35, %v12510_v12 }
 0x853   : > { %v5143_v24 = vrot.slane %v5115_v13, %v12510_v12  ;;  %v5145_v18 = vcombine.high %v5129_v55, %v5129_v55  ;;  %v5146_v53 = vcombine.high %v5136_v42, %v5136_v42  ;;  %v5406_v14 = vadd.f32 %v13810_v32, %v5136_v42 }
 0x854   : > { %v5407_v4 = vadd.f32 %v13814_v6, %v5144_v7  ;;  %v5409_v43 = vadd.f32 %v13807_v16, %v5129_v55  ;;  %v5080_v56 = vpop.f32.mrb[26].mxu1  ;;  %v5162_v48 = vrot.slane %v5148_v3, %v12510_v12  ;;  %v5163_v2 = vcombine.high %v5155_v52, %v5155_v52 }
 0x855   : > { %v5147_v23 = vcombine.high %v5143_v24, %v5143_v24  ;;  %v5408_v46 = vadd.f32 %v13827_v9, %v5146_v53  ;;  %v5410_v36 = vadd.f32 %v13819_v63, %v5143_v24  ;;  %v13841_v27 = vadd.f32 %v13823_v61, %v5145_v18  ;;  %v11294_v31 = vpop.f32.mrb[27].mxu1 }
 0x856   : > { %v5449_v5 = vcombine.low %v5405_v33, %v5406_v14  ;;  %v5197_v62 = vcombine.high %v5080_v56, %v5080_v56  ;;  %v5204_v49 = vrot.slane %v5080_v56, %v12510_v12  ;;  %v5164_v19 = vcombine.high %v5162_v48, %v5162_v48 }
 0x857   : > { %v13846_v54 = vadd.f32 %v13834_v15, %v5147_v23  ;;  %v5450_v10 = vcombine.low %v5407_v4, %v5408_v46  ;;  %v5451_v21 = vcombine.low %v5409_v43, %v5410_v36  ;;  %v5171_v58 = vrot.slane %v5155_v52, %v12510_v12 }
 0x858   : > { %v5085_v39 = vpop.f32.mrb[28].mxu1  ;;  %v13853_v35 = vrot.slane %v5449_v5, %v12510_v12  ;;  %v5178_v42 = vrot.slane %v5162_v48, %v12510_v12  ;;  %v5185_v37 = vrot.slane %v5163_v2, %v12510_v12  ;;  %v5192_v33 = vrot.slane %v5164_v19, %v12510_v12 }
 0x859   : > { %v5452_v13 = vcombine.low %v13841_v27, %v13846_v54  ;;  %v13856_v55 = vrot.slane %v5450_v10, %v12510_v12  ;;  %v11297_v7 = vpop.f32.mrb[29].mxu1  ;;  %v5193_v24 = vcombine.high %v5171_v58, %v5171_v58  ;;  %v5413_v18 = vadd.f32 %v13802_v40, %v5171_v58 }
 0x85a   : > { %v5194_v53 = vcombine.high %v5178_v42, %v5178_v42  ;;  %v13863_v14 = vadd.f32 %v13810_v32, %v5178_v42  ;;  %v5211_v4 = vrot.slane %v5197_v62, %v12510_v12  ;;  %v5212_v43 = vcombine.high %v5204_v49, %v5204_v49 }
 0x85b   : > { %v5195_v3 = vcombine.high %v5185_v37, %v5185_v37  ;;  %v5196_v56 = vcombine.high %v5192_v33, %v5192_v33  ;;  %v5414_v23 = vadd.f32 %v13810_v32, %v5185_v37  ;;  %v5415_v46 = vadd.f32 %v13814_v6, %v5193_v24 }
 0x85c   : > { %v5090_v36 = vpop.f32.mrb[30].mxu1  ;;  %v13869_v27 = vadd.f32 %v13814_v6, %v5192_v33  ;;  %v13872_v31 = vadd.f32 %v13827_v9, %v5194_v53  ;;  %v5213_v5 = vcombine.high %v5211_v4, %v5211_v4  ;;  %v5220_v52 = vrot.slane %v5204_v49, %v12510_v12 }
 0x85d   : > { %v11300_v48 = vpop.f32.mrb[31].mxu1  ;;  %v13876_v54 = vadd.f32 %v13802_v40, %v5195_v3  ;;  %v5498_v10 = vcombine.low %v5413_v18, %v5414_v23  ;;  %v5512_v62 = vrot.slane %v5415_v46, %v12510_v12  ;;  %v5227_v2 = vrot.slane %v5211_v4, %v12510_v12 }
 0x85e   : > { %v5234_v58 = vrot.slane %v5212_v43, %v12510_v12  ;;  %v5241_v42 = vrot.slane %v5213_v5, %v12510_v12  ;;  %v5242_v7 = vcombine.high %v5220_v52, %v5220_v52  ;;  %v5420_v24 = vadd.f32 %v13807_v16, %v5196_v56 }
 0x85f   : > { %v5505_v37 = vrot.slane %v5498_v10, %v12510_v12  ;;  %v5612_v49 = vcombine.low %v13876_v54, %v13863_v14  ;;  %v5243_v33 = vcombine.high %v5227_v2, %v5227_v2  ;;  %v5421_v4 = vadd.f32 %v13819_v63, %v5220_v52 }
 0x860   : > { %v5244_v18 = vcombine.high %v5234_v58, %v5234_v58  ;;  %v5245_v53 = vcombine.high %v5241_v42, %v5241_v42  ;;  %v5422_v3 = vadd.f32 %v13823_v61, %v5234_v58  ;;  %v5473_v23 = vrot.slane %v5451_v21, %v12510_v12 }
 0x861   : > { %v13891_v43 = vcombine.low %v5505_v37, %v5512_v62  ;;  %v5423_v46 = vadd.f32 %v13834_v15, %v5242_v7  ;;  %v5425_v5 = vadd.f32 %v13810_v32, %v5227_v2  ;;  %v5426_v14 = vadd.f32 %v13814_v6, %v5241_v42 }
 0x862   : > { %v5424_v48 = vadd.f32 %v13802_v40, %v5244_v18  ;;  %v5427_v56 = vadd.f32 %v13802_v40, %v5243_v33  ;;  %v5428_v54 = vadd.f32 %v13810_v32, %v5245_v53  ;;  %v5614_v10 = vcombine.low %v5420_v24, %v5421_v4 }
 0x863   : > { %v5615_v52 = vcombine.low %v5422_v3, %v5423_v46  ;;  %v5246_v19 = vcombine.high %v5085_v39, %v5085_v39  ;;  %v5253_v58 = vrot.slane %v5085_v39, %v12510_v12  ;;  %v5675_v62 = vrot.slane %v5426_v14, %v12510_v12 }
 0x864   : > { %v5661_v21 = vcombine.low %v5424_v48, %v5425_v5  ;;  %v5774_v37 = vcombine.low %v5427_v56, %v5428_v54  ;;  %v5480_v7 = vrot.slane %v5452_v13, %v12510_v12  ;;  %v5481_v24 = vcombine.low %v13853_v35, %v13856_v55 }
 0x865   : > { %v5260_v2 = vrot.slane %v5246_v19, %v12510_v12  ;;  %v5261_v18 = vcombine.high %v5253_v58, %v5253_v58  ;;  %v5269_v33 = vrot.slane %v5253_v58, %v12510_v12  ;;  %v5301_v46 = vrot.slane %v5090_v36, %v12510_v12 }
 0x866   : > { %v5668_v42 = vrot.slane %v5661_v21, %v12510_v12  ;;  %v5482_v53 = vcombine.low %v5473_v23, %v5480_v7  ;;  %v5489_v48 = vrot.slane %v5481_v24, %v12510_v12 }
 0x867   : > { %v5262_v4 = vcombine.high %v5260_v2, %v5260_v2  ;;  %v5276_v39 = vrot.slane %v5260_v2, %v12510_v12  ;;  %v5283_v3 = vrot.slane %v5261_v18, %v12510_v12  ;;  %v5291_v19 = vcombine.high %v5269_v33, %v5269_v33 }
 0x868   : > { %v13910_v13 = vcombine.low %v5668_v42, %v5675_v62  ;;  %v5429_v5 = vadd.f32 %v13814_v6, %v5269_v33  ;;  %v5496_v58 = vrot.slane %v5482_v53, %v12510_v12  ;;  %v5308_v36 = vrot.slane %v5301_v46, %v12510_v12 }
 0x869   : > { %v5290_v14 = vrot.slane %v5262_v4, %v12510_v12  ;;  %v5292_v56 = vcombine.high %v5276_v39, %v5276_v39  ;;  %v5293_v54 = vcombine.high %v5283_v3, %v5283_v3  ;;  %v5430_v35 = vadd.f32 %v13827_v9, %v5283_v3 }
 0x86a   : > { %v5431_v55 = vadd.f32 %v13807_v16, %v5291_v19  ;;  %v5433_v23 = vadd.f32 %v13823_v61, %v5276_v39  ;;  %v5497_v42 = vcombine.low %v5489_v48, %v5496_v58  ;;  %v5437_v33 = vadd.f32 %v13814_v6, %v5308_v36 }
 0x86b   : > { %v5294_v21 = vcombine.high %v5290_v14, %v5290_v14  ;;  %v5432_v62 = vadd.f32 %v13819_v63, %v5293_v54  ;;  %v5434_v7 = vadd.f32 %v13834_v15, %v5290_v14  ;;  %v5435_v2 = vadd.f32 %v13802_v40, %v5292_v56 }
 0x86c   : > { %v5775_v18 = vcombine.low %v5429_v5, %v5430_v35  ;;  %11305 = vmatprep.mubr.msk.f32.mxu0 %vm5521_vm12, %v5497_v42  ;;  %v5837_v53 = vrot.slane %v5437_v33, %v12510_v12  ;;  %v5622_v15 = vrot.slane %v5612_v49, %v12510_v12  ;;  %v5636_v40 = vrot.slane %v5614_v10, %v12510_v12 }
 0x86d   : > { %v5436_v9 = vadd.f32 %v13810_v32, %v5294_v21  ;;  %v5776_v16 = vcombine.low %v5431_v55, %v5432_v62  ;;  %v5777_v24 = vcombine.low %v5433_v23, %v5434_v7  ;;  %v5643_v39 = vrot.slane %v5615_v52, %v12510_v12 }
 0x86e   : > { %v15879_v32 = vcombine.low %v13869_v27, %v13872_v31  ;;  %v5791_v19 = vrot.slane %v5775_v18, %v12510_v12  ;;  %v5784_v27 = vrot.slane %v5774_v37, %v12510_v12 }
 0x86f   : > { %v5823_v61 = vcombine.low %v5435_v2, %v5436_v9  ;;  %v5645_v46 = vcombine.low %v5636_v40, %v5643_v39  ;;  %v5798_v5 = vrot.slane %v5776_v16, %v12510_v12  ;;  %v5805_v48 = vrot.slane %v5777_v24, %v12510_v12 }
 0x870   : > { %v5629_v6 = vrot.slane %v15879_v32, %v12510_v12  ;;  %v5806_v31 = vcombine.low %v5784_v27, %v5791_v19 }
 0x871   : > { %v5830_v4 = vrot.slane %v5823_v61, %v12510_v12  ;;  %v13944_v49 = vrot.slane %v5645_v46, %v12510_v12  ;;  %v5807_v52 = vcombine.low %v5798_v5, %v5805_v48 }
 0x872   : > { %v5644_v3 = vcombine.low %v5622_v15, %v5629_v6  ;;  %v13950_v56 = vrot.slane %v5806_v31, %v12510_v12 }
 0x873   : > { %v13928_v63 = vcombine.low %v5830_v4, %v5837_v53  ;;  %v13953_v54 = vrot.slane %v5807_v52, %v12510_v12 }
 0x874   : > { %v13941_v14 = vrot.slane %v5644_v3, %v12510_v12 }
 0x875   : > { %v5822_v35 = vcombine.low %v13950_v56, %v13953_v54 }
 0x876   : > { %v5660_v10 = vcombine.low %v13941_v14, %v13944_v49 }
 0x913   : > { %v4864_v55 = vpop.f32.mrb[12].mxu0 }
 0x914   : > { %v10871_v23 = vmul.f32 -1.442695, %v4864_v55  ;;  %v11253_v58 = vpop.f32.mrb[13].mxu0 }
 0x916   : > { %11856 = vpow2.f32 %v10871_v23 }
 0x920   : > { %v11857_v36 = vpop.eup %11856 }
 0x921   : > { %v4871_v21 = vadd.f32 1.0, %v11857_v36 }
 0x923   : > { %11858 = vrcp.f32 %v4871_v21 }
 0x92d   : > { %v11859_v62 = vpop.eup %11858 }
 0x92e   : > { %v4881_v37 = vrot.slane %v11859_v62, %v12510_v12 }
 0x930   : > { %v4882_v7 = vcombine.high %v4881_v37, %v4881_v37  ;;  %v4889_v2 = vrot.slane %v4881_v37, %v12510_v12 }
 0x932   : > { %v4896_v18 = vrot.slane %v4882_v7, %v12510_v12  ;;  %v4897_v42 = vcombine.high %v4889_v2, %v4889_v2  ;;  %v4901_v33 = vrot.slane %v4889_v2, %v13008_v60 }
 0x934   : > { %v4905_v9 = vrot.slane %v4896_v18, %v13008_v60  ;;  %v4909_v16 = vrot.slane %v4897_v42, %v13008_v60  ;;  %v4913_v24 = vmul.f32 %v4901_v33, %v13738_v0  ;;  %v4914_v61 = vmul.f32 %v4901_v33, %v13736_v51 }
 0x936   : > { %v4919_v53 = vmax.f32 %v4913_v24, %v4914_v61  ;;  %v4915_v4 = vmul.f32 %v4905_v9, %v13744_v22  ;;  %v4916_v15 = vmul.f32 %v4905_v9, %v13742_v28  ;;  %v4917_v40 = vmul.f32 %v4909_v16, %v13750_v45 }
 0x937   : > { %v4918_v39 = vmul.f32 %v4909_v16, %v13748_v34 }
 0x938   : > { %v4920_v32 = vrot.slane %v4919_v53, 4  ;;  %v4926_v6 = vmax.f32 %v4915_v4, %v4916_v15 }
 0x939   : > { %v4933_v3 = vmax.f32 %v4917_v40, %v4918_v39 }
 0x93a   : > { %v4921_v46 = vmax.f32 %v4919_v53, %v4920_v32  ;;  %v4927_v19 = vrot.slane %v4926_v6, 4 }
 0x93b   : > { %v4934_v5 = vrot.slane %v4933_v3, 4 }
 0x93c   : > { %v4922_v48 = vrot.slane %v4921_v46, 2  ;;  %v4928_v27 = vmax.f32 %v4926_v6, %v4927_v19 }
 0x93d   : > { %v4935_v0 = vmax.f32 %v4933_v3, %v4934_v5 }
 0x93e   : > { %v4923_v31 = vmax.f32 %v4921_v46, %v4922_v48  ;;  %v4929_v51 = vrot.slane %v4928_v27, 2 }
 0x93f   : > { %v4936_v52 = vrot.slane %v4935_v0, 2 }
 0x940   : > { %v4924_v55 = vrot.slane %v4923_v31, 1  ;;  %v4930_v22 = vmax.f32 %v4928_v27, %v4929_v51 }
 0x941   : > { %v4937_v23 = vmax.f32 %v4935_v0, %v4936_v52 }
 0x942   : > { %v4925_v28 = vmax.f32 %v4923_v31, %v4924_v55  ;;  %v4931_v58 = vrot.slane %v4930_v22, 1 }
 0x943   : > { %v4938_v45 = vrot.slane %v4937_v23, 1 }
 0x944   : > { %v4940_v36 = vsub.f32 %v4913_v24, %v4925_v28  ;;  %v4941_v34 = vsub.f32 %v4914_v61, %v4925_v28  ;;  %v4932_v21 = vmax.f32 %v4930_v22, %v4931_v58 }
 0x945   : > { %v4939_v62 = vmax.f32 %v4937_v23, %v4938_v45 }
 0x946   : > { %v4946_v37 = vmul.f32 1.442695, %v4940_v36  ;;  %v4948_v7 = vmul.f32 1.442695, %v4941_v34  ;;  %v4942_v2 = vsub.f32 %v4915_v4, %v4932_v21  ;;  %v4943_v18 = vsub.f32 %v4916_v15, %v4932_v21 }
 0x947   : > { %v4944_v42 = vsub.f32 %v4917_v40, %v4939_v62  ;;  %v4945_v33 = vsub.f32 %v4918_v39, %v4939_v62 }
 0x948   : > { %11860 = vpow2.f32 %v4946_v37  ;;  %v4950_v9 = vmul.f32 1.442695, %v4942_v2  ;;  %v4952_v16 = vmul.f32 1.442695, %v4943_v18 }
 0x949   : > { %11862 = vpow2.f32 %v4948_v7  ;;  %v4954_v53 = vmul.f32 1.442695, %v4944_v42  ;;  %v4956_v32 = vmul.f32 1.442695, %v4945_v33 }
 0x94a   : > { %11864 = vpow2.f32 %v4950_v9 }
 0x94b   : > { %11866 = vpow2.f32 %v4952_v16 }
 0x94c   : > { %11868 = vpow2.f32 %v4954_v53 }
 0x94d   : > { %11870 = vpow2.f32 %v4956_v32 }
 0x952   : > { %v11861_v24 = vpop.eup %11860 }
 0x953   : > { %v11863_v61 = vpop.eup %11862 }
 0x954   : > { %v11865_v6 = vpop.eup %11864  ;;  %v4958_v3 = vadd.f32 %v11863_v61, %v11861_v24 }
 0x955   : > { %v11867_v46 = vpop.eup %11866 }
 0x956   : > { %v11869_v19 = vpop.eup %11868  ;;  %v4959_v4 = vrot.slane %v4958_v3, 4  ;;  %v4965_v15 = vadd.f32 %v11867_v46, %v11865_v6 }
 0x957   : > { %v11871_v40 = vpop.eup %11870 }
 0x958   : > { %v4960_v39 = vadd.f32 %v4959_v4, %v4958_v3  ;;  %v4966_v5 = vrot.slane %v4965_v15, 4  ;;  %v4972_v48 = vadd.f32 %v11871_v40, %v11869_v19  ;;  %v5520_v4 = vrot.slane %v13891_v43, %v12510_v12 }
 0x95a   : > { %v4961_v27 = vrot.slane %v4960_v39, 2  ;;  %v4967_v0 = vadd.f32 %v4966_v5, %v4965_v15  ;;  %v4973_v31 = vrot.slane %v4972_v48, 4 }
 0x95c   : > { %v4962_v51 = vadd.f32 %v4961_v27, %v4960_v39  ;;  %v4968_v52 = vrot.slane %v4967_v0, 2  ;;  %v4974_v55 = vadd.f32 %v4973_v31, %v4972_v48  ;;  %v5952_v48 = vld [vmem:[%s12260_s6] sm:$0xff]  ;;  %v5953_v27 = vld [vmem:[%s12260_s6 + $0x8] sm:$0x7] }
 0x95e   : > { %v4963_v22 = vrot.slane %v4962_v51, 1  ;;  %v4969_v23 = vadd.f32 %v4968_v52, %v4967_v0  ;;  %v4975_v28 = vrot.slane %v4974_v55, 2  ;;  %v11511_v0 = vpack.c.bf16 %v5953_v27, %v5952_v48  ;;  %v6164_v27 = vld [vmem:[%s15884_s10] sm:$0x3]  ;;  %s15548_s10 = scalar_lea.vmem %s12340_s4, %s10904_s15 }
 0x960   : > { %v4964_v58 = vadd.f32 %v4963_v22, %v4962_v51  ;;  %v4970_v45 = vrot.slane %v4969_v23, 1  ;;  %v4976_v36 = vadd.f32 %v4975_v28, %v4974_v55 }
 0x962   : > { %11872 = vrcp.f32 %v4964_v58  ;;  %v4971_v34 = vadd.f32 %v4970_v45, %v4969_v23  ;;  %v4977_v21 = vrot.slane %v4976_v36, 1 }
 0x964   : > { %11874 = vrcp.f32 %v4971_v34  ;;  %v4978_v62 = vadd.f32 %v4977_v21, %v4976_v36  ;;  %v15880_v36 = vld [vmem:[#allocation62_spill] sm:$0xff] }
 0x966   : > { %11876 = vrcp.f32 %v4978_v62 }
 0x96c   : > { %v11873_v37 = vpop.eup %11872 }
 0x96d   : > { %v4980_v7 = vmul.f32 %v11873_v37, %v11861_v24  ;;  %v4981_v2 = vmul.f32 %v11873_v37, %v11863_v61  ;;  %v5683_v24 = vrot.slane %v13910_v13, %v12510_v12  ;;  %v5845_v61 = vrot.slane %v13928_v63, %v12510_v12  ;;  %v15882_v37 = vld [vmem:[#allocation61_spill] sm:$0xff] }
 0x96e   : > { %v11875_v18 = vpop.eup %11874 }
 0x96f   : > { %v11498_v42 = vpack.c.bf16 %v4981_v2, %v4980_v7  ;;  %v4983_v33 = vmul.f32 %v11875_v18, %v11865_v6  ;;  %v4984_v9 = vmul.f32 %v11875_v18, %v11867_v46 }
 0x970   : > { %v11877_v16 = vpop.eup %11876 }
 0x971   : > { %11499 = vmatprep.subr.bf16.mxu0 %v11498_v42  ;;  %v11502_v53 = vpack.c.bf16 %v4984_v9, %v4983_v33  ;;  %v4986_v32 = vmul.f32 %v11877_v16, %v11869_v19  ;;  %v4987_v3 = vmul.f32 %v11877_v16, %v11871_v40 }
 0x972   : > { %11501 = vmatpush3.bf16.msra.mxu0 %v11498_v42 }
 0x973   : > { %11503 = vmatprep.subr.bf16.mxu0 %v11502_v53  ;;  %v11506_v15 = vpack.c.bf16 %v4987_v3, %v4986_v32 }
 0x975   : > { %11306 = vmatmul.mubr.msk.f32.vlgmr.msra.gmra.mrb[14].mxu0 %vm5521_vm12, %v5520_v4  ;;  %v6080_v4 = vld [vmem:[%s15881_s23] sm:$0x3]  ;;  %s15958_s23 = sld [smem:[#allocation28_spill]] }
 0x976   : > { %11505 = vmatpush3.bf16.msra.mxu0 %v11502_v53  ;;  %11312 = vmatprep.mubr.msk.f32.mxu0 %vm5521_vm12, %v5660_v10 }
 0x977   : > { %11507 = vmatprep.subr.bf16.mxu0 %v11506_v15 }
 0x979   : > { %11313 = vmatmul.mubr.msk.f32.vlgmr.msra.gmra.mrb[16].mxu0 %vm5521_vm12, %v5683_v24 }
 0x97a   : > { %11509 = vmatpush3.bf16.msra.mxu0 %v11506_v15  ;;  %11319 = vmatprep.mubr.msk.f32.mxu0 %vm5521_vm12, %v5822_v35  ;;  %v10879_v15 = vld [vmem:[%s15883_s18] ss:$0 sm:$0xff]  ;;  %s15959_s18 = sld [smem:[#allocation27_spill]] }
 0x97b   : > { %11510 = vmatprep.subr.bf16.mxu0 %v15872_v57 }
 0x97d   : > { %11320 = vmatmul.mubr.msk.f32.vlgmr.msra.gmra.mrb[18].mxu0 %vm5521_vm12, %v5845_v61 }
 0x97e   : > { %11326 = vmatprep.mubr.msk.f32.mxu0 %vm12183_vm0, %v15873_v29  ;;  %11513 = vmatpush3.bf16.msk.msra.mxu0 %vm12971_vm5, %v11511_v0  ;;  %v6559_v0 = vld [vmem:[%s15885_s22] sm:$0xff] }
 0x97f   : > { %11329 = vmatprep.subr.mxu0 %v15873_v29 }
 0xa48   : > { %v13989_v43 = vpop.f32.mrb[14].mxu0 }
 0xa49   : > { %v5926_v13 = vadd.f32 %v13989_v43, %v13724_v47  ;;  %v13993_v63 = vpop.f32.mrb[15].mxu0 }
 0xa4a   : > { %v5925_v14 = vadd.f32 %v13993_v63, %v13726_v1 }
 0xa4b   : > { %v5933_v49 = vsel %vm2256_vm3, %v5926_v13, 0.0 }
 0xa4c   : > { %5934 = vadd.xlane.f32.xlu0 %v5933_v49  ;;  %5931 = vadd.xlane.f32.xlu1 %v5925_v14  ;;  %v13998_v10 = vpop.f32.mrb[16].mxu0 }
 0xa4d   : > { %v5928_v56 = vadd.f32 %v13998_v10, %v13728_v8  ;;  %v14002_v54 = vpop.f32.mrb[17].mxu0 }
 0xa4e   : > { %v5927_v35 = vadd.f32 %v14002_v54, %v13730_v11 }
 0xa4f   : > { %v5938_v39 = vsel %vm2256_vm3, %v5928_v56, 0.0 }
 0xa50   : > { %5936 = vadd.xlane.f32.xlu0 %v5927_v35  ;;  %v14006_v6 = vpop.f32.mrb[18].mxu0 }
 0xa51   : > { %v5930_v46 = vadd.f32 %v14006_v6, %v13732_v44  ;;  %v14010_v19 = vpop.f32.mrb[19].mxu0 }
 0xa52   : > { %v5929_v40 = vadd.f32 %v14010_v19, %v13734_v25 }
 0xa53   : > { %v5943_v5 = vsel %vm2256_vm3, %v5930_v46, 0.0 }
 0xa54   : > { %5939 = vadd.xlane.f32.xlu0 %v5938_v39  ;;  %5941 = vadd.xlane.f32.xlu1 %v5929_v40 }
 0xa58   : > { %5944 = vadd.xlane.f32.xlu0 %v5943_v5 }
 0xad9   : > { %v5935_v31 = vpop.xlane.xlu0 %5934  ;;  %v5932_v51 = vpop.xlane.xlu1 %5931 }
 0xada   : > { %v5947_v55 = vmul.f32 0.0078125, %v5935_v31  ;;  %v5946_v22 = vmul.f32 0.0078125, %v5932_v51  ;;  %v6560_v31 = vld [vmem:[%s15885_s22 + $0x8] sm:$0xff]  ;;  %v6561_v51 = vld [vmem:[%s15885_s22 + $0x10] sm:$0xff] }
 0xadc   : > { %v5974_v62 = vrot.slane %v5947_v55, %v15880_v36  ;;  %v5970_v30 = vrot.slane %v5946_v22, %v15882_v37  ;;  %v6562_v55 = vld [vmem:[%s15885_s22 + $0x18] sm:$0xff] }
 0xadd   : > { %v5937_v52 = vpop.xlane.xlu0 %5936  ;;  %v11518_v22 = vpack.c.bf16 %v6562_v55, %v6561_v51 }
 0xade   : > { %v5948_v23 = vmul.f32 0.0078125, %v5937_v52  ;;  %v5975_v16 = vsel %vm2229_vm6, %v5974_v62, %v5970_v30  ;;  %v11515_v52 = vpack.c.bf16 %v6560_v31, %v6559_v0 }
 0xae0   : > { %v5979_v7 = vrot.slane %v5948_v23, %v15882_v37  ;;  %11516 = vmatpush3.bf16.msra.mxu1 %v11515_v52 }
 0xae1   : > { %v5940_v28 = vpop.xlane.xlu0 %5939  ;;  %v5942_v58 = vpop.xlane.xlu1 %5941  ;;  %11517 = vmatprep.subr.bf16.mxu1 %v15872_v57 }
 0xae2   : > { %v5949_v45 = vmul.f32 0.0078125, %v5940_v28  ;;  %v5950_v21 = vmul.f32 0.0078125, %v5942_v58  ;;  %v10882_v58 = vld [vmem:[%s15886_s11] ss:$0 sm:$0xff] }
 0xae4   : > { %v5983_v34 = vrot.slane %v5949_v45, %v15880_v36  ;;  %v5988_v33 = vrot.slane %v5950_v21, %v15882_v37  ;;  %11519 = vmatpush3.bf16.msra.mxu1 %v11518_v22  ;;  %v10885_v45 = vld [vmem:[%s15887_s1] ss:$0 sm:$0xff] }
 0xae5   : > { %v5945_v2 = vpop.xlane.xlu0 %5944  ;;  %11520 = vmatprep.subr.bf16.mxu1 %v15872_v57 }
 0xae6   : > { %v5951_v18 = vmul.f32 0.0078125, %v5945_v2  ;;  %v5984_v42 = vsel %vm2229_vm6, %v5983_v34, %v5979_v7 }
 0xae7   : > { %v5994_v32 = vsel %vm2249_vm7, %v5984_v42, %v5975_v16  ;;  %v6564_v42 = vld [vmem:[%s15885_s22 + $0x28] sm:$0xff]  ;;  %v6566_v16 = vld [vmem:[%s15885_s22 + $0x38] sm:$0xff] }
 0xae8   : > { %v5992_v9 = vrot.slane %v5951_v18, %v15880_v36  ;;  %v6563_v18 = vld [vmem:[%s15885_s22 + $0x20] sm:$0xff] }
 0xaea   : > { %v5993_v53 = vsel %vm2229_vm6, %v5992_v9, %v5988_v33  ;;  %v11521_v33 = vpack.c.bf16 %v6564_v42, %v6563_v18  ;;  %v6565_v9 = vld [vmem:[%s15885_s22 + $0x30] sm:$0xff] }
 0xaeb   : > { %v5995_v3 = vsel %vm2251_vm8, %v5993_v53, %v5994_v32  ;;  %v11524_v53 = vpack.c.bf16 %v6566_v16, %v6565_v9  ;;  %v6567_v32 = vld [vmem:[%s15885_s22 + $0x40] sm:$0xff] }
 0xaec   : > { %11327 = vmatmul.mubr.msk.f32.vlgmr.msra.gmra.mrb[20].mxu0 %vm2253_vm9, %v5995_v3  ;;  %11522 = vmatpush3.bf16.msra.mxu1 %v11521_v33  ;;  %v6568_v3 = vld [vmem:[%s15885_s22 + $0x48] sm:$0xff] }
 0xaed   : > { %11331 = vmatprep.mubr.msk.f32.mxu0 %vm12183_vm0, %v15873_v29  ;;  %11330 = vmatpush3.msk.msra.mxu0 %vm2335_vm10, %v6080_v4  ;;  %v11527_v4 = vpack.c.bf16 %v6568_v3, %v6567_v32 }
 0xaee   : > { %11334 = vmatprep.subr.mxu0 %v15873_v29  ;;  %11523 = vmatprep.subr.bf16.mxu1 %v15872_v57 }
 0xaf0   : > { %11525 = vmatpush3.bf16.msra.mxu1 %v11524_v53 }
 0xaf1   : > { %11526 = vmatprep.subr.bf16.mxu1 %v15872_v57 }
 0xaf4   : > { %11528 = vmatpush3.bf16.msra.mxu1 %v11527_v4 }
 0xaf5   : > { %11529 = vmatprep.subr.bf16.mxu1 %v15872_v57 }
 0xbbf   : > { %v6067_v24 = vpop.f32.mrb[20].mxu0 }
 0xbc0   : > { %v6068_v61 = vadd.f32 %v10879_v15, %v6067_v24  ;;  %v11328_v13 = vpop.f32.mrb[21].mxu0 }
 0xbc1   : > { %v6569_v13 = vld [vmem:[%s15885_s22 + $0x50] sm:$0xff] }
 0xbc2   : > { %v6071_v14 = vmul.f32 %v6068_v61, %v6068_v61 }
 0xbc4   : > { %v6072_v49 = vmul.f32 %v6071_v14, %v6068_v61  ;;  %v6570_v14 = vld [vmem:[%s15885_s22 + $0x58] sm:$0xff] }
 0xbc6   : > { %v6073_v56 = vmul.f32 0.044715, %v6072_v49 }
 0xbc8   : > { %v6074_v35 = vadd.f32 %v6073_v56, %v6068_v61  ;;  %v11530_v56 = vpack.c.bf16 %v6570_v14, %v6569_v13 }
 0xbca   : > { %v6075_v46 = vmul.f32 0.7978846, %v6074_v35  ;;  %11531 = vmatpush3.bf16.msra.mxu1 %v11530_v56 }
 0xbcb   : > { %11532 = vmatprep.subr.bf16.mxu1 %v15872_v57 }
 0xbcc   : > { %11878 = vtanh.f32 %v6075_v46 }
 0xbd6   : > { %v11879_v40 = vpop.eup %11878 }
 0xbd7   : > { %v6077_v39 = vadd.f32 1.0, %v11879_v40  ;;  %v6571_v40 = vld [vmem:[%s15885_s22 + $0x60] sm:$0xff] }
 0xbd9   : > { %v6078_v5 = vmul.f32 0.5, %v6077_v39  ;;  %v6572_v39 = vld [vmem:[%s15885_s22 + $0x68] sm:$0xff] }
 0xbdb   : > { %v6079_v48 = vmul.f32 %v6078_v5, %v6068_v61  ;;  %v11533_v5 = vpack.c.bf16 %v6572_v39, %v6571_v40 }
 0xbdd   : > { %11332 = vmatmul.mubr.msk.f32.vlgmr.msra.gmra.mrb[22].mxu0 %vm2184_vm2, %v6079_v48  ;;  %11534 = vmatpush3.bf16.msra.mxu1 %v11533_v5 }
 0xbde   : > { %11335 = vmatpush3.msk.msra.mxu0 %vm2335_vm10, %v6164_v27  ;;  %11336 = vmatprep.mubr.msk.f32.mxu0 %vm12183_vm0, %v15873_v29  ;;  %v6574_v27 = vld [vmem:[%s15885_s22 + $0x78] sm:$0xff] }
 0xbdf   : > { %11535 = vmatprep.subr.bf16.mxu1 %v15872_v57 }
 0xbe1   : > { %11337 = vmatmul.mubr.msk.f32.vlgmr.msra.gmra.mrb[24].mxu0 %vm2184_vm2, %v6079_v48  ;;  %v6573_v48 = vld [vmem:[%s15885_s22 + $0x70] sm:$0xff] }
 0xbe2   : > { %8694 = vmatprep.mubr.f32.mxu0 %v15873_v29  ;;  %v11536_v0 = vpack.c.bf16 %v6574_v27, %v6573_v48 }
 0xbe4   : > { %11537 = vmatpush3.bf16.msra.mxu1 %v11536_v0 }
 0xcb0   : > { %v6160_v23 = vpop.f32.mrb[22].mxu0 }
 0xcb1   : > { %v11333_v28 = vpop.f32.mrb[23].mxu0  ;;  %v6161_v34 = vadd.f32 %v10882_v58, %v6160_v23 }
 0xcb4   : > { %v6241_v36 = vpop.f32.mrb[24].mxu0 }
 0xcb5   : > { %v6242_v21 = vadd.f32 %v10885_v45, %v6241_v36  ;;  %v11338_v62 = vpop.f32.mrb[25].mxu0 }
 0xcb7   : > { %v6245_v37 = vsub.f32 %v6161_v34, %v6242_v21 }
 0xcb9   : > { %v10888_v30 = vmul.f32 -1.442695, %v6245_v37 }
 0xcbb   : > { %11880 = vpow2.f32 %v10888_v30 }
 0xcc5   : > { %v11881_v7 = vpop.eup %11880 }
 0xcc6   : > { %v6249_v2 = vadd.f32 1.0, %v11881_v7 }
 0xcc8   : > { %11882 = vrcp.f32 %v6249_v2 }
 0xcd2   : > { %v11883_v15 = vpop.eup %11882 }
 0xcd3   : > { %v6255_v24 = vrot.slane %v11883_v15, %v13008_v60  ;;  %v6291_v61 = vsub.f32 1.0, %v11883_v15  ;;  %v6266_v35 = vrot.slane %v11883_v15, %v13005_v59  ;;  %v6277_v46 = vrot.slane %v11883_v15, %v13013_v38 }
 0xcd5   : > { %6257 = vbcast.lane.b32.xlu1 %v6255_v24, 256  ;;  %v6295_v49 = vrot.slane %v6291_v61, %v13008_v60  ;;  %v6306_v31 = vrot.slane %v6291_v61, %v13005_v59  ;;  %v6317_v51 = vrot.slane %v6291_v61, %v13013_v38 }
 0xcd7   : > { %6297 = vbcast.lane.b32.xlu0 %v6295_v49, 256 }
 0xcd9   : > { %6268 = vbcast.lane.b32.xlu1 %v6266_v35, 256 }
 0xcdb   : > { %6279 = vbcast.lane.b32.xlu0 %v6277_v46, 256 }
 0xcdd   : > { %6261 = vbcast.lane.b32.xlu1 %v6255_v24, 264 }
 0xcdf   : > { %6301 = vbcast.lane.b32.xlu0 %v6295_v49, 264 }
 0xce1   : > { %6308 = vbcast.lane.b32.xlu1 %v6306_v31, 256 }
 0xce3   : > { %6319 = vbcast.lane.b32.xlu0 %v6317_v51, 256 }
 0xce5   : > { %6272 = vbcast.lane.b32.xlu1 %v6266_v35, 264 }
 0xce7   : > { %6323 = vbcast.lane.b32.xlu0 %v6317_v51, 264 }
 0xce9   : > { %6312 = vbcast.lane.b32.xlu1 %v6306_v31, 264 }
 0xced   : > { %6283 = vbcast.lane.b32.xlu1 %v6277_v46, 264 }
 0xd47   : > { %v6258_v52 = vpop.permute.xlu1 %6257 }
 0xd48   : > { %v6285_v22 = vmul.f32 %v6258_v52, %v13726_v1 }
 0xd49   : > { %v6298_v55 = vpop.permute.xlu0 %6297 }
 0xd4a   : > { %v6325_v57 = vmul.f32 %v6298_v55, %v13993_v63 }
 0xd4b   : > { %v6269_v23 = vpop.permute.xlu1 %6268 }
 0xd4c   : > { %v6331_v28 = vadd.f32 %v6325_v57, %v6285_v22  ;;  %v6287_v32 = vmul.f32 %v6269_v23, %v13730_v11 }
 0xd4d   : > { %v6280_v58 = vpop.permute.xlu0 %6279 }
 0xd4e   : > { %v6343_v45 = vcombine.high %v6331_v28, %v6331_v28  ;;  %v6350_v36 = vrot.slane %v6331_v28, %v12510_v12  ;;  %v6289_v11 = vmul.f32 %v6280_v58, %v13734_v25 }
 0xd4f   : > { %v6262_v34 = vpop.permute.xlu1 %6261 }
 0xd50   : > { %v6357_v21 = vrot.slane %v6343_v45, %v12510_v12  ;;  %v6358_v62 = vcombine.high %v6350_v36, %v6350_v36  ;;  %v6366_v37 = vrot.slane %v6350_v36, %v12510_v12  ;;  %v6286_v1 = vmul.f32 %v13724_v47, %v6262_v34 }
 0xd51   : > { %v6302_v30 = vpop.permute.xlu0 %6301 }
 0xd52   : > { %v6359_v7 = vcombine.high %v6357_v21, %v6357_v21  ;;  %v6380_v2 = vrot.slane %v6358_v62, %v12510_v12  ;;  %v6326_v63 = vmul.f32 %v13989_v43, %v6302_v30  ;;  %v6373_v18 = vrot.slane %v6357_v21, %v12510_v12 }
 0xd53   : > { %v6309_v42 = vpop.permute.xlu1 %6308 }
 0xd54   : > { %v6387_v33 = vrot.slane %v6359_v7, %v12510_v12  ;;  %v6582_v9 = vcombine.low %v6366_v37, %v6380_v2  ;;  %v10890_v16 = vcombine.high %v6366_v37, %v6380_v2  ;;  %v6332_v53 = vadd.f32 %v6326_v63, %v6286_v1 }
 0xd55   : > { %v6327_v3 = vmul.f32 %v6309_v42, %v14002_v54  ;;  %v6320_v4 = vpop.permute.xlu0 %6319 }
 0xd56   : > { %v6584_v15 = vcombine.low %v6373_v18, %v6387_v33  ;;  %v10891_v24 = vcombine.high %v6373_v18, %v6387_v33  ;;  %v6592_v61 = vrot.slane %v6582_v9, %v12510_v12  ;;  %v6599_v47 = vrot.slane %v10890_v16, %v12510_v12 }
 0xd57   : > { %v6398_v43 = vrot.slane %v6332_v53, %v12510_v12  ;;  %v6333_v13 = vadd.f32 %v6327_v3, %v6287_v32  ;;  %v6329_v14 = vmul.f32 %v6320_v4, %v14010_v19  ;;  %v6273_v49 = vpop.permute.xlu1 %6272 }
 0xd58   : > { %v6606_v56 = vrot.slane %v6584_v15, %v12510_v12  ;;  %v6613_v35 = vrot.slane %v10891_v24, %v12510_v12  ;;  %v6614_v5 = vcombine.low %v6592_v61, %v6599_v47  ;;  %v6288_v27 = vmul.f32 %v13728_v8, %v6273_v49 }
 0xd59   : > { %v6399_v54 = vcombine.high %v6398_v43, %v6398_v43  ;;  %v6406_v46 = vrot.slane %v6398_v43, %v12510_v12  ;;  %v6415_v40 = vcombine.high %v6333_v13, %v6333_v13  ;;  %v6422_v39 = vrot.slane %v6333_v13, %v12510_v12  ;;  %v6324_v23 = vpop.permute.xlu0 %6323 }
 0xd5a   : > { %v6335_v48 = vadd.f32 %v6329_v14, %v6289_v11  ;;  %v6615_v55 = vcombine.low %v6606_v56, %v6613_v35  ;;  %v6330_v7 = vmul.f32 %v14006_v6, %v6324_v23  ;;  %v6622_v1 = vrot.slane %v6614_v5, %v12510_v12 }
 0xd5b   : > { %v6413_v0 = vrot.slane %v6399_v54, %v12510_v12  ;;  %v6414_v19 = vcombine.high %v6406_v46, %v6406_v46  ;;  %v6429_v31 = vrot.slane %v6415_v40, %v12510_v12  ;;  %v6430_v51 = vcombine.high %v6422_v39, %v6422_v39  ;;  %v6313_v52 = vpop.permute.xlu1 %6312 }
 0xd5c   : > { %v6438_v25 = vrot.slane %v6422_v39, %v12510_v12  ;;  %v6487_v22 = vcombine.high %v6335_v48, %v6335_v48  ;;  %v6494_v57 = vrot.slane %v6335_v48, %v12510_v12  ;;  %v6328_v8 = vmul.f32 %v13998_v10, %v6313_v52 }
 0xd5d   : > { %v6431_v28 = vcombine.high %v6429_v31, %v6429_v31  ;;  %v6445_v58 = vrot.slane %v6429_v31, %v12510_v12  ;;  %v6452_v45 = vrot.slane %v6430_v51, %v12510_v12  ;;  %v6631_v37 = vcombine.low %v6406_v46, %v6413_v0 }
 0xd5e   : > { %v6460_v36 = vcombine.high %v6438_v25, %v6438_v25  ;;  %v6632_v34 = vcombine.low %v6414_v19, %v6438_v25  ;;  %v6501_v21 = vrot.slane %v6487_v22, %v12510_v12  ;;  %v6502_v62 = vcombine.high %v6494_v57, %v6494_v57 }
 0xd5f   : > { %v6462_v30 = vcombine.high %v6452_v45, %v6452_v45  ;;  %v6284_v2 = vpop.permute.xlu1 %6283  ;;  %v6459_v63 = vrot.slane %v6431_v28, %v12510_v12  ;;  %v6461_v18 = vcombine.high %v6445_v58, %v6445_v58  ;;  %v6510_v10 = vrot.slane %v6494_v57, %v12510_v12 }
 0xd60   : > { %v6503_v42 = vcombine.high %v6501_v21, %v6501_v21  ;;  %v6524_v33 = vrot.slane %v6502_v62, %v12510_v12  ;;  %v6334_v16 = vadd.f32 %v6328_v8, %v6288_v27  ;;  %v6290_v53 = vmul.f32 %v13732_v44, %v6284_v2 }
 0xd61   : > { %v6634_v9 = vcombine.low %v6462_v30, %v6445_v58  ;;  %v6633_v32 = vcombine.low %v6452_v45, %v6460_v36  ;;  %v6517_v3 = vrot.slane %v6501_v21, %v12510_v12  ;;  %v6629_v4 = vrot.slane %v6615_v55, %v12510_v12 }
 0xd62   : > { %v6531_v6 = vrot.slane %v6503_v42, %v12510_v12  ;;  %v6470_v15 = vrot.slane %v6334_v16, %v12510_v12  ;;  %v6336_v24 = vadd.f32 %v6330_v7, %v6290_v53  ;;  %v6641_v61 = vrot.slane %v6631_v37, %v12510_v12 }
 0xd63   : > { %v6648_v47 = vrot.slane %v6632_v34, %v12510_v12  ;;  %v6683_v43 = vcombine.low %v6510_v10, %v6524_v33  ;;  %v6463_v14 = vcombine.high %v6459_v63, %v6459_v63  ;;  %v6630_v49 = vcombine.low %v6622_v1, %v6629_v4 }
 0xd64   : > { %v6730_v13 = vcombine.low %v6517_v3, %v6531_v6  ;;  %v6471_v56 = vcombine.high %v6470_v15, %v6470_v15  ;;  %v6478_v44 = vrot.slane %v6470_v15, %v12510_v12  ;;  %v6542_v35 = vrot.slane %v6336_v24, %v12510_v12 }
 0xd65   : > { %v6662_v11 = vrot.slane %v6634_v9, %v12510_v12  ;;  %v10892_v54 = vcombine.high %v6510_v10, %v6524_v33  ;;  %11372 = vmatmul.mubr.f32.vlgmr.msra.gmra.mrb[32].mxu1 %v6630_v49  ;;  %v6655_v46 = vrot.slane %v6633_v32, %v12510_v12  ;;  %v6663_v40 = vcombine.low %v6641_v61, %v6648_v47  ;;  %v14151_v32 = vld [vmem:[%s15888_s2] ss:$0 sm:$0xff] }
 0xd66   : > { %v6680_v39 = vcombine.low %v6459_v63, %v6461_v18  ;;  %v6485_v5 = vrot.slane %v6471_v56, %v12510_v12  ;;  %v6486_v48 = vcombine.high %v6478_v44, %v6478_v44  ;;  %v6681_v27 = vcombine.low %v6463_v14, %v6478_v44  ;;  %11374 = vmatprep.mubr.msk.f32.mxu1 %vm12183_vm0, %v15873_v29  ;;  %v15890_v49 = vld [vmem:[#allocation33_spill] sm:$0xff] }
 0xd67   : > { %v6543_v0 = vcombine.high %v6542_v35, %v6542_v35  ;;  %v10893_v19 = vcombine.high %v6517_v3, %v6531_v6  ;;  %v6550_v31 = vrot.slane %v6542_v35, %v12510_v12  ;;  %v6664_v51 = vcombine.low %v6655_v46, %v6662_v11  ;;  %v15891_v46 = vld [vmem:[#allocation32_spill] sm:$0xff] }
 0xd68   : > { %v6690_v52 = vrot.slane %v6680_v39, %v12510_v12  ;;  %v6682_v55 = vcombine.low %v6485_v5, %v6486_v48  ;;  %v6697_v22 = vrot.slane %v6681_v27, %v12510_v12  ;;  %v6746_v57 = vrot.slane %v6730_v13, %v12510_v12  ;;  %v15889_v13 = vld [vmem:[#allocation29_spill] sm:$0xff]  ;;  %v15892_v5 = vld [vmem:[#allocation47_spill] sm:$0xff]  ;;  %v15893_v27 = vld [vmem:[#allocation50_spill] sm:$0xff] }
 0xd69   : > { %v6557_v25 = vrot.slane %v6543_v0, %v12510_v12  ;;  %v6671_v23 = vrot.slane %v6663_v40, %v12510_v12  ;;  %v6678_v28 = vrot.slane %v6664_v51, %v12510_v12  ;;  %v6711_v58 = vrot.slane %v6683_v43, %v12510_v12 }
 0xd6a   : > { %v6704_v8 = vrot.slane %v6682_v55, %v12510_v12  ;;  %v6712_v36 = vcombine.low %v6690_v52, %v6697_v22  ;;  %v6739_v34 = vrot.slane %v10892_v54, %v12510_v12  ;;  %v6753_v37 = vrot.slane %v10893_v19, %v12510_v12  ;;  %v15894_v19 = vld [vmem:[#allocation38_spill] sm:$0xff] }
 0xd6b   : > { %v6732_v45 = vcombine.low %v6550_v31, %v6557_v25  ;;  %v6679_v21 = vcombine.low %v6671_v23, %v6678_v28  ;;  %v6558_v9 = vcombine.high %v6550_v31, %v6550_v31  ;;  %v1060_v14 = vcombine.high %v15889_v13, %v15889_v13 }
 0xd6c   : > { %v6713_v62 = vcombine.low %v6704_v8, %v6711_v58  ;;  %v6761_v7 = vcombine.low %v6739_v34, %v6746_v57  ;;  %v6720_v2 = vrot.slane %v6712_v36, %v12510_v12  ;;  %v1062_v56 = vcombine.high %v15890_v49, %v15890_v49  ;;  %v15895_v58 = vld [vmem:[#allocation48_spill] sm:$0xff] }
 0xd6d   : > { %v6760_v30 = vrot.slane %v6732_v45, %v12510_v12  ;;  %11375 = vmatmul.mubr.f32.gmra.mrb[34].mxu1 %v6679_v21  ;;  %v6784_v16 = vrot.slane %v6558_v9, %v12510_v12  ;;  %v1061_v40 = vcombine.high %v15891_v46, %v15891_v46  ;;  %v1204_v48 = vcombine.high %v15892_v5, %v15892_v5 }
 0xd6e   : > { %11377 = vmatprep.mubr.msk.f32.mxu1 %vm12183_vm0, %v15873_v29  ;;  %v6727_v1 = vrot.slane %v6713_v62, %v12510_v12  ;;  %v6769_v42 = vrot.slane %v6761_v7, %v12510_v12  ;;  %v1205_v0 = vcombine.high %v15893_v27, %v15893_v27  ;;  %v1063_v31 = vcombine.high %v15894_v19, %v15894_v19  ;;  %v15896_v7 = vld [vmem:[#allocation52_spill] sm:$0xff] }
 0xd6f   : > { %v6762_v63 = vcombine.low %v6753_v37, %v6760_v30  ;;  %v6791_v53 = vrot.slane %v6784_v16, %v12510_v12  ;;  %v1206_v45 = vcombine.high %v15895_v58, %v15895_v58 }
 0xd70   : > { %v6728_v18 = vcombine.low %v6720_v2, %v6727_v1  ;;  %v1207_v2 = vcombine.high %v15896_v7, %v15896_v7 }
 0xd71   : > { %v6776_v33 = vrot.slane %v6762_v63, %v12510_v12 }
 0xd72   : > { %11378 = vmatmul.mubr.f32.gmra.mrb[36].mxu1 %v6728_v18 }
 0xd73   : > { %v6777_v10 = vcombine.low %v6769_v42, %v6776_v33  ;;  %11380 = vmatprep.mubr.msk.f32.mxu1 %vm12183_vm0, %v15873_v29 }
 0xd76   : > { %11381 = vmatmul.mubr.f32.gmra.mrb[38].mxu1 %v6777_v10 }
 0xd77   : > { %11383 = vmatprep.mubr.msk.f32.mxu1 %vm12183_vm0, %v15873_v29 }
 0xd7a   : > { %11384 = vmatmul.mubr.f32.gmra.mrb[40].mxu1 %v6791_v53 }
 0xe38   : > { %v6863_v3 = vpop.f32.mrb[32].mxu1 }
 0xe39   : > { %v6864_v6 = vadd.f32 %v14151_v32, %v6863_v3  ;;  %v11373_v4 = vpop.f32.mrb[33].mxu1 }
 0xe3b   : > { %v6892_v15 = vcombine.high %v6864_v6, %v6864_v6  ;;  %v6899_v24 = vrot.slane %v6864_v6, %v12510_v12 }
 0xe3d   : > { %v6906_v61 = vrot.slane %v6892_v15, %v12510_v12  ;;  %v6907_v47 = vcombine.high %v6899_v24, %v6899_v24  ;;  %v6915_v43 = vrot.slane %v6899_v24, %v12510_v12 }
 0xe3f   : > { %v6908_v44 = vcombine.high %v6906_v61, %v6906_v61  ;;  %v6922_v35 = vrot.slane %v6906_v61, %v12510_v12  ;;  %v6929_v11 = vrot.slane %v6907_v47, %v12510_v12  ;;  %v6937_v54 = vcombine.high %v6915_v43, %v6915_v43 }
 0xe40   : > { %v6868_v39 = vpop.f32.mrb[34].mxu1  ;;  %v14176_v57 = vadd.f32 %v6915_v43, %v15889_v13 }
 0xe41   : > { %v6936_v51 = vrot.slane %v6908_v44, %v12510_v12  ;;  %v6938_v52 = vcombine.high %v6922_v35, %v6922_v35  ;;  %v6939_v55 = vcombine.high %v6929_v11, %v6929_v11  ;;  %v14173_v25 = vadd.f32 %v6929_v11, %v15890_v49  ;;  %v11376_v22 = vpop.f32.mrb[35].mxu1 }
 0xe42   : > { %v14178_v23 = vadd.f32 %v6937_v54, %v1060_v14  ;;  %v6869_v28 = vadd.f32 %v14151_v32, %v6868_v39  ;;  %v14186_v34 = vadd.f32 %v6922_v35, %v15891_v46  ;;  %v15897_v14 = vld [vmem:[#allocation30_spill] sm:$0xff] }
 0xe43   : > { %v6940_v8 = vcombine.high %v6936_v51, %v6936_v51  ;;  %v14183_v36 = vadd.f32 %v6939_v55, %v1062_v56  ;;  %v14189_v21 = vadd.f32 %v6936_v51, %v15894_v19  ;;  %v7201_v62 = vcombine.low %v14176_v57, %v14173_v25  ;;  %v15898_v39 = vld [vmem:[#allocation34_spill] sm:$0xff]  ;;  %v15899_v51 = vld [vmem:[#allocation35_spill] sm:$0xff]  ;;  %v15900_v55 = vld [vmem:[#allocation36_spill] sm:$0xff] }
 0xe44   : > { %v6941_v37 = vcombine.high %v6869_v28, %v6869_v28  ;;  %v6948_v30 = vrot.slane %v6869_v28, %v12510_v12  ;;  %v14196_v1 = vadd.f32 %v6938_v52, %v1061_v40 }
 0xe45   : > { %v6873_v63 = vpop.f32.mrb[36].mxu1  ;;  %v14198_v18 = vadd.f32 %v6940_v8, %v1063_v31  ;;  %v7202_v42 = vcombine.low %v14178_v23, %v14183_v36  ;;  %v7203_v33 = vcombine.low %v14186_v34, %v14189_v21  ;;  %v7211_v4 = vrot.slane %v7201_v62, %v12510_v12 }
 0xe46   : > { %v6955_v9 = vrot.slane %v6941_v37, %v12510_v12  ;;  %v6956_v10 = vcombine.high %v6948_v30, %v6948_v30  ;;  %v6964_v16 = vrot.slane %v6948_v30, %v12510_v12  ;;  %v6874_v53 = vadd.f32 %v14151_v32, %v6873_v63  ;;  %v11379_v3 = vpop.f32.mrb[37].mxu1  ;;  %v15901_v37 = vld [vmem:[#allocation31_spill] sm:$0xff]  ;;  %v15902_v63 = vld [vmem:[#allocation37_spill] sm:$0xff] }
 0xe47   : > { %v7204_v6 = vcombine.low %v14196_v1, %v14198_v18  ;;  %v7218_v15 = vrot.slane %v7202_v42, %v12510_v12  ;;  %v7225_v24 = vrot.slane %v7203_v33, %v12510_v12  ;;  %v15903_v33 = vld [vmem:[#allocation40_spill] sm:$0xff] }
 0xe48   : > { %v6957_v61 = vcombine.high %v6955_v9, %v6955_v9  ;;  %v6971_v47 = vrot.slane %v6955_v9, %v12510_v12  ;;  %v6978_v43 = vrot.slane %v6956_v10, %v12510_v12  ;;  %v6986_v13 = vcombine.high %v6964_v16, %v6964_v16 }
 0xe49   : > { %v14215_v49 = vadd.f32 %v6964_v16, %v15897_v14  ;;  %v6990_v56 = vcombine.high %v6874_v53, %v6874_v53  ;;  %v6997_v44 = vrot.slane %v6874_v53, %v12510_v12  ;;  %v6878_v35 = vpop.f32.mrb[38].mxu1  ;;  %v7232_v11 = vrot.slane %v7204_v6, %v12510_v12 }
 0xe4a   : > { %v6985_v54 = vrot.slane %v6957_v61, %v12510_v12  ;;  %v6987_v46 = vcombine.high %v6971_v47, %v6971_v47  ;;  %v6988_v40 = vcombine.high %v6978_v43, %v6978_v43  ;;  %v14221_v19 = vadd.f32 %v6978_v43, %v15898_v39  ;;  %v11382_v31 = vpop.f32.mrb[39].mxu1 }
 0xe4b   : > { %v14224_v52 = vadd.f32 %v6986_v13, %v15899_v51  ;;  %v14227_v22 = vadd.f32 %v6971_v47, %v15900_v55  ;;  %v7004_v28 = vrot.slane %v6990_v56, %v12510_v12  ;;  %v7005_v8 = vcombine.high %v6997_v44, %v6997_v44  ;;  %v15906_v55 = vld [vmem:[#allocation45_spill] sm:$0xff] }
 0xe4c   : > { %v6989_v62 = vcombine.high %v6985_v54, %v6985_v54  ;;  %v14231_v30 = vadd.f32 %v6988_v40, %v15901_v37  ;;  %v14234_v42 = vadd.f32 %v6985_v54, %v15902_v63  ;;  %v14237_v9 = vadd.f32 %v6987_v46, %v15903_v33  ;;  %v15904_v40 = vld [vmem:[#allocation41_spill] sm:$0xff]  ;;  %v15907_v37 = vld [vmem:[#allocation43_spill] sm:$0xff]  ;;  %v15909_v33 = vld [vmem:[#allocation44_spill] sm:$0xff] }
 0xe4d   : > { %v7250_v10 = vcombine.low %v14215_v49, %v14221_v19  ;;  %v7006_v16 = vcombine.high %v7004_v28, %v7004_v28  ;;  %v7013_v53 = vrot.slane %v6997_v44, %v12510_v12  ;;  %v7020_v3 = vrot.slane %v7004_v28, %v12510_v12  ;;  %v6883_v6 = vpop.f32.mrb[40].mxu1  ;;  %v15905_v44 = vld [vmem:[#allocation42_spill] sm:$0xff] }
 0xe4e   : > { %v7027_v61 = vrot.slane %v7005_v8, %v12510_v12  ;;  %v6879_v47 = vadd.f32 %v14151_v32, %v6878_v35  ;;  %v6884_v43 = vadd.f32 %v14151_v32, %v6883_v6  ;;  %v11385_v13 = vpop.f32.mrb[41].mxu1  ;;  %v7233_v14 = vcombine.low %v7211_v4, %v7218_v15  ;;  %v15908_v4 = vld [vmem:[#allocation46_spill] sm:$0xff] }
 0xe4f   : > { %v7034_v56 = vrot.slane %v7006_v16, %v12510_v12  ;;  %v7035_v54 = vcombine.high %v7013_v53, %v7013_v53  ;;  %v7036_v46 = vcombine.high %v7020_v3, %v7020_v3  ;;  %v14248_v39 = vadd.f32 %v7013_v53, %v15904_v40 }
 0xe50   : > { %v7037_v31 = vcombine.high %v7027_v61, %v7027_v61  ;;  %v14251_v51 = vadd.f32 %v7027_v61, %v15905_v44  ;;  %v14254_v28 = vadd.f32 %v7020_v3, %v15906_v55  ;;  %v7039_v8 = vcombine.high %v6879_v47, %v6879_v47 }
 0xe51   : > { %v7038_v35 = vcombine.high %v7034_v56, %v7034_v56  ;;  %v14257_v32 = vadd.f32 %v7035_v54, %v15907_v37  ;;  %v14260_v15 = vadd.f32 %v7034_v56, %v15908_v4  ;;  %v14263_v63 = vadd.f32 %v7036_v46, %v15892_v5  ;;  %v15910_v56 = vld [vmem:[#allocation39_spill] sm:$0xff] }
 0xe52   : > { %v14266_v16 = vadd.f32 %v7037_v31, %v15909_v33  ;;  %v7299_v53 = vcombine.low %v14248_v39, %v14251_v51  ;;  %v7046_v3 = vrot.slane %v6879_v47, %v12510_v12  ;;  %v7053_v6 = vrot.slane %v7039_v8, %v12510_v12 }
 0xe53   : > { %v7094_v61 = vrot.slane %v6884_v43, %v12510_v12  ;;  %v7234_v13 = vcombine.low %v7225_v24, %v7232_v11  ;;  %v7241_v54 = vrot.slane %v7233_v14, %v12510_v12  ;;  %v14275_v40 = vadd.f32 %v6989_v62, %v15910_v56 }
 0xe54   : > { %v7054_v46 = vcombine.high %v7046_v3, %v7046_v3  ;;  %v7055_v44 = vcombine.high %v7053_v6, %v7053_v6  ;;  %v7062_v31 = vrot.slane %v7046_v3, %v12510_v12  ;;  %v7069_v55 = vrot.slane %v7053_v6, %v12510_v12 }
 0xe55   : > { %v7101_v37 = vrot.slane %v7094_v61, %v12510_v12  ;;  %v7248_v47 = vrot.slane %v7234_v13, %v12510_v12  ;;  %v7251_v8 = vcombine.low %v14224_v52, %v14231_v30  ;;  %v7252_v24 = vcombine.low %v14227_v22, %v14234_v42 }
 0xe56   : > { %v7076_v11 = vrot.slane %v7054_v46, %v12510_v12  ;;  %v7083_v62 = vrot.slane %v7055_v44, %v12510_v12  ;;  %v7084_v43 = vcombine.high %v7062_v31, %v7062_v31  ;;  %v7085_v14 = vcombine.high %v7069_v55, %v7069_v55 }
 0xe57   : > { %v14290_v4 = vadd.f32 %v7062_v31, %v1204_v48  ;;  %v14295_v33 = vadd.f32 %v7069_v55, %v1205_v0  ;;  %v7249_v3 = vcombine.low %v7241_v54, %v7248_v47  ;;  %v7253_v6 = vcombine.low %v14237_v9, %v14275_v40  ;;  %v15911_v0 = vld [vmem:[#allocation49_spill] sm:$0xff]  ;;  %v15912_v47 = vld [vmem:[#allocation56_spill] sm:$0xff] }
 0xe58   : > { %v7086_v61 = vcombine.high %v7076_v11, %v7076_v11  ;;  %v7087_v13 = vcombine.high %v7083_v62, %v7083_v62  ;;  %v14302_v56 = vadd.f32 %v7076_v11, %v1206_v45  ;;  %v14305_v5 = vadd.f32 %v7084_v43, %v15893_v27 }
 0xe59   : > { %v14310_v48 = vadd.f32 %v7083_v62, %v1207_v2  ;;  %v14313_v54 = vadd.f32 %v7085_v14, %v15911_v0  ;;  %7416 = vadd.xlane.f32.xlu1 %v7249_v3  ;;  %v7260_v46 = vrot.slane %v7250_v10, %v12510_v12  ;;  %v7267_v44 = vrot.slane %v7251_v8, %v12510_v12  ;;  %v15913_v14 = vld [vmem:[#allocation51_spill] sm:$0xff] }
 0xe5a   : > { %v14318_v31 = vadd.f32 %v7086_v61, %v15896_v7  ;;  %v7348_v27 = vcombine.low %v14290_v4, %v14302_v56  ;;  %v7274_v45 = vrot.slane %v7252_v24, %v12510_v12  ;;  %v7281_v55 = vrot.slane %v7253_v6, %v12510_v12 }
 0xe5b   : > { %v7282_v2 = vcombine.low %v7260_v46, %v7267_v44  ;;  %v14325_v11 = vadd.f32 %v7101_v37, %v15912_v47  ;;  %v14328_v62 = vadd.f32 %v7038_v35, %v15895_v58  ;;  %v7300_v10 = vcombine.low %v14257_v32, %v14266_v16 }
 0xe5c   : > { %v7283_v8 = vcombine.low %v7274_v45, %v7281_v55  ;;  %v7301_v7 = vcombine.low %v14254_v28, %v14260_v15  ;;  %v7309_v43 = vrot.slane %v7299_v53, %v12510_v12  ;;  %v14336_v24 = vadd.f32 %v7087_v13, %v15913_v14 }
 0xe5d   : > { %v7290_v3 = vrot.slane %v7282_v2, %v12510_v12  ;;  %v7403_v37 = vrot.slane %v14325_v11, %v12510_v12  ;;  %v7302_v58 = vcombine.low %v14263_v63, %v14328_v62  ;;  %v7316_v35 = vrot.slane %v7300_v10, %v12510_v12 }
 0xe5e   : > { %v7297_v6 = vrot.slane %v7283_v8, %v12510_v12  ;;  %v7323_v61 = vrot.slane %v7301_v7, %v12510_v12  ;;  %v7349_v53 = vcombine.low %v14305_v5, %v14318_v31  ;;  %v7350_v13 = vcombine.low %v14295_v33, %v14310_v48 }
 0xe5f   : > { %v7410_v0 = vrot.slane %v7403_v37, %v12510_v12  ;;  %v7330_v46 = vrot.slane %v7302_v58, %v12510_v12  ;;  %v7331_v44 = vcombine.low %v7309_v43, %v7316_v35  ;;  %v7351_v45 = vcombine.low %v14313_v54, %v14336_v24 }
 0xe60   : > { %v7298_v55 = vcombine.low %v7290_v3, %v7297_v6  ;;  %v7358_v2 = vrot.slane %v7348_v27, %v12510_v12  ;;  %v7365_v47 = vrot.slane %v7349_v53, %v12510_v12  ;;  %v7372_v7 = vrot.slane %v7350_v13, %v12510_v12 }
 0xe61   : > { %v7425_v10 = vsel %vm7424_vm13, %v7410_v0, 0.0  ;;  %v7332_v8 = vcombine.low %v7323_v61, %v7330_v46  ;;  %v7379_v14 = vrot.slane %v7351_v45, %v12510_v12  ;;  %v7339_v43 = vrot.slane %v7331_v44, %v12510_v12 }
 0xe62   : > { %7418 = vadd.xlane.f32.xlu0 %v7298_v55  ;;  %7426 = vadd.xlane.f32.xlu1 %v7425_v10  ;;  %v7380_v37 = vcombine.low %v7358_v2, %v7365_v47 }
 0xe63   : > { %v7346_v58 = vrot.slane %v7332_v8, %v12510_v12  ;;  %v7381_v35 = vcombine.low %v7372_v7, %v7379_v14 }
 0xe64   : > { %v7388_v27 = vrot.slane %v7380_v37, %v12510_v12 }
 0xe65   : > { %v7347_v3 = vcombine.low %v7339_v43, %v7346_v58  ;;  %v7395_v6 = vrot.slane %v7381_v35, %v12510_v12 }
 0xe67   : > { %7420 = vadd.xlane.f32.xlu0 %v7347_v3  ;;  %v7396_v53 = vcombine.low %v7388_v27, %v7395_v6 }
 0xe6b   : > { %7422 = vadd.xlane.f32.xlu0 %v7396_v53 }
 0xee6   : > { %v7417_v61 = vpop.xlane.xlu1 %7416 }
 0xee7   : > { %v7428_v13 = vmul.f32 0.0078125, %v7417_v61 }
 0xee9   : > { %v7441_v0 = vrot.slane %v7428_v13, %v13008_v60  ;;  %v7445_v46 = vrot.slane %v7428_v13, %v13005_v59  ;;  %v7449_v45 = vrot.slane %v7428_v13, %v13013_v38  ;;  %v7453_v44 = vrot.slane %v7428_v13, %v13047_v17 }
 0xeea   : > { %v7457_v55 = vrot.slane %v7428_v13, %v13050_v20  ;;  %v7461_v2 = vrot.slane %v7428_v13, %v13053_v41  ;;  %v7465_v47 = vrot.slane %v7428_v13, %v13056_v50  ;;  %v7469_v10 = vrot.slane %v7428_v13, %v13059_v26 }
 0xeeb   : > { %v14372_v8 = vsub.f32 %v14176_v57, %v7441_v0  ;;  %v14375_v7 = vsub.f32 %v14173_v25, %v7445_v46  ;;  %v14378_v14 = vsub.f32 %v14178_v23, %v7449_v45  ;;  %v14381_v37 = vsub.f32 %v14183_v36, %v7453_v44 }
 0xeec   : > { %v14384_v43 = vsub.f32 %v14186_v34, %v7457_v55  ;;  %v14387_v58 = vsub.f32 %v14189_v21, %v7461_v2  ;;  %v14390_v35 = vsub.f32 %v14196_v1, %v7465_v47  ;;  %v14393_v57 = vsub.f32 %v14198_v18, %v7469_v10 }
 0xeed   : > { %v7636_v25 = vmul.f32 %v14372_v8, %v14372_v8  ;;  %v7637_v23 = vmul.f32 %v14375_v7, %v14375_v7  ;;  %v7638_v36 = vmul.f32 %v14378_v14, %v14378_v14  ;;  %v7639_v34 = vmul.f32 %v14381_v37, %v14381_v37 }
 0xeee   : > { %15914 = vst [vmem:[#allocation71_spill] sm:$0xff] %v14393_v57  ;;  %v7640_v21 = vmul.f32 %v14384_v43, %v14384_v43  ;;  %v7641_v1 = vmul.f32 %v14387_v58, %v14387_v58  ;;  %v7642_v18 = vmul.f32 %v14390_v35, %v14390_v35  ;;  %v7643_v3 = vmul.f32 %v14393_v57, %v14393_v57 }
 0xeef   : > { %v7419_v27 = vpop.xlane.xlu0 %7418  ;;  %v7427_v6 = vpop.xlane.xlu1 %7426  ;;  %v7702_v53 = vcombine.low %v7636_v25, %v7637_v23  ;;  %v7703_v61 = vcombine.low %v7638_v36, %v7639_v34 }
 0xef0   : > { %v7429_v13 = vmul.f32 0.0078125, %v7419_v27  ;;  %v7432_v0 = vmul.f32 0.0078125, %v7427_v6  ;;  %v7704_v46 = vcombine.low %v7640_v21, %v7641_v1  ;;  %v7705_v45 = vcombine.low %v7642_v18, %v7643_v3 }
 0xef1   : > { %v7712_v44 = vrot.slane %v7702_v53, %v12510_v12  ;;  %v7719_v55 = vrot.slane %v7703_v61, %v12510_v12 }
 0xef2   : > { %v7569_v2 = vrot.slane %v7432_v0, %v13008_v60  ;;  %v7726_v47 = vrot.slane %v7704_v46, %v12510_v12  ;;  %v7733_v10 = vrot.slane %v7705_v45, %v12510_v12  ;;  %v7473_v29 = vrot.slane %v7429_v13, %v13008_v60 }
 0xef3   : > { %v7734_v57 = vcombine.low %v7712_v44, %v7719_v55  ;;  %v7477_v25 = vrot.slane %v7429_v13, %v13005_v59  ;;  %v7481_v23 = vrot.slane %v7429_v13, %v13013_v38  ;;  %v7485_v36 = vrot.slane %v7429_v13, %v13047_v17 }
 0xef4   : > { %v14421_v34 = vsub.f32 %v14325_v11, %v7569_v2  ;;  %v7421_v21 = vpop.xlane.xlu0 %7420  ;;  %v7735_v1 = vcombine.low %v7726_v47, %v7733_v10  ;;  %v7489_v18 = vrot.slane %v7429_v13, %v13050_v20  ;;  %v7493_v3 = vrot.slane %v7429_v13, %v13053_v41 }
 0xef5   : > { %v7430_v27 = vmul.f32 0.0078125, %v7421_v21  ;;  %v7742_v6 = vrot.slane %v7734_v57, %v12510_v12  ;;  %v7497_v53 = vrot.slane %v7429_v13, %v13056_v50  ;;  %v7501_v61 = vrot.slane %v7429_v13, %v13059_v26 }
 0xef6   : > { %15915 = vst [vmem:[#allocation72_spill] sm:$0xff] %v14421_v34  ;;  %v7749_v0 = vrot.slane %v7735_v1, %v12510_v12  ;;  %v14430_v46 = vsub.f32 %v14215_v49, %v7473_v29  ;;  %v14433_v11 = vsub.f32 %v14221_v19, %v7477_v25  ;;  %v14436_v45 = vsub.f32 %v14224_v52, %v7481_v23 }
 0xef7   : > { %v14439_v44 = vsub.f32 %v14231_v30, %v7485_v36  ;;  %v14442_v57 = vsub.f32 %v14227_v22, %v7489_v18  ;;  %v14445_v55 = vsub.f32 %v14234_v42, %v7493_v3  ;;  %v14448_v13 = vsub.f32 %v14237_v9, %v7497_v53 }
 0xef8   : > { %v7750_v29 = vcombine.low %v7742_v6, %v7749_v0  ;;  %v7423_v49 = vpop.xlane.xlu0 %7422  ;;  %v14451_v19 = vsub.f32 %v14275_v40, %v7501_v61  ;;  %v7644_v52 = vmul.f32 %v14430_v46, %v14430_v46  ;;  %v7645_v30 = vmul.f32 %v14433_v11, %v14433_v11 }
 0xef9   : > { %v14457_v2 = vmul.f32 0.0078125, %v7423_v49  ;;  %v7646_v22 = vmul.f32 %v14436_v45, %v14436_v45  ;;  %v7647_v42 = vmul.f32 %v14439_v44, %v14439_v44  ;;  %v7648_v9 = vmul.f32 %v14442_v57, %v14442_v57 }
 0xefa   : > { %7917 = vadd.xlane.f32.xlu0 %v7750_v29  ;;  %v7649_v40 = vmul.f32 %v14445_v55, %v14445_v55  ;;  %v7650_v47 = vmul.f32 %v14448_v13, %v14448_v13  ;;  %v7651_v10 = vmul.f32 %v14451_v19, %v14451_v19  ;;  %v7751_v25 = vcombine.low %v7644_v52, %v7645_v30 }
 0xefb   : > { %v7752_v23 = vcombine.low %v7646_v22, %v7647_v42  ;;  %v7505_v36 = vrot.slane %v7430_v27, %v13008_v60  ;;  %v7509_v21 = vrot.slane %v7430_v27, %v13005_v59  ;;  %v7513_v1 = vrot.slane %v7430_v27, %v13013_v38 }
 0xefc   : > { %v7753_v18 = vcombine.low %v7648_v9, %v7649_v40  ;;  %v7754_v3 = vcombine.low %v7650_v47, %v7651_v10  ;;  %v7761_v6 = vrot.slane %v7751_v25, %v12510_v12  ;;  %v7517_v53 = vrot.slane %v7430_v27, %v13047_v17 }
 0xefd   : > { %v7768_v61 = vrot.slane %v7752_v23, %v12510_v12  ;;  %v7521_v0 = vrot.slane %v7430_v27, %v13050_v20  ;;  %v7525_v29 = vrot.slane %v7430_v27, %v13053_v41  ;;  %v7529_v49 = vrot.slane %v7430_v27, %v13056_v50 }
 0xefe   : > { %v7775_v52 = vrot.slane %v7753_v18, %v12510_v12  ;;  %v7782_v30 = vrot.slane %v7754_v3, %v12510_v12  ;;  %v7533_v22 = vrot.slane %v7430_v27, %v13059_v26  ;;  %v14484_v42 = vsub.f32 %v14248_v39, %v7505_v36 }
 0xeff   : > { %v7783_v9 = vcombine.low %v7761_v6, %v7768_v61  ;;  %v14487_v40 = vsub.f32 %v14251_v51, %v7509_v21  ;;  %v14490_v47 = vsub.f32 %v14257_v32, %v7513_v1  ;;  %v14493_v10 = vsub.f32 %v14266_v16, %v7517_v53 }
 0xf00   : > { %v7784_v25 = vcombine.low %v7775_v52, %v7782_v30  ;;  %v14496_v23 = vsub.f32 %v14254_v28, %v7521_v0  ;;  %v14499_v18 = vsub.f32 %v14260_v15, %v7525_v29  ;;  %v14502_v39 = vsub.f32 %v14263_v63, %v7529_v49 }
 0xf01   : > { %v7791_v27 = vrot.slane %v7783_v9, %v12510_v12  ;;  %v14506_v51 = vsub.f32 %v14328_v62, %v7533_v22  ;;  %v7652_v32 = vmul.f32 %v14484_v42, %v14484_v42  ;;  %v7653_v16 = vmul.f32 %v14487_v40, %v14487_v40 }
 0xf02   : > { %15916 = vst [vmem:[#allocation59_spill] sm:$0xff] %v14499_v18  ;;  %15917 = vst [vmem:[#allocation64_spill] sm:$0xff] %v14502_v39  ;;  %v7798_v28 = vrot.slane %v7784_v25, %v12510_v12  ;;  %v7654_v15 = vmul.f32 %v14490_v47, %v14490_v47  ;;  %v7655_v63 = vmul.f32 %v14493_v10, %v14493_v10 }
 0xf03   : > { %15918 = vst [vmem:[#allocation60_spill] sm:$0xff] %v14506_v51  ;;  %v7656_v36 = vmul.f32 %v14496_v23, %v14496_v23  ;;  %v7657_v62 = vmul.f32 %v14499_v18, %v14499_v18  ;;  %v7658_v21 = vmul.f32 %v14502_v39, %v14502_v39  ;;  %v7659_v1 = vmul.f32 %v14506_v51, %v14506_v51  ;;  %v15930_v51 = vld [vmem:[#allocation71_spill] sm:$0xff] }
 0xf04   : > { %v7800_v3 = vcombine.low %v7652_v32, %v7653_v16  ;;  %v7799_v6 = vcombine.low %v7791_v27, %v7798_v28  ;;  %v7801_v53 = vcombine.low %v7654_v15, %v7655_v63  ;;  %v7537_v61 = vrot.slane %v14457_v2, %v13008_v60 }
 0xf05   : > { %v7541_v0 = vrot.slane %v14457_v2, %v13005_v59  ;;  %v7802_v29 = vcombine.low %v7656_v36, %v7657_v62  ;;  %v7803_v49 = vcombine.low %v7658_v21, %v7659_v1  ;;  %v7545_v30 = vrot.slane %v14457_v2, %v13013_v38 }
 0xf06   : > { %v7810_v52 = vrot.slane %v7800_v3, %v12510_v12  ;;  %7919 = vadd.xlane.f32.xlu1 %v7799_v6  ;;  %v7817_v22 = vrot.slane %v7801_v53, %v12510_v12  ;;  %v7549_v9 = vrot.slane %v14457_v2, %v13047_v17  ;;  %v7553_v25 = vrot.slane %v14457_v2, %v13050_v20 }
 0xf07   : > { %v7557_v27 = vrot.slane %v14457_v2, %v13053_v41  ;;  %v7824_v32 = vrot.slane %v7802_v29, %v12510_v12  ;;  %v7831_v16 = vrot.slane %v7803_v49, %v12510_v12  ;;  %v7561_v28 = vrot.slane %v14457_v2, %v13056_v50  ;;  %v8339_v49 = vld [vmem:[%s15922_s28 + $0x8] sm:$0xff] }
 0xf08   : > { %v7565_v15 = vrot.slane %v14457_v2, %v13059_v26  ;;  %v7832_v63 = vcombine.low %v7810_v52, %v7817_v22  ;;  %v14546_v36 = vsub.f32 %v14290_v4, %v7537_v61  ;;  %v14549_v62 = vsub.f32 %v14302_v56, %v7541_v0  ;;  %v8341_v52 = vld [vmem:[%s15922_s28 + $0x18] sm:$0xff] }
 0xf09   : > { %v14552_v21 = vsub.f32 %v14305_v5, %v7545_v30  ;;  %v7833_v1 = vcombine.low %v7824_v32, %v7831_v16  ;;  %v14555_v3 = vsub.f32 %v14318_v31, %v7549_v9  ;;  %v14558_v6 = vsub.f32 %v14295_v33, %v7553_v25  ;;  %v8338_v30 = vld [vmem:[%s15922_s28] sm:$0xff]  ;;  %v8340_v32 = vld [vmem:[%s15922_s28 + $0x10] sm:$0xff]  ;;  %v8343_v16 = vld [vmem:[%s15922_s28 + $0x28] sm:$0xff] }
 0xf0a   : > { %15919 = vst [vmem:[#allocation65_spill] sm:$0xff] %v14546_v36  ;;  %15920 = vst [vmem:[#allocation66_spill] sm:$0xff] %v14549_v62  ;;  %v14561_v2 = vsub.f32 %v14310_v48, %v7557_v27  ;;  %v7840_v4 = vrot.slane %v7832_v63, %v12510_v12  ;;  %v14565_v56 = vsub.f32 %v14313_v54, %v7561_v28  ;;  %v8345_v28 = vld [vmem:[%s15922_s28 + $0x38] sm:$0xff] }
 0xf0b   : > { %15921 = vst [vmem:[#allocation53_spill] sm:$0xff] %v14552_v21  ;;  %15923 = vst [vmem:[#allocation54_spill] sm:$0xff] %v14555_v3  ;;  %v14568_v5 = vsub.f32 %v14336_v24, %v7565_v15  ;;  %v7660_v31 = vmul.f32 %v14546_v36, %v14546_v36  ;;  %v7847_v53 = vrot.slane %v7833_v1, %v12510_v12 }
 0xf0c   : > { %15924 = vst [vmem:[#allocation55_spill] sm:$0xff] %v14558_v6  ;;  %15925 = vst [vmem:[#allocation57_spill] sm:$0xff] %v14561_v2  ;;  %v7661_v33 = vmul.f32 %v14549_v62, %v14549_v62  ;;  %v7662_v48 = vmul.f32 %v14552_v21, %v14552_v21  ;;  %v7663_v54 = vmul.f32 %v14555_v3, %v14555_v3 }
 0xf0d   : > { %15926 = vst [vmem:[#allocation58_spill] sm:$0xff] %v14565_v56  ;;  %15927 = vst [vmem:[#allocation62_spill] sm:$0xff] %v14568_v5  ;;  %v7664_v24 = vmul.f32 %v14558_v6, %v14558_v6  ;;  %v7665_v61 = vmul.f32 %v14561_v2, %v14561_v2  ;;  %v7666_v0 = vmul.f32 %v14565_v56, %v14565_v56  ;;  %v8344_v2 = vld [vmem:[%s15922_s28 + $0x30] sm:$0xff] }
 0xf0e   : > { %v7667_v29 = vmul.f32 %v14568_v5, %v14568_v5  ;;  %v7848_v22 = vcombine.low %v7840_v4, %v7847_v53  ;;  %v7849_v9 = vcombine.low %v7660_v31, %v7661_v33  ;;  %v7850_v25 = vcombine.low %v7662_v48, %v7663_v54  ;;  %v8342_v5 = vld [vmem:[%s15922_s28 + $0x20] sm:$0xff]  ;;  %v8347_v33 = vld [vmem:[%s15922_s28 + $0x48] sm:$0xff]  ;;  %v8349_v48 = vld [vmem:[%s15922_s28 + $0x58] sm:$0xff] }
 0xf0f   : > { %v7668_v27 = vmul.f32 %v14421_v34, %v14421_v34  ;;  %v7851_v15 = vcombine.low %v7664_v24, %v7665_v61  ;;  %v11538_v1 = vpack.c.bf16 %v8341_v52, %v8339_v49  ;;  %v11540_v56 = vpack.c.bf16 %v8340_v32, %v8338_v30 }
 0xf10   : > { %v7852_v63 = vcombine.low %v7666_v0, %v7667_v29  ;;  %7921 = vadd.xlane.f32.xlu0 %v7848_v22  ;;  %v7859_v6 = vrot.slane %v7849_v9, %v12510_v12  ;;  %v7866_v4 = vrot.slane %v7850_v25, %v12510_v12  ;;  %v11542_v53 = vpack.c.bf16 %v8345_v28, %v8343_v16  ;;  %v8353_v9 = vld [vmem:[%s15922_s28 + $0x78] sm:$0xff]  ;;  %v8350_v25 = vld [vmem:[%s15922_s28 + $0x60] sm:$0xff]  ;;  %v8355_v28 = vld [vmem:[%s15922_s28 + $0x88] sm:$0xff] }
 0xf11   : > { %v7904_v31 = vrot.slane %v7668_v27, %v12510_v12  ;;  %v7873_v54 = vrot.slane %v7851_v15, %v12510_v12  ;;  %11539 = vmatprep.subr.bf16.mxu0 %v11538_v1  ;;  %v11544_v0 = vpack.c.bf16 %v8344_v2, %v8342_v5  ;;  %v11546_v49 = vpack.c.bf16 %v8349_v48, %v8347_v33  ;;  %v8346_v2 = vld [vmem:[%s15922_s28 + $0x40] sm:$0xff]  ;;  %v8352_v27 = vld [vmem:[%s15922_s28 + $0x70] sm:$0xff]  ;;  %v8357_v15 = vld [vmem:[%s15922_s28 + $0x98] sm:$0xff] }
 0xf12   : > { %v7880_v34 = vrot.slane %v7852_v63, %v12510_v12  ;;  %v7881_v24 = vcombine.low %v7859_v6, %v7866_v4  ;;  %11541 = vmatpush1.bf16.msra.mxu0 %v11540_v56  ;;  %v8351_v56 = vld [vmem:[%s15922_s28 + $0x68] sm:$0xff]  ;;  %v11552_v16 = vpack.c.bf16 %v8352_v27, %v8350_v25  ;;  %v8354_v63 = vld [vmem:[%s15922_s28 + $0x80] sm:$0xff]  ;;  %v11554_v1 = vpack.c.bf16 %v8357_v15, %v8355_v28  ;;  %v8356_v4 = vld [vmem:[%s15922_s28 + $0x90] sm:$0xff] }
 0xf13   : > { %v7911_v61 = vrot.slane %v7904_v31, %v12510_v12  ;;  %11543 = vmatprep.subr.bf16.mxu0 %v11542_v53  ;;  %v11550_v32 = vpack.c.bf16 %v8353_v9, %v8351_v56  ;;  %v11556_v31 = vpack.c.bf16 %v8356_v4, %v8354_v63  ;;  %v8359_v53 = vld [vmem:[%s15922_s28 + $0xa8] sm:$0xff]  ;;  %v8361_v33 = vld [vmem:[%s15922_s28 + $0xb8] sm:$0xff]  ;;  %v8368_v56 = vld [vmem:[%s15922_s28 + $0xf0] sm:$0xff] }
 0xf14   : > { %v7882_v29 = vcombine.low %v7873_v54, %v7880_v34  ;;  %v7889_v52 = vrot.slane %v7881_v24, %v12510_v12  ;;  %v8348_v34 = vld [vmem:[%s15922_s28 + $0x50] sm:$0xff]  ;;  %v11558_v48 = vpack.c.bf16 %v8361_v33, %v8359_v53  ;;  %v8358_v54 = vld [vmem:[%s15922_s28 + $0xa0] sm:$0xff] }
 0xf15   : > { %v7925_v30 = vsel %vm7424_vm13, %v7911_v61, 0.0  ;;  %v11548_v5 = vpack.c.bf16 %v8348_v34, %v8346_v2  ;;  %v8360_v24 = vld [vmem:[%s15922_s28 + $0xb0] sm:$0xff]  ;;  %v8369_v2 = vld [vmem:[%s15922_s28 + $0xf8] sm:$0xff]  ;;  %v8366_v34 = vld [vmem:[%s15922_s28 + $0xe0] sm:$0xff] }
 0xf16   : > { %v7896_v22 = vrot.slane %v7882_v29, %v12510_v12  ;;  %7926 = vadd.xlane.f32.xlu0 %v7925_v30  ;;  %11545 = vmatpush1.bf16.msra.mxu0 %v11544_v0  ;;  %v11560_v61 = vpack.c.bf16 %v8360_v24, %v8358_v54  ;;  %v8363_v0 = vld [vmem:[%s15922_s28 + $0xc8] sm:$0xff]  ;;  %v8365_v29 = vld [vmem:[%s15922_s28 + $0xd8] sm:$0xff]  ;;  %v8364_v30 = vld [vmem:[%s15922_s28 + $0xd0] sm:$0xff]  ;;  %v11568_v9 = vpack.c.bf16 %v8368_v56, %v8366_v34 }
 0xf17   : > { %11547 = vmatprep.subr.bf16.mxu0 %v11546_v49  ;;  %v11562_v49 = vpack.c.bf16 %v8365_v29, %v8363_v0  ;;  %v10894_v25 = vld [vmem:[%s15928_s26] ss:$0 sm:$0xff] }
 0xf18   : > { %v7897_v6 = vcombine.low %v7889_v52, %v7896_v22  ;;  %v8362_v52 = vld [vmem:[%s15922_s28 + $0xc0] sm:$0xff]  ;;  %v8367_v22 = vld [vmem:[%s15922_s28 + $0xe8] sm:$0xff]  ;;  %v8159_v63 = vrot.slane %v10894_v25, %v12510_v12 }
 0xf19   : > { %v10895_v27 = vld [vmem:[%s15929_s0] ss:$0 sm:$0xff] }
 0xf1a   : > { %7923 = vadd.xlane.f32.xlu1 %v7897_v6  ;;  %11549 = vmatpush1.bf16.msra.mxu0 %v11548_v5  ;;  %v11564_v6 = vpack.c.bf16 %v8364_v30, %v8362_v52  ;;  %v11566_v5 = vpack.c.bf16 %v8369_v2, %v8367_v22  ;;  %v8167_v33 = vcombine.high %v8159_v63, %v8159_v63 }
 0xf1b   : > { %11551 = vmatprep.subr.bf16.mxu0 %v11550_v32  ;;  %v8152_v32 = vcombine.high %v10894_v25, %v10894_v25 }
 0xf1c   : > { %v14643_v29 = vrot.slane %v8167_v33, %v12510_v12 }
 0xf1e   : > { %11553 = vmatpush1.bf16.msra.mxu0 %v11552_v16  ;;  %v8248_v16 = vcombine.high %v10895_v27, %v10895_v27 }
 0xf1f   : > { %11555 = vmatprep.subr.bf16.mxu0 %v11554_v1  ;;  %v8166_v1 = vrot.slane %v8152_v32, %v12510_v12 }
 0xf20   : > { %v8262_v53 = vrot.slane %v8248_v16, %v12510_v12 }
 0xf21   : > { %v14640_v0 = vrot.slane %v8166_v1, %v12510_v12 }
 0xf22   : > { %11557 = vmatpush1.bf16.msra.mxu0 %v11556_v31  ;;  %v8255_v31 = vrot.slane %v10895_v27, %v12510_v12  ;;  %v8264_v24 = vcombine.high %v8262_v53, %v8262_v53  ;;  %v14652_v30 = vrot.slane %v8262_v53, %v12510_v12 }
 0xf23   : > { %11559 = vmatprep.subr.bf16.mxu0 %v11558_v48  ;;  %v8168_v48 = vcombine.high %v8166_v1, %v8166_v1 }
 0xf24   : > { %v8263_v54 = vcombine.high %v8255_v31, %v8255_v31  ;;  %v14649_v52 = vrot.slane %v8255_v31, %v12510_v12 }
 0xf26   : > { %11561 = vmatpush1.bf16.msra.mxu0 %v11560_v61  ;;  %v14637_v61 = vrot.slane %v8159_v63, %v12510_v12  ;;  %v14655_v22 = vrot.slane %v8263_v54, %v12510_v12  ;;  %v14678_v27 = vcombine.high %v14649_v52, %v14649_v52 }
 0xf27   : > { %11563 = vmatprep.subr.bf16.mxu0 %v11562_v49  ;;  %v14646_v49 = vrot.slane %v8168_v48, %v12510_v12 }
 0xf28   : > { %v14662_v56 = vcombine.high %v14637_v61, %v14637_v61 }
 0xf29   : > { %v14674_v25 = vcombine.high %v14646_v49, %v14646_v49 }
 0xf2a   : > { %11565 = vmatpush1.bf16.msra.mxu0 %v11564_v6  ;;  %v14658_v6 = vrot.slane %v8264_v24, %v12510_v12 }
 0xf2b   : > { %11567 = vmatprep.subr.bf16.mxu0 %v11566_v5  ;;  %v14666_v5 = vcombine.high %v14640_v0, %v14640_v0 }
 0xf2c   : > { %v14690_v63 = vcombine.high %v14658_v6, %v14658_v6 }
 0xf2e   : > { %11569 = vmatpush1.bf16.msra.mxu0 %v11568_v9  ;;  %v14670_v9 = vcombine.high %v14643_v29, %v14643_v29 }
 0xf87   : > { %v7918_v28 = vpop.xlane.xlu0 %7917 }
 0xf88   : > { %v7928_v15 = vmul.f32 0.0078125, %v7918_v28  ;;  %v14682_v28 = vcombine.high %v14652_v30, %v14652_v30 }
 0xf8a   : > { %v7933_v4 = vadd.f32 1e-05, %v7928_v15  ;;  %v14686_v15 = vcombine.high %v14655_v22, %v14655_v22 }
 0xf8c   : > { %11884 = vrsqrt.f32 %v7933_v4 }
 0xf93   : > { %v7920_v2 = vpop.xlane.xlu1 %7919 }
 0xf94   : > { %v7929_v34 = vmul.f32 0.0078125, %v7920_v2 }
 0xf96   : > { %v11885_v32 = vpop.eup %11884  ;;  %v7934_v16 = vadd.f32 1e-05, %v7929_v34 }
 0xf97   : > { %v7951_v1 = vrot.slane %v11885_v32, %v13008_v60  ;;  %v7955_v4 = vrot.slane %v11885_v32, %v13005_v59  ;;  %v7959_v31 = vrot.slane %v11885_v32, %v13013_v38  ;;  %v7963_v53 = vrot.slane %v11885_v32, %v13047_v17 }
 0xf98   : > { %11886 = vrsqrt.f32 %v7934_v16  ;;  %v7967_v33 = vrot.slane %v11885_v32, %v13050_v20  ;;  %v7971_v48 = vrot.slane %v11885_v32, %v13053_v41  ;;  %v7975_v54 = vrot.slane %v11885_v32, %v13056_v50 }
 0xf99   : > { %v7979_v24 = vrot.slane %v11885_v32, %v13059_v26  ;;  %v8113_v2 = vmul.f32 %v7951_v1, %v14372_v8  ;;  %v8114_v34 = vmul.f32 %v7955_v4, %v14375_v7  ;;  %v8115_v3 = vmul.f32 %v7959_v31, %v14378_v14 }
 0xf9a   : > { %v8116_v21 = vmul.f32 %v7963_v53, %v14381_v37  ;;  %v8117_v62 = vmul.f32 %v7967_v33, %v14384_v43  ;;  %v8118_v16 = vmul.f32 %v7971_v48, %v14387_v58  ;;  %v8119_v36 = vmul.f32 %v7975_v54, %v14390_v35 }
 0xf9b   : > { %v8120_v39 = vmul.f32 %v7979_v24, %v15930_v51  ;;  %v8209_v18 = vmul.f32 %v14637_v61, %v8113_v2  ;;  %v8210_v32 = vmul.f32 %v14643_v29, %v8114_v34  ;;  %v8211_v8 = vmul.f32 %v14662_v56, %v8115_v3 }
 0xf9c   : > { %v8212_v7 = vmul.f32 %v14670_v9, %v8116_v21  ;;  %v8213_v14 = vmul.f32 %v14640_v0, %v8117_v62  ;;  %v8214_v37 = vmul.f32 %v14646_v49, %v8118_v16  ;;  %v8215_v43 = vmul.f32 %v14666_v5, %v8119_v36 }
 0xf9d   : > { %v7922_v1 = vpop.xlane.xlu0 %7921  ;;  %v8216_v35 = vmul.f32 %v14674_v25, %v8120_v39  ;;  %v14717_v51 = vadd.f32 %v14649_v52, %v8209_v18  ;;  %v14720_v4 = vadd.f32 %v14655_v22, %v8210_v32  ;;  %v14723_v3 = vadd.f32 %v14678_v27, %v8211_v8 }
 0xf9e   : > { %v7930_v58 = vmul.f32 0.0078125, %v7922_v1  ;;  %v14726_v21 = vadd.f32 %v14686_v15, %v8212_v7  ;;  %v14729_v62 = vadd.f32 %v14652_v30, %v8213_v14  ;;  %v14732_v36 = vadd.f32 %v14658_v6, %v8214_v37 }
 0xf9f   : > { %v14735_v39 = vadd.f32 %v14682_v28, %v8215_v43  ;;  %v14738_v18 = vadd.f32 %v14690_v63, %v8216_v35  ;;  %v8415_v53 = vcombine.low %v14717_v51, %v14720_v4 }
 0xfa0   : > { %15931 = vst [vmem:[#allocation61_spill] sm:$0xff] %v14726_v21  ;;  %15932 = vst [vmem:[#allocation29_spill] sm:$0xff] %v14729_v62  ;;  %v7935_v31 = vadd.f32 1e-05, %v7930_v58  ;;  %v8416_v33 = vcombine.low %v14723_v3, %v14726_v21  ;;  %v8417_v48 = vcombine.low %v14729_v62, %v14732_v36 }
 0xfa1   : > { %15933 = vst [vmem:[#allocation33_spill] sm:$0xff] %v14732_v36  ;;  %15934 = vst [vmem:[#allocation32_spill] sm:$0xff] %v14735_v39  ;;  %v8418_v24 = vcombine.low %v14735_v39, %v14738_v18  ;;  %v8425_v2 = vrot.slane %v8415_v53, %v12510_v12 }
 0xfa2   : > { %15935 = vst [vmem:[#allocation47_spill] sm:$0xff] %v14738_v18  ;;  %11888 = vrsqrt.f32 %v7935_v31  ;;  %v11887_v34 = vpop.eup %11886  ;;  %v8432_v32 = vrot.slane %v8416_v33, %v12510_v12  ;;  %v8439_v8 = vrot.slane %v8417_v48, %v12510_v12 }
 0xfa3   : > { %v7927_v54 = vpop.xlane.xlu0 %7926  ;;  %v8446_v1 = vrot.slane %v8418_v24, %v12510_v12  ;;  %v7983_v7 = vrot.slane %v11887_v34, %v13008_v60  ;;  %v7987_v14 = vrot.slane %v11887_v34, %v13005_v59  ;;  %v7991_v37 = vrot.slane %v11887_v34, %v13013_v38 }
 0xfa4   : > { %v7932_v16 = vmul.f32 0.0078125, %v7927_v54  ;;  %v8447_v58 = vcombine.low %v8425_v2, %v8432_v32  ;;  %v7995_v35 = vrot.slane %v11887_v34, %v13047_v17  ;;  %v7999_v31 = vrot.slane %v11887_v34, %v13050_v20 }
 0xfa5   : > { %v8448_v54 = vcombine.low %v8439_v8, %v8446_v1  ;;  %v8003_v33 = vrot.slane %v11887_v34, %v13053_v41  ;;  %v8007_v48 = vrot.slane %v11887_v34, %v13056_v50  ;;  %v8011_v24 = vrot.slane %v11887_v34, %v13059_v26 }
 0xfa6   : > { %v7937_v43 = vadd.f32 1e-05, %v7932_v16  ;;  %v8455_v39 = vrot.slane %v8447_v58, %v12510_v12  ;;  %v8121_v36 = vmul.f32 %v7983_v7, %v14430_v46  ;;  %v8122_v16 = vmul.f32 %v7987_v14, %v14433_v11 }
 0xfa7   : > { %v7924_v53 = vpop.xlane.xlu1 %7923  ;;  %v8462_v2 = vrot.slane %v8448_v54, %v12510_v12  ;;  %v8123_v32 = vmul.f32 %v7991_v37, %v14436_v45  ;;  %v8124_v8 = vmul.f32 %v7995_v35, %v14439_v44  ;;  %v8125_v21 = vmul.f32 %v7999_v31, %v14442_v57 }
 0xfa8   : > { %11890 = vrsqrt.f32 %v7937_v43  ;;  %v7931_v18 = vmul.f32 0.0078125, %v7924_v53  ;;  %v8126_v62 = vmul.f32 %v8003_v33, %v14445_v55  ;;  %v8127_v34 = vmul.f32 %v8007_v48, %v14448_v13 }
 0xfa9   : > { %v8463_v43 = vcombine.low %v8455_v39, %v8462_v2  ;;  %v8128_v58 = vmul.f32 %v8011_v24, %v14451_v19  ;;  %v8217_v46 = vmul.f32 %v14637_v61, %v8121_v36  ;;  %v8218_v7 = vmul.f32 %v14643_v29, %v8122_v16 }
 0xfaa   : > { %v7936_v1 = vadd.f32 1e-05, %v7931_v18  ;;  %v8219_v11 = vmul.f32 %v14662_v56, %v8123_v32  ;;  %v8220_v45 = vmul.f32 %v14670_v9, %v8124_v8  ;;  %v8221_v44 = vmul.f32 %v14640_v0, %v8125_v21 }
 0xfab   : > { %8695 = vmatmul.mubr.f32.vlgmr.msra.gmra.mrb[26].mxu0 %v8463_v43  ;;  %v8222_v57 = vmul.f32 %v14646_v49, %v8126_v62  ;;  %v8223_v55 = vmul.f32 %v14666_v5, %v8127_v34  ;;  %v8224_v13 = vmul.f32 %v14674_v25, %v8128_v58  ;;  %v14779_v19 = vadd.f32 %v14649_v52, %v8217_v46 }
 0xfac   : > { %11892 = vrsqrt.f32 %v7936_v1  ;;  %v11889_v18 = vpop.eup %11888  ;;  %v15936_v36 = vmov 0.0   ;;  %v14783_v39 = vadd.f32 %v14655_v22, %v8218_v7  ;;  %v14786_v14 = vadd.f32 %v14678_v27, %v8219_v11 }
 0xfad   : > { %8700 = vmatprep.mubr.f32.mxu0 %v15936_v36  ;;  %v14789_v21 = vadd.f32 %v14686_v15, %v8220_v45  ;;  %v14792_v62 = vadd.f32 %v14652_v30, %v8221_v44  ;;  %v14795_v37 = vadd.f32 %v14658_v6, %v8222_v57  ;;  %v14798_v35 = vadd.f32 %v14682_v28, %v8223_v55 }
 0xfae   : > { %v14801_v31 = vadd.f32 %v14690_v63, %v8224_v13  ;;  %v8015_v53 = vrot.slane %v11889_v18, %v13008_v60  ;;  %v8464_v54 = vcombine.low %v14779_v19, %v14783_v39  ;;  %v8019_v48 = vrot.slane %v11889_v18, %v13005_v59 }
 0xfaf   : > { %15937 = vst [vmem:[#allocation50_spill] sm:$0xff] %v14789_v21  ;;  %15938 = vst [vmem:[#allocation38_spill] sm:$0xff] %v14792_v62  ;;  %v8465_v33 = vcombine.low %v14786_v14, %v14789_v21  ;;  %v8023_v24 = vrot.slane %v11889_v18, %v13013_v38  ;;  %v8466_v2 = vcombine.low %v14792_v62, %v14795_v37  ;;  %v15942_v62 = vld [vmem:[#allocation59_spill] sm:$0xff] }
 0xfb0   : > { %15939 = vst [vmem:[#allocation48_spill] sm:$0xff] %v14795_v37  ;;  %15940 = vst [vmem:[#allocation52_spill] sm:$0xff] %v14798_v35  ;;  %v8467_v16 = vcombine.low %v14798_v35, %v14801_v31  ;;  %v8027_v32 = vrot.slane %v11889_v18, %v13047_v17  ;;  %v8031_v8 = vrot.slane %v11889_v18, %v13050_v20 }
 0xfb1   : > { %15941 = vst [vmem:[#allocation30_spill] sm:$0xff] %v14801_v31  ;;  %v8474_v34 = vrot.slane %v8464_v54, %v12510_v12  ;;  %v8481_v43 = vrot.slane %v8465_v33, %v12510_v12  ;;  %v8035_v58 = vrot.slane %v11889_v18, %v13053_v41  ;;  %v8039_v46 = vrot.slane %v11889_v18, %v13056_v50 }
 0xfb2   : > { %v14816_v1 = vpop.eup %11890  ;;  %v8488_v11 = vrot.slane %v8466_v2, %v12510_v12  ;;  %v8495_v45 = vrot.slane %v8467_v16, %v12510_v12  ;;  %v8043_v44 = vrot.slane %v11889_v18, %v13059_v26  ;;  %v8129_v55 = vmul.f32 %v8015_v53, %v14484_v42  ;;  %v15943_v16 = vld [vmem:[#allocation64_spill] sm:$0xff] }
 0xfb3   : > { %v8496_v57 = vcombine.low %v8474_v34, %v8481_v43  ;;  %v8130_v13 = vmul.f32 %v8019_v48, %v14487_v40  ;;  %v8131_v54 = vmul.f32 %v8023_v24, %v14490_v47  ;;  %v8132_v31 = vmul.f32 %v8027_v32, %v14493_v10  ;;  %v15944_v18 = vld [vmem:[#allocation60_spill] sm:$0xff] }
 0xfb4   : > { %v8497_v33 = vcombine.low %v8488_v11, %v8495_v45  ;;  %v8133_v35 = vmul.f32 %v8031_v8, %v14496_v23  ;;  %v8134_v7 = vmul.f32 %v8035_v58, %v15942_v62  ;;  %v8135_v21 = vmul.f32 %v8039_v46, %v15943_v16 }
 0xfb5   : > { %v8504_v2 = vrot.slane %v8496_v57, %v12510_v12  ;;  %v8136_v34 = vmul.f32 %v8043_v44, %v15944_v18  ;;  %v8225_v42 = vmul.f32 %v14637_v61, %v8129_v55  ;;  %v8226_v47 = vmul.f32 %v14643_v29, %v8130_v13 }
 0xfb6   : > { %v11893_v37 = vpop.eup %11892  ;;  %v8511_v40 = vrot.slane %v8497_v33, %v12510_v12  ;;  %v8227_v53 = vmul.f32 %v14662_v56, %v8131_v54  ;;  %v8228_v10 = vmul.f32 %v14670_v9, %v8132_v31  ;;  %v8229_v23 = vmul.f32 %v14640_v0, %v8133_v35 }
 0xfb7   : > { %v8230_v62 = vmul.f32 %v14646_v49, %v8134_v7  ;;  %v8231_v48 = vmul.f32 %v14666_v5, %v8135_v21  ;;  %v8232_v24 = vmul.f32 %v14674_v25, %v8136_v34  ;;  %v14846_v8 = vadd.f32 %v14649_v52, %v8225_v42 }
 0xfb8   : > { %v8512_v32 = vcombine.low %v8504_v2, %v8511_v40  ;;  %v14849_v43 = vadd.f32 %v14655_v22, %v8226_v47  ;;  %v14852_v58 = vadd.f32 %v14678_v27, %v8227_v53  ;;  %v14855_v31 = vadd.f32 %v14686_v15, %v8228_v10  ;;  %v15948_v10 = vld [vmem:[#allocation65_spill] sm:$0xff] }
 0xfb9   : > { %v14858_v35 = vadd.f32 %v14652_v30, %v8229_v23  ;;  %v14861_v21 = vadd.f32 %v14658_v6, %v8230_v62  ;;  %v14864_v46 = vadd.f32 %v14682_v28, %v8231_v48  ;;  %v14867_v7 = vadd.f32 %v14690_v63, %v8232_v24  ;;  %v15949_v62 = vld [vmem:[#allocation66_spill] sm:$0xff]  ;;  %v15950_v24 = vld [vmem:[#allocation53_spill] sm:$0xff] }
 0xfba   : > { %8701 = vmatmul.mubr.f32.gmra.mrb[28].mxu0 %v8512_v32  ;;  %v8513_v11 = vcombine.low %v14846_v8, %v14849_v43  ;;  %v8047_v45 = vrot.slane %v11893_v37, %v13008_v60  ;;  %v8051_v44 = vrot.slane %v11893_v37, %v13005_v59  ;;  %v8514_v57 = vcombine.low %v14852_v58, %v14855_v31 }
 0xfbb   : > { %15945 = vst [vmem:[#allocation34_spill] sm:$0xff] %v14861_v21  ;;  %15946 = vst [vmem:[#allocation35_spill] sm:$0xff] %v14864_v46  ;;  %8706 = vmatprep.mubr.f32.mxu0 %v15936_v36  ;;  %v8515_v55 = vcombine.low %v14858_v35, %v14861_v21  ;;  %v8055_v13 = vrot.slane %v11893_v37, %v13013_v38  ;;  %v8059_v54 = vrot.slane %v11893_v37, %v13047_v17  ;;  %v15955_v21 = vld [vmem:[#allocation62_spill] sm:$0xff] }
 0xfbc   : > { %15947 = vst [vmem:[#allocation36_spill] sm:$0xff] %v14867_v7  ;;  %v8516_v33 = vcombine.low %v14864_v46, %v14867_v7  ;;  %v8523_v2 = vrot.slane %v8513_v11, %v12510_v12  ;;  %v8063_v16 = vrot.slane %v11893_v37, %v13050_v20  ;;  %v8067_v18 = vrot.slane %v11893_v37, %v13053_v41  ;;  %v15951_v20 = vld [vmem:[#allocation54_spill] sm:$0xff]  ;;  %v15952_v41 = vld [vmem:[#allocation55_spill] sm:$0xff] }
 0xfbd   : > { %v8530_v34 = vrot.slane %v8514_v57, %v12510_v12  ;;  %v8537_v42 = vrot.slane %v8515_v55, %v12510_v12  ;;  %v8071_v40 = vrot.slane %v11893_v37, %v13056_v50  ;;  %v8075_v47 = vrot.slane %v11893_v37, %v13059_v26  ;;  %v15953_v57 = vld [vmem:[#allocation57_spill] sm:$0xff]  ;;  %v15954_v46 = vld [vmem:[#allocation58_spill] sm:$0xff] }
 0xfbe   : > { %v8544_v53 = vrot.slane %v8516_v33, %v12510_v12  ;;  %v8137_v23 = vmul.f32 %v8047_v45, %v15948_v10  ;;  %v8138_v48 = vmul.f32 %v8051_v44, %v15949_v62  ;;  %v8139_v32 = vmul.f32 %v8055_v13, %v15950_v24  ;;  %v8832_v62 = vld [vmem:[%s15958_s23 + $0x88] sm:$0xff]  ;;  %v8815_v24 = vld [vmem:[%s15958_s23] sm:$0xff] }
 0xfbf   : > { %v8545_v11 = vcombine.low %v8523_v2, %v8530_v34  ;;  %v8140_v17 = vmul.f32 %v8059_v54, %v15951_v20  ;;  %v8141_v38 = vmul.f32 %v8063_v16, %v15952_v41  ;;  %v8142_v7 = vmul.f32 %v8067_v18, %v15953_v57  ;;  %v8833_v57 = vld [vmem:[%s15958_s23 + $0x90] sm:$0xff] }
 0xfc0   : > { %v8546_v55 = vcombine.low %v8537_v42, %v8544_v53  ;;  %v8143_v50 = vmul.f32 %v8071_v40, %v15954_v46  ;;  %v8144_v37 = vmul.f32 %v8075_v47, %v15955_v21  ;;  %v8233_v33 = vmul.f32 %v14637_v61, %v8137_v23 }
 0xfc1   : > { %v8553_v45 = vrot.slane %v8545_v11, %v12510_v12  ;;  %v8234_v44 = vmul.f32 %v14643_v29, %v8138_v48  ;;  %v8235_v13 = vmul.f32 %v14662_v56, %v8139_v32  ;;  %v8236_v2 = vmul.f32 %v14670_v9, %v8140_v17  ;;  %v8816_v32 = vld [vmem:[%s15958_s23 + $0x8] sm:$0xff] }
 0xfc2   : > { %v8560_v20 = vrot.slane %v8546_v55, %v12510_v12  ;;  %v8237_v41 = vmul.f32 %v14640_v0, %v8141_v38  ;;  %v8238_v54 = vmul.f32 %v14646_v49, %v8142_v7  ;;  %v8239_v46 = vmul.f32 %v14666_v5, %v8143_v50  ;;  %v15956_v5 = vld [vmem:[#allocation72_spill] sm:$0xff] }
 0xfc3   : > { %v8240_v21 = vmul.f32 %v14674_v25, %v8144_v37  ;;  %v14909_v16 = vadd.f32 %v14649_v52, %v8233_v33  ;;  %v14912_v18 = vadd.f32 %v14655_v22, %v8234_v44  ;;  %v14915_v29 = vadd.f32 %v14678_v27, %v8235_v13  ;;  %v8817_v37 = vld [vmem:[%s15958_s23 + $0x10] sm:$0xff]  ;;  %v8818_v33 = vld [vmem:[%s15958_s23 + $0x18] sm:$0xff]  ;;  %v8835_v44 = vld [vmem:[%s15958_s23 + $0xa0] sm:$0xff] }
 0xfc4   : > { %v8561_v17 = vcombine.low %v8553_v45, %v8560_v20  ;;  %v14918_v56 = vadd.f32 %v14686_v15, %v8236_v2  ;;  %v14921_v38 = vadd.f32 %v14652_v30, %v8237_v41  ;;  %v14924_v50 = vadd.f32 %v14658_v6, %v8238_v54  ;;  %v8836_v13 = vld [vmem:[%s15958_s23 + $0xa8] sm:$0xff]  ;;  %v8819_v20 = vld [vmem:[%s15958_s23 + $0x20] sm:$0xff] }
 0xfc5   : > { %v14927_v0 = vadd.f32 %v14682_v28, %v8239_v46  ;;  %v14930_v49 = vadd.f32 %v14690_v63, %v8240_v21  ;;  %v8562_v22 = vcombine.low %v14909_v16, %v14912_v18  ;;  %v15957_v9 = vrot.slane %v14816_v1, %v13008_v60  ;;  %v8820_v41 = vld [vmem:[%s15958_s23 + $0x28] sm:$0xff]  ;;  %v8837_v46 = vld [vmem:[%s15958_s23 + $0xb0] sm:$0xff]  ;;  %v8838_v21 = vld [vmem:[%s15958_s23 + $0xb8] sm:$0xff] }
 0xfc6   : > { %8707 = vmatmul.mubr.f32.gmra.mrb[30].mxu0 %v8561_v17  ;;  %v8563_v30 = vcombine.low %v14915_v29, %v14918_v56  ;;  %v8564_v6 = vcombine.low %v14921_v38, %v14924_v50  ;;  %v11572_v11 = vpack.c.bf16 %v8816_v32, %v8815_v24  ;;  %v11576_v45 = vpack.c.bf16 %v8818_v33, %v8817_v37  ;;  %v8821_v17 = vld [vmem:[%s15958_s23 + $0x30] sm:$0xff]  ;;  %v8846_v24 = vld [vmem:[%s15958_s23 + $0xf8] sm:$0xff] }
 0xfc7   : > { %v8145_v25 = vmul.f32 %v15957_v9, %v15956_v5  ;;  %8712 = vmatprep.mubr.f32.mxu0 %v15936_v36  ;;  %v8565_v27 = vcombine.low %v14927_v0, %v14930_v49  ;;  %v8572_v28 = vrot.slane %v8562_v22, %v12510_v12  ;;  %v11578_v2 = vpack.c.bf16 %v8836_v13, %v8835_v44  ;;  %v8822_v5 = vld [vmem:[%s15958_s23 + $0x38] sm:$0xff] }
 0xfc8   : > { %v8579_v63 = vrot.slane %v8563_v30, %v12510_v12  ;;  %v8586_v1 = vrot.slane %v8564_v6, %v12510_v12  ;;  %v11580_v54 = vpack.c.bf16 %v8820_v41, %v8819_v20  ;;  %v11582_v22 = vpack.c.bf16 %v8838_v21, %v8837_v46  ;;  %v8840_v30 = vld [vmem:[%s15958_s23 + $0xc8] sm:$0xff] }
 0xfc9   : > { %v8241_v15 = vmul.f32 %v14637_v61, %v8145_v25  ;;  %v8593_v7 = vrot.slane %v8565_v27, %v12510_v12  ;;  %v11584_v9 = vpack.c.bf16 %v8822_v5, %v8821_v17  ;;  %v8839_v25 = vld [vmem:[%s15958_s23 + $0xc0] sm:$0xff] }
 0xfca   : > { %v8594_v34 = vcombine.low %v8572_v28, %v8579_v63  ;;  %v11586_v6 = vpack.c.bf16 %v8840_v30, %v8839_v25  ;;  %v8823_v27 = vld [vmem:[%s15958_s23 + $0x40] sm:$0xff]  ;;  %v8824_v28 = vld [vmem:[%s15958_s23 + $0x48] sm:$0xff]  ;;  %v8841_v63 = vld [vmem:[%s15958_s23 + $0xd0] sm:$0xff] }
 0xfcb   : > { %v8595_v42 = vcombine.low %v8586_v1, %v8593_v7  ;;  %v14951_v40 = vadd.f32 %v14649_v52, %v8241_v15  ;;  %v8831_v52 = vld [vmem:[%s15958_s23 + $0x80] sm:$0xff]  ;;  %v11588_v15 = vpack.c.bf16 %v8824_v28, %v8823_v27  ;;  %v8842_v1 = vld [vmem:[%s15958_s23 + $0xd8] sm:$0xff] }
 0xfcc   : > { %v8602_v47 = vrot.slane %v8594_v34, %v12510_v12  ;;  %v11570_v48 = vpack.c.bf16 %v8832_v62, %v8831_v52  ;;  %v11590_v7 = vpack.c.bf16 %v8842_v1, %v8841_v63  ;;  %v8825_v34 = vld [vmem:[%s15958_s23 + $0x50] sm:$0xff]  ;;  %v8828_v52 = vld [vmem:[%s15958_s23 + $0x68] sm:$0xff] }
 0xfcd   : > { %v8609_v53 = vrot.slane %v8595_v42, %v12510_v12  ;;  %v8617_v10 = vrot.slane %v14951_v40, %v12510_v12  ;;  %v8826_v42 = vld [vmem:[%s15958_s23 + $0x58] sm:$0xff] }
 0xfce   : > { %11571 = vmatprep.subr.bf16.mxu1 %v11570_v48  ;;  %v8845_v48 = vld [vmem:[%s15958_s23 + $0xf0] sm:$0xff] }
 0xfcf   : > { %v8610_v61 = vcombine.low %v8602_v47, %v8609_v53  ;;  %v8624_v23 = vrot.slane %v8617_v10, %v12510_v12  ;;  %11573 = vmatpush3.bf16.msra.mxu1 %v11572_v11  ;;  %v11592_v47 = vpack.c.bf16 %v8826_v42, %v8825_v34  ;;  %v8843_v53 = vld [vmem:[%s15958_s23 + $0xe0] sm:$0xff]  ;;  %v11598_v32 = vpack.c.bf16 %v8846_v24, %v8845_v48  ;;  %v8829_v11 = vld [vmem:[%s15958_s23 + $0x70] sm:$0xff] }
 0xfd1   : > { %8713 = vmatmul.mubr.f32.gmra.mrb[32].mxu0 %v8610_v61  ;;  %v8844_v61 = vld [vmem:[%s15958_s23 + $0xe8] sm:$0xff] }
 0xfd2   : > { %8718 = vmatprep.mubr.f32.mxu0 %v15936_v36  ;;  %v8834_v36 = vld [vmem:[%s15958_s23 + $0x98] sm:$0xff]  ;;  %v11594_v10 = vpack.c.bf16 %v8844_v61, %v8843_v53 }
 0xfd3   : > { %v11574_v55 = vpack.c.bf16 %v8834_v36, %v8833_v57  ;;  %v8830_v57 = vld [vmem:[%s15958_s23 + $0x78] sm:$0xff] }
 0xfd4   : > { %v11600_v36 = vpack.c.bf16 %v8830_v57, %v8829_v11 }
 0xfd5   : > { %8719 = vmatmul.mubr.f32.gmra.mrb[34].mxu0 %v8624_v23  ;;  %11575 = vmatprep.subr.bf16.mxu1 %v11574_v55  ;;  %v8827_v23 = vld [vmem:[%s15958_s23 + $0x60] sm:$0xff] }
 0xfd6   : > { %11577 = vmatpush3.bf16.msra.mxu1 %v11576_v45  ;;  %v11596_v62 = vpack.c.bf16 %v8828_v52, %v8827_v23  ;;  %v8370_v55 = vld [vmem:[%s15959_s18] sm:$0x3] }
 0xfd7   : > { %11579 = vmatprep.subr.bf16.mxu1 %v11578_v2  ;;  %v14993_v37 = vrot.slane %v8370_v55, %v13008_v60  ;;  %v14996_v33 = vrot.slane %v8370_v55, %v13005_v59 }
 0xfda   : > { %11581 = vmatpush3.bf16.msra.mxu1 %v11580_v54 }
 0xfdb   : > { %11583 = vmatprep.subr.bf16.mxu1 %v11582_v22 }
 0xfde   : > { %11585 = vmatpush3.bf16.msra.mxu1 %v11584_v9 }
 0xfdf   : > { %11587 = vmatprep.subr.bf16.mxu1 %v11586_v6 }
 0xfe2   : > { %11589 = vmatpush3.bf16.msra.mxu1 %v11588_v15 }
 0xfe3   : > { %11591 = vmatprep.subr.bf16.mxu1 %v11590_v7 }
 0xfe6   : > { %11593 = vmatpush3.bf16.msra.mxu1 %v11592_v47 }
 0xfe7   : > { %11595 = vmatprep.subr.bf16.mxu1 %v11594_v10 }
 0xfea   : > { %11597 = vmatpush3.bf16.msra.mxu1 %v11596_v62 }
 0xfeb   : > { %11599 = vmatprep.subr.bf16.mxu1 %v11598_v32 }
 0xfee   : > { %11601 = vmatpush3.bf16.msra.mxu1 %v11600_v36 }
0x107e   : > { %v8696_v45 = vpop.f32.mrb[26].mxu0 }
0x107f   : > { %v8697_v44 = vadd.f32 %v8696_v45, %v14993_v37  ;;  %v8698_v13 = vpop.f32.mrb[27].mxu0 }
0x1080   : > { %v8699_v2 = vadd.f32 %v8698_v13, %v14996_v33 }
0x1081   : > { %v8725_v20 = vmul.f32 %v8697_v44, %v8697_v44 }
0x1082   : > { %v8726_v41 = vmul.f32 %v8699_v2, %v8699_v2 }
0x1083   : > { %v8735_v54 = vmul.f32 %v8725_v20, %v8697_v44 }
0x1084   : > { %v8736_v46 = vmul.f32 %v8726_v41, %v8699_v2 }
0x1085   : > { %v8745_v21 = vmul.f32 0.044715, %v8735_v54 }
0x1086   : > { %v8746_v17 = vmul.f32 0.044715, %v8736_v46 }
0x1087   : > { %v8755_v22 = vadd.f32 %v8745_v21, %v8697_v44 }
0x1088   : > { %v8756_v5 = vadd.f32 %v8746_v17, %v8699_v2 }
0x1089   : > { %v8765_v9 = vmul.f32 0.7978846, %v8755_v22 }
0x108a   : > { %v8766_v25 = vmul.f32 0.7978846, %v8756_v5 }
0x108b   : > { %11894 = vtanh.f32 %v8765_v9 }
0x108c   : > { %11896 = vtanh.f32 %v8766_v25 }
0x108d   : > { %v8702_v30 = vpop.f32.mrb[28].mxu0 }
0x108e   : > { %v8703_v6 = vadd.f32 %v8702_v30, %v14993_v37  ;;  %v8704_v27 = vpop.f32.mrb[29].mxu0 }
0x108f   : > { %v8705_v28 = vadd.f32 %v8704_v27, %v14996_v33 }
0x1090   : > { %v8727_v15 = vmul.f32 %v8703_v6, %v8703_v6 }
0x1091   : > { %v8728_v63 = vmul.f32 %v8705_v28, %v8705_v28 }
0x1092   : > { %v8737_v1 = vmul.f32 %v8727_v15, %v8703_v6 }
0x1093   : > { %v8738_v7 = vmul.f32 %v8728_v63, %v8705_v28 }
0x1094   : > { %v8747_v34 = vmul.f32 0.044715, %v8737_v1 }
0x1095   : > { %v8748_v42 = vmul.f32 0.044715, %v8738_v7  ;;  %v11895_v47 = vpop.eup %11894 }
0x1096   : > { %v8757_v53 = vadd.f32 %v8747_v34, %v8703_v6  ;;  %v11897_v61 = vpop.eup %11896  ;;  %v8785_v10 = vadd.f32 1.0, %v11895_v47 }
0x1097   : > { %v8758_v23 = vadd.f32 %v8748_v42, %v8705_v28  ;;  %v8786_v62 = vadd.f32 1.0, %v11897_v61 }
0x1098   : > { %v8767_v52 = vmul.f32 0.7978846, %v8757_v53  ;;  %v8795_v48 = vmul.f32 0.5, %v8785_v10 }
0x1099   : > { %v8768_v24 = vmul.f32 0.7978846, %v8758_v23  ;;  %v8708_v32 = vpop.f32.mrb[30].mxu0  ;;  %v8796_v36 = vmul.f32 0.5, %v8786_v62 }
0x109a   : > { %v15003_v11 = vadd.f32 %v8708_v32, %v14993_v37  ;;  %v8710_v57 = vpop.f32.mrb[31].mxu0  ;;  %11898 = vtanh.f32 %v8767_v52  ;;  %v8805_v20 = vmul.f32 %v8795_v48, %v8697_v44 }
0x109b   : > { %v15006_v55 = vadd.f32 %v8710_v57, %v14996_v33  ;;  %11900 = vtanh.f32 %v8768_v24  ;;  %v8806_v13 = vmul.f32 %v8796_v36, %v8699_v2 }
0x109c   : > { %v8729_v45 = vmul.f32 %v15003_v11, %v15003_v11 }
0x109d   : > { %v8730_v41 = vmul.f32 %v15006_v55, %v15006_v55  ;;  %8918 = vmatprep.mubr.f32.mxu1 %v8806_v13 }
0x109e   : > { %v8739_v54 = vmul.f32 %v8729_v45, %v15003_v11  ;;  %8919 = vmatmul.mubr.f32.vlgmr.msra.gmra.mrb[42].mxu1 %v8805_v20 }
0x109f   : > { %v8740_v46 = vmul.f32 %v8730_v41, %v15006_v55 }
0x10a0   : > { %v8749_v21 = vmul.f32 0.044715, %v8739_v54 }
0x10a1   : > { %v8750_v17 = vmul.f32 0.044715, %v8740_v46 }
0x10a2   : > { %v8759_v22 = vadd.f32 %v8749_v21, %v15003_v11 }
0x10a3   : > { %v8760_v5 = vadd.f32 %v8750_v17, %v15006_v55 }
0x10a4   : > { %v11899_v9 = vpop.eup %11898  ;;  %v8769_v25 = vmul.f32 0.7978846, %v8759_v22  ;;  %v8714_v30 = vpop.f32.mrb[32].mxu0 }
0x10a5   : > { %v11901_v2 = vpop.eup %11900  ;;  %v8770_v44 = vmul.f32 0.7978846, %v8760_v5  ;;  %v8715_v27 = vadd.f32 %v8714_v30, %v14993_v37  ;;  %v8716_v15 = vpop.f32.mrb[33].mxu0  ;;  %v8787_v63 = vadd.f32 1.0, %v11899_v9 }
0x10a6   : > { %v8717_v1 = vadd.f32 %v8716_v15, %v14996_v33  ;;  %v8788_v7 = vadd.f32 1.0, %v11901_v2  ;;  %11902 = vtanh.f32 %v8769_v25 }
0x10a7   : > { %v8731_v34 = vmul.f32 %v8715_v27, %v8715_v27  ;;  %v8797_v42 = vmul.f32 0.5, %v8787_v63  ;;  %11904 = vtanh.f32 %v8770_v44 }
0x10a8   : > { %v8732_v47 = vmul.f32 %v8717_v1, %v8717_v1  ;;  %v8720_v53 = vpop.f32.mrb[34].mxu0  ;;  %v8798_v61 = vmul.f32 0.5, %v8788_v7 }
0x10a9   : > { %v8741_v10 = vmul.f32 %v8731_v34, %v8715_v27  ;;  %v8721_v23 = vadd.f32 %v8720_v53, %v14993_v37  ;;  %v8722_v52 = vpop.f32.mrb[35].mxu0  ;;  %v8807_v36 = vmul.f32 %v8797_v42, %v8703_v6 }
0x10aa   : > { %v8742_v62 = vmul.f32 %v8732_v47, %v8717_v1  ;;  %v8723_v48 = vadd.f32 %v8722_v52, %v14996_v33  ;;  %v8808_v24 = vmul.f32 %v8798_v61, %v8705_v28 }
0x10ab   : > { %v8751_v32 = vmul.f32 0.044715, %v8741_v10  ;;  %v8733_v57 = vmul.f32 %v8721_v23, %v8721_v23 }
0x10ac   : > { %v8752_v45 = vmul.f32 0.044715, %v8742_v62  ;;  %v8734_v13 = vmul.f32 %v8723_v48, %v8723_v48  ;;  %8923 = vmatprep.mubr.f32.mxu1 %v8808_v24 }
0x10ad   : > { %v8761_v20 = vadd.f32 %v8751_v32, %v8715_v27  ;;  %v8743_v41 = vmul.f32 %v8733_v57, %v8721_v23  ;;  %8924 = vmatmul.mubr.f32.gmra.mrb[44].mxu1 %v8807_v36 }
0x10ae   : > { %v8762_v54 = vadd.f32 %v8752_v45, %v8717_v1  ;;  %v8744_v46 = vmul.f32 %v8734_v13, %v8723_v48 }
0x10af   : > { %v8771_v21 = vmul.f32 0.7978846, %v8761_v20  ;;  %v8753_v17 = vmul.f32 0.044715, %v8743_v41  ;;  %v15023_v41 = vld [vmem:[%s12325_s12] ss:$0 sm:$0xff] }
0x10b0   : > { %v11903_v22 = vpop.eup %11902  ;;  %v8772_v37 = vmul.f32 0.7978846, %v8762_v54  ;;  %v8754_v5 = vmul.f32 0.044715, %v8744_v46 }
0x10b1   : > { %v11905_v9 = vpop.eup %11904  ;;  %v8763_v25 = vadd.f32 %v8753_v17, %v8721_v23  ;;  %v8789_v33 = vadd.f32 1.0, %v11903_v22  ;;  %11906 = vtanh.f32 %v8771_v21 }
0x10b2   : > { %v8764_v28 = vadd.f32 %v8754_v5, %v8723_v48  ;;  %v8790_v30 = vadd.f32 1.0, %v11905_v9  ;;  %11908 = vtanh.f32 %v8772_v37 }
0x10b3   : > { %v8773_v6 = vmul.f32 0.7978846, %v8763_v25  ;;  %v8799_v2 = vmul.f32 0.5, %v8789_v33 }
0x10b4   : > { %v8774_v44 = vmul.f32 0.7978846, %v8764_v28  ;;  %v8800_v15 = vmul.f32 0.5, %v8790_v30 }
0x10b5   : > { %11910 = vtanh.f32 %v8773_v6  ;;  %v8809_v7 = vmul.f32 %v8799_v2, %v15003_v11 }
0x10b6   : > { %v8810_v63 = vmul.f32 %v8800_v15, %v15006_v55  ;;  %11912 = vtanh.f32 %v8774_v44  ;;  %v15960_v15 = vld [vmem:[#allocation29_spill] sm:$0xff] }
0x10b8   : > { %8928 = vmatprep.mubr.f32.mxu1 %v8810_v63 }
0x10b9   : > { %8929 = vmatmul.mubr.f32.gmra.mrb[46].mxu1 %v8809_v7 }
0x10bb   : > { %v11907_v34 = vpop.eup %11906 }
0x10bc   : > { %v11909_v42 = vpop.eup %11908  ;;  %v8791_v47 = vadd.f32 1.0, %v11907_v34  ;;  %v15961_v34 = vld [vmem:[#allocation61_spill] sm:$0xff] }
0x10bd   : > { %v8792_v53 = vadd.f32 1.0, %v11909_v42 }
0x10be   : > { %v8801_v61 = vmul.f32 0.5, %v8791_v47  ;;  %v15962_v47 = vld [vmem:[#allocation33_spill] sm:$0xff] }
0x10bf   : > { %v11911_v10 = vpop.eup %11910  ;;  %v8802_v52 = vmul.f32 0.5, %v8792_v53 }
0x10c0   : > { %v11913_v62 = vpop.eup %11912  ;;  %v8793_v24 = vadd.f32 1.0, %v11911_v10  ;;  %v8811_v36 = vmul.f32 %v8801_v61, %v8715_v27 }
0x10c1   : > { %v8812_v32 = vmul.f32 %v8802_v52, %v8717_v1  ;;  %v8794_v57 = vadd.f32 1.0, %v11913_v62  ;;  %v15964_v52 = vld [vmem:[#allocation47_spill] sm:$0xff] }
0x10c2   : > { %v8803_v45 = vmul.f32 0.5, %v8793_v24 }
0x10c3   : > { %8933 = vmatprep.mubr.f32.mxu1 %v8812_v32  ;;  %v8804_v55 = vmul.f32 0.5, %v8794_v57 }
0x10c4   : > { %8934 = vmatmul.mubr.f32.gmra.mrb[48].mxu1 %v8811_v36  ;;  %v8813_v13 = vmul.f32 %v8803_v45, %v8721_v23 }
0x10c5   : > { %v8814_v11 = vmul.f32 %v8804_v55, %v8723_v48 }
0x10c7   : > { %8938 = vmatprep.mubr.f32.mxu1 %v8814_v11 }
0x10c8   : > { %8939 = vmatmul.mubr.f32.gmra.mrb[50].mxu1 %v8813_v13 }
0x1171   : > { %v11077_v20 = vpop.f32.mrb[42].mxu1 }
0x1172   : > { %v11078_v54 = vpop.f32.mrb[43].mxu1 }
0x1173   : > { %v11079_v46 = vadd.f32 %v11078_v54, %v11077_v20 }
0x1175   : > { %v8921_v21 = vadd.f32 %v11079_v46, %v15023_v41 }
0x1177   : > { %v8949_v17 = vcombine.high %v8921_v21, %v8921_v21  ;;  %v8956_v1 = vrot.slane %v8921_v21, %v12510_v12 }
0x1179   : > { %v8963_v27 = vrot.slane %v8949_v17, %v12510_v12  ;;  %v8964_v22 = vcombine.high %v8956_v1, %v8956_v1  ;;  %v8972_v37 = vrot.slane %v8956_v1, %v12510_v12 }
0x117b   : > { %v8965_v5 = vcombine.high %v8963_v27, %v8963_v27  ;;  %v8979_v23 = vrot.slane %v8963_v27, %v12510_v12  ;;  %v8986_v48 = vrot.slane %v8964_v22, %v12510_v12  ;;  %v8994_v9 = vcombine.high %v8972_v37, %v8972_v37 }
0x117c   : > { %v15036_v6 = vadd.f32 %v8972_v37, %v14717_v51 }
0x117d   : > { %v8993_v25 = vrot.slane %v8965_v5, %v12510_v12  ;;  %v8995_v33 = vcombine.high %v8979_v23, %v8979_v23  ;;  %v8996_v28 = vcombine.high %v8986_v48, %v8986_v48  ;;  %v15033_v30 = vadd.f32 %v8986_v48, %v14720_v4  ;;  %v15963_v4 = vld [vmem:[#allocation32_spill] sm:$0xff] }
0x117e   : > { %v15039_v2 = vadd.f32 %v8994_v9, %v14723_v3  ;;  %v15042_v63 = vadd.f32 %v8979_v23, %v15960_v15 }
0x117f   : > { %v8997_v44 = vcombine.high %v8993_v25, %v8993_v25  ;;  %v15045_v42 = vadd.f32 %v8996_v28, %v15961_v34  ;;  %v15048_v53 = vadd.f32 %v8993_v25, %v15962_v47  ;;  %v15051_v10 = vadd.f32 %v8995_v33, %v15963_v4 }
0x1180   : > { %v11080_v7 = vpop.f32.mrb[44].mxu1  ;;  %v9258_v51 = vcombine.low %v15036_v6, %v15033_v30 }
0x1181   : > { %v11081_v61 = vpop.f32.mrb[45].mxu1  ;;  %v15056_v62 = vadd.f32 %v8997_v44, %v15964_v52  ;;  %v9259_v24 = vcombine.low %v15039_v2, %v15045_v42  ;;  %v9260_v32 = vcombine.low %v15042_v63, %v15048_v53 }
0x1182   : > { %v11082_v3 = vadd.f32 %v11081_v61, %v11080_v7  ;;  %v9268_v55 = vrot.slane %v9258_v51, %v12510_v12 }
0x1183   : > { %v9261_v36 = vcombine.low %v15051_v10, %v15056_v62  ;;  %v9275_v45 = vrot.slane %v9259_v24, %v12510_v12  ;;  %v9282_v20 = vrot.slane %v9260_v32, %v12510_v12  ;;  %v15966_v24 = vld [vmem:[#allocation48_spill] sm:$0xff] }
0x1184   : > { %v8926_v57 = vadd.f32 %v11082_v3, %v15023_v41  ;;  %v15965_v3 = vld [vmem:[#allocation50_spill] sm:$0xff] }
0x1185   : > { %v9289_v54 = vrot.slane %v9261_v36, %v12510_v12  ;;  %v9290_v46 = vcombine.low %v9268_v55, %v9275_v45  ;;  %v15968_v36 = vld [vmem:[#allocation52_spill] sm:$0xff]  ;;  %v15969_v55 = vld [vmem:[#allocation30_spill] sm:$0xff] }
0x1186   : > { %v8998_v11 = vcombine.high %v8926_v57, %v8926_v57  ;;  %v9005_v13 = vrot.slane %v8926_v57, %v12510_v12  ;;  %v15967_v57 = vld [vmem:[#allocation38_spill] sm:$0xff] }
0x1187   : > { %v9291_v27 = vcombine.low %v9282_v20, %v9289_v54  ;;  %v9298_v48 = vrot.slane %v9290_v46, %v12510_v12 }
0x1188   : > { %v9012_v21 = vrot.slane %v8998_v11, %v12510_v12  ;;  %v9013_v17 = vcombine.high %v9005_v13, %v9005_v13  ;;  %v9021_v1 = vrot.slane %v9005_v13, %v12510_v12 }
0x1189   : > { %v9305_v9 = vrot.slane %v9291_v27, %v12510_v12 }
0x118a   : > { %v9014_v22 = vcombine.high %v9012_v21, %v9012_v21  ;;  %v9028_v37 = vrot.slane %v9012_v21, %v12510_v12  ;;  %v9035_v5 = vrot.slane %v9013_v17, %v12510_v12  ;;  %v9043_v23 = vcombine.high %v9021_v1, %v9021_v1 }
0x118b   : > { %v15081_v7 = vadd.f32 %v9021_v1, %v14779_v19  ;;  %v9306_v61 = vcombine.low %v9298_v48, %v9305_v9 }
0x118c   : > { %v9042_v25 = vrot.slane %v9014_v22, %v12510_v12  ;;  %v9044_v33 = vcombine.high %v9028_v37, %v9028_v37  ;;  %v9045_v28 = vcombine.high %v9035_v5, %v9035_v5  ;;  %v15078_v44 = vadd.f32 %v9035_v5, %v14783_v39  ;;  %v11083_v15 = vpop.f32.mrb[46].mxu1 }
0x118d   : > { %v15084_v34 = vadd.f32 %v9043_v23, %v14786_v14  ;;  %v11084_v47 = vpop.f32.mrb[47].mxu1  ;;  %v15093_v39 = vadd.f32 %v9028_v37, %v15967_v57  ;;  %9473 = vadd.xlane.f32.xlu1 %v9306_v61 }
0x118e   : > { %v9046_v4 = vcombine.high %v9042_v25, %v9042_v25  ;;  %v11085_v51 = vadd.f32 %v11084_v47, %v11083_v15  ;;  %v15087_v52 = vadd.f32 %v9045_v28, %v15965_v3  ;;  %v15090_v32 = vadd.f32 %v9042_v25, %v15966_v24 }
0x118f   : > { %v9307_v19 = vcombine.low %v15081_v7, %v15078_v44  ;;  %v15099_v45 = vadd.f32 %v9044_v33, %v15968_v36 }
0x1190   : > { %v8931_v14 = vadd.f32 %v11085_v51, %v15023_v41  ;;  %v15102_v11 = vadd.f32 %v9046_v4, %v15969_v55  ;;  %v9308_v13 = vcombine.low %v15084_v34, %v15087_v52  ;;  %v9309_v20 = vcombine.low %v15093_v39, %v15090_v32 }
0x1191   : > { %v9317_v1 = vrot.slane %v9307_v19, %v12510_v12 }
0x1192   : > { %v9047_v54 = vcombine.high %v8931_v14, %v8931_v14  ;;  %v9054_v46 = vrot.slane %v8931_v14, %v12510_v12  ;;  %v9310_v21 = vcombine.low %v15099_v45, %v15102_v11  ;;  %v9324_v17 = vrot.slane %v9308_v13, %v12510_v12 }
0x1193   : > { %v9331_v23 = vrot.slane %v9309_v20, %v12510_v12 }
0x1194   : > { %v9061_v27 = vrot.slane %v9047_v54, %v12510_v12  ;;  %v9062_v22 = vcombine.high %v9054_v46, %v9054_v46  ;;  %v9070_v37 = vrot.slane %v9054_v46, %v12510_v12  ;;  %v9338_v5 = vrot.slane %v9310_v21, %v12510_v12  ;;  %v15970_v54 = vld [vmem:[#allocation34_spill] sm:$0xff] }
0x1195   : > { %v9339_v48 = vcombine.low %v9317_v1, %v9324_v17 }
0x1196   : > { %v9063_v9 = vcombine.high %v9061_v27, %v9061_v27  ;;  %v9077_v25 = vrot.slane %v9061_v27, %v12510_v12  ;;  %v9084_v33 = vrot.slane %v9062_v22, %v12510_v12  ;;  %v9092_v28 = vcombine.high %v9070_v37, %v9070_v37  ;;  %v15971_v27 = vld [vmem:[#allocation35_spill] sm:$0xff] }
0x1197   : > { %v15120_v15 = vadd.f32 %v9070_v37, %v14846_v8  ;;  %v11086_v47 = vpop.f32.mrb[48].mxu1  ;;  %v9340_v61 = vcombine.low %v9331_v23, %v9338_v5  ;;  %v9347_v36 = vrot.slane %v9339_v48, %v12510_v12  ;;  %v15972_v37 = vld [vmem:[#allocation36_spill] sm:$0xff] }
0x1198   : > { %v9091_v4 = vrot.slane %v9063_v9, %v12510_v12  ;;  %v9093_v51 = vcombine.high %v9077_v25, %v9077_v25  ;;  %v9094_v3 = vcombine.high %v9084_v33, %v9084_v33  ;;  %v15124_v24 = vadd.f32 %v9084_v33, %v14849_v43  ;;  %v11087_v57 = vpop.f32.mrb[49].mxu1 }
0x1199   : > { %v15127_v19 = vadd.f32 %v9092_v28, %v14852_v58  ;;  %v11088_v14 = vadd.f32 %v11087_v57, %v11086_v47  ;;  %v9354_v55 = vrot.slane %v9340_v61, %v12510_v12  ;;  %v15132_v13 = vadd.f32 %v9077_v25, %v14858_v35 }
0x119a   : > { %v9095_v8 = vcombine.high %v9091_v4, %v9091_v4  ;;  %v15135_v20 = vadd.f32 %v9094_v3, %v14855_v31  ;;  %v15138_v46 = vadd.f32 %v9091_v4, %v15970_v54  ;;  %v9356_v17 = vcombine.low %v15120_v15, %v15124_v24 }
0x119b   : > { %v8936_v43 = vadd.f32 %v11088_v14, %v15023_v41  ;;  %v11089_v21 = vpop.f32.mrb[50].mxu1  ;;  %v9355_v58 = vcombine.low %v9347_v36, %v9354_v55  ;;  %v15144_v22 = vadd.f32 %v9093_v51, %v15971_v27 }
0x119c   : > { %v11090_v1 = vpop.f32.mrb[51].mxu1  ;;  %v15147_v35 = vadd.f32 %v9095_v8, %v15972_v37  ;;  %v9357_v31 = vcombine.low %v15127_v19, %v15135_v20  ;;  %v9358_v5 = vcombine.low %v15132_v13, %v15138_v46  ;;  %v9366_v33 = vrot.slane %v9356_v17, %v12510_v12 }
0x119d   : > { %v9096_v23 = vcombine.high %v8936_v43, %v8936_v43  ;;  %v9103_v48 = vrot.slane %v8936_v43, %v12510_v12  ;;  %v11091_v9 = vadd.f32 %v11090_v1, %v11089_v21  ;;  %9475 = vadd.xlane.f32.xlu0 %v9355_v58 }
0x119e   : > { %v9359_v25 = vcombine.low %v15144_v22, %v15147_v35  ;;  %v9373_v28 = vrot.slane %v9357_v31, %v12510_v12  ;;  %v9380_v3 = vrot.slane %v9358_v5, %v12510_v12 }
0x119f   : > { %v9110_v47 = vrot.slane %v9096_v23, %v12510_v12  ;;  %v9111_v61 = vcombine.high %v9103_v48, %v9103_v48  ;;  %v9119_v4 = vrot.slane %v9103_v48, %v12510_v12  ;;  %v8941_v51 = vadd.f32 %v11091_v9, %v15023_v41 }
0x11a0   : > { %v9387_v57 = vrot.slane %v9359_v25, %v12510_v12  ;;  %v9388_v14 = vcombine.low %v9366_v33, %v9373_v28 }
0x11a1   : > { %v9112_v36 = vcombine.high %v9110_v47, %v9110_v47  ;;  %v9126_v55 = vrot.slane %v9110_v47, %v12510_v12  ;;  %v9133_v8 = vrot.slane %v9111_v61, %v12510_v12  ;;  %v9141_v54 = vcombine.high %v9119_v4, %v9119_v4 }
0x11a2   : > { %v15166_v43 = vadd.f32 %v9119_v4, %v14909_v16  ;;  %v9151_v21 = vrot.slane %v8941_v51, %v12510_v12  ;;  %v9389_v58 = vcombine.low %v9380_v3, %v9387_v57  ;;  %v9396_v5 = vrot.slane %v9388_v14, %v12510_v12 }
0x11a3   : > { %v9140_v17 = vrot.slane %v9112_v36, %v12510_v12  ;;  %v9142_v41 = vcombine.high %v9126_v55, %v9126_v55  ;;  %v9143_v1 = vcombine.high %v9133_v8, %v9133_v8  ;;  %v15171_v27 = vadd.f32 %v9133_v8, %v14912_v18 }
0x11a4   : > { %v15174_v37 = vadd.f32 %v9141_v54, %v14915_v29  ;;  %v9158_v31 = vrot.slane %v9151_v21, %v12510_v12  ;;  %v9403_v16 = vrot.slane %v9389_v58, %v12510_v12  ;;  %v15180_v48 = vadd.f32 %v9126_v55, %v14921_v38 }
0x11a5   : > { %v9144_v23 = vcombine.high %v9140_v17, %v9140_v17  ;;  %v15183_v9 = vadd.f32 %v9143_v1, %v14918_v56  ;;  %v15186_v25 = vadd.f32 %v9140_v17, %v14924_v50  ;;  %v9405_v33 = vcombine.low %v15166_v43, %v15171_v27 }
0x11a6   : > { %v9404_v18 = vcombine.low %v9396_v5, %v9403_v16  ;;  %v15189_v29 = vadd.f32 %v9158_v31, %v14951_v40  ;;  %v15194_v28 = vadd.f32 %v9142_v41, %v14927_v0  ;;  %v15973_v41 = vld [vmem:[#allocation63_spill] sm:$0xff]  ;;  %v15975_v16 = vld [vmem:[#allocation68_spill] sm:$0xff] }
0x11a7   : > { %v15197_v47 = vadd.f32 %v9144_v23, %v14930_v49  ;;  %v9406_v56 = vcombine.low %v15174_v37, %v15183_v9  ;;  %v9407_v38 = vcombine.low %v15180_v48, %v15186_v25  ;;  %v9415_v61 = vrot.slane %v9405_v33, %v12510_v12  ;;  %v15974_v31 = vld [vmem:[#allocation67_spill] sm:$0xff] }
0x11a8   : > { %9477 = vadd.xlane.f32.xlu1 %v9404_v18  ;;  %v9460_v50 = vrot.slane %v15189_v29, %v12510_v12  ;;  %v15976_v18 = vld [vmem:[#allocation69_spill] sm:$0xff] }
0x11a9   : > { %v9408_v40 = vcombine.low %v15194_v28, %v15197_v47  ;;  %v9422_v0 = vrot.slane %v9406_v56, %v12510_v12  ;;  %v9429_v4 = vrot.slane %v9407_v38, %v12510_v12  ;;  %v15977_v56 = vld [vmem:[#allocation70_spill] sm:$0xff] }
0x11aa   : > { %v9467_v49 = vrot.slane %v9460_v50, %v12510_v12 }
0x11ab   : > { %v9436_v51 = vrot.slane %v9408_v40, %v12510_v12  ;;  %v9437_v3 = vcombine.low %v9415_v61, %v9422_v0 }
0x11ac   : > { %v9481_v57 = vsel %vm7424_vm13, %v9467_v49, 0.0 }
0x11ad   : > { %9482 = vadd.xlane.f32.xlu1 %v9481_v57  ;;  %v9438_v14 = vcombine.low %v9429_v4, %v9436_v51  ;;  %v9445_v36 = vrot.slane %v9437_v3, %v12510_v12 }
0x11af   : > { %v9452_v55 = vrot.slane %v9438_v14, %v12510_v12 }
0x11b1   : > { %v9453_v8 = vcombine.low %v9445_v36, %v9452_v55 }
0x11b3   : > { %9479 = vadd.xlane.f32.xlu0 %v9453_v8 }
0x121a   : > { %v9474_v54 = vpop.xlane.xlu1 %9473 }
0x121b   : > { %v9484_v21 = vmul.f32 0.0078125, %v9474_v54 }
0x121d   : > { %v9497_v58 = vrot.slane %v9484_v21, %v13008_v60  ;;  %v9501_v17 = vrot.slane %v9484_v21, %v13005_v59  ;;  %v9505_v1 = vrot.slane %v9484_v21, %v15973_v41  ;;  %v9509_v5 = vrot.slane %v9484_v21, %v15974_v31 }
0x121e   : > { %v9513_v23 = vrot.slane %v9484_v21, %v15975_v16  ;;  %v9517_v33 = vrot.slane %v9484_v21, %v15976_v18  ;;  %v9521_v38 = vrot.slane %v9484_v21, %v15977_v56  ;;  %v9525_v50 = vrot.slane %v9484_v21, %v13059_v26 }
0x121f   : > { %v15224_v40 = vsub.f32 %v15036_v6, %v9497_v58  ;;  %v15227_v61 = vsub.f32 %v15033_v30, %v9501_v17  ;;  %v15230_v0 = vsub.f32 %v15039_v2, %v9505_v1  ;;  %v15233_v49 = vsub.f32 %v15045_v42, %v9509_v5 }
0x1220   : > { %v15236_v4 = vsub.f32 %v15042_v63, %v9513_v23  ;;  %v15239_v51 = vsub.f32 %v15048_v53, %v9517_v33  ;;  %v15242_v3 = vsub.f32 %v15051_v10, %v9521_v38  ;;  %v15245_v6 = vsub.f32 %v15056_v62, %v9525_v50 }
0x1221   : > { %v9692_v30 = vmul.f32 %v15224_v40, %v15224_v40  ;;  %v9693_v2 = vmul.f32 %v15227_v61, %v15227_v61  ;;  %v9694_v42 = vmul.f32 %v15230_v0, %v15230_v0  ;;  %v9695_v63 = vmul.f32 %v15233_v49, %v15233_v49 }
0x1222   : > { %v9696_v53 = vmul.f32 %v15236_v4, %v15236_v4  ;;  %v9697_v10 = vmul.f32 %v15239_v51, %v15239_v51  ;;  %v9698_v62 = vmul.f32 %v15242_v3, %v15242_v3  ;;  %v9699_v57 = vmul.f32 %v15245_v6, %v15245_v6 }
0x1223   : > { %v9758_v14 = vcombine.low %v9692_v30, %v9693_v2  ;;  %v9759_v36 = vcombine.low %v9694_v42, %v9695_v63 }
0x1224   : > { %v9760_v55 = vcombine.low %v9696_v53, %v9697_v10  ;;  %v9761_v8 = vcombine.low %v9698_v62, %v9699_v57 }
0x1225   : > { %v9768_v54 = vrot.slane %v9758_v14, %v12510_v12  ;;  %v9775_v21 = vrot.slane %v9759_v36, %v12510_v12 }
0x1226   : > { %v9782_v58 = vrot.slane %v9760_v55, %v12510_v12  ;;  %v9789_v17 = vrot.slane %v9761_v8, %v12510_v12 }
0x1227   : > { %v9790_v1 = vcombine.low %v9768_v54, %v9775_v21 }
0x1228   : > { %v9791_v23 = vcombine.low %v9782_v58, %v9789_v17 }
0x1229   : > { %v9798_v38 = vrot.slane %v9790_v1, %v12510_v12 }
0x122a   : > { %v9476_v5 = vpop.xlane.xlu0 %9475  ;;  %v9805_v50 = vrot.slane %v9791_v23, %v12510_v12 }
0x122b   : > { %v9485_v33 = vmul.f32 0.0078125, %v9476_v5 }
0x122c   : > { %v9806_v53 = vcombine.low %v9798_v38, %v9805_v50 }
0x122d   : > { %v9529_v30 = vrot.slane %v9485_v33, %v13008_v60  ;;  %v9533_v2 = vrot.slane %v9485_v33, %v13005_v59  ;;  %v9537_v42 = vrot.slane %v9485_v33, %v15973_v41  ;;  %v9541_v63 = vrot.slane %v9485_v33, %v15974_v31 }
0x122e   : > { %v9545_v10 = vrot.slane %v9485_v33, %v15975_v16  ;;  %v9549_v62 = vrot.slane %v9485_v33, %v15976_v18  ;;  %v9553_v57 = vrot.slane %v9485_v33, %v15977_v56  ;;  %v9557_v14 = vrot.slane %v9485_v33, %v13059_v26  ;;  %9973 = vadd.xlane.f32.xlu0 %v9806_v53 }
0x122f   : > { %v15278_v36 = vsub.f32 %v15081_v7, %v9529_v30  ;;  %v15281_v55 = vsub.f32 %v15078_v44, %v9533_v2  ;;  %v15284_v8 = vsub.f32 %v15084_v34, %v9537_v42  ;;  %v15287_v54 = vsub.f32 %v15087_v52, %v9541_v63 }
0x1230   : > { %v15290_v21 = vsub.f32 %v15093_v39, %v9545_v10  ;;  %v15293_v58 = vsub.f32 %v15090_v32, %v9549_v62  ;;  %v15296_v17 = vsub.f32 %v15099_v45, %v9553_v57  ;;  %v15299_v7 = vsub.f32 %v15102_v11, %v9557_v14 }
0x1231   : > { %v9700_v44 = vmul.f32 %v15278_v36, %v15278_v36  ;;  %v9701_v34 = vmul.f32 %v15281_v55, %v15281_v55  ;;  %v9702_v52 = vmul.f32 %v15284_v8, %v15284_v8  ;;  %v9703_v39 = vmul.f32 %v15287_v54, %v15287_v54 }
0x1232   : > { %v9704_v32 = vmul.f32 %v15290_v21, %v15290_v21  ;;  %v9705_v45 = vmul.f32 %v15293_v58, %v15293_v58  ;;  %v9706_v11 = vmul.f32 %v15296_v17, %v15296_v17  ;;  %v9707_v1 = vmul.f32 %v15299_v7, %v15299_v7 }
0x1233   : > { %v9807_v5 = vcombine.low %v9700_v44, %v9701_v34  ;;  %v9808_v23 = vcombine.low %v9702_v52, %v9703_v39 }
0x1234   : > { %v9809_v33 = vcombine.low %v9704_v32, %v9705_v45  ;;  %v9810_v50 = vcombine.low %v9706_v11, %v9707_v1 }
0x1235   : > { %v9478_v38 = vpop.xlane.xlu1 %9477  ;;  %v9817_v30 = vrot.slane %v9807_v5, %v12510_v12  ;;  %v9824_v42 = vrot.slane %v9808_v23, %v12510_v12 }
0x1236   : > { %v9486_v2 = vmul.f32 0.0078125, %v9478_v38  ;;  %v9831_v63 = vrot.slane %v9809_v33, %v12510_v12  ;;  %v9838_v53 = vrot.slane %v9810_v50, %v12510_v12 }
0x1237   : > { %v9839_v10 = vcombine.low %v9817_v30, %v9824_v42 }
0x1238   : > { %v9561_v62 = vrot.slane %v9486_v2, %v13008_v60  ;;  %v9565_v57 = vrot.slane %v9486_v2, %v13005_v59  ;;  %v9569_v14 = vrot.slane %v9486_v2, %v15973_v41  ;;  %v9840_v44 = vcombine.low %v9831_v63, %v9838_v53 }
0x1239   : > { %v9573_v34 = vrot.slane %v9486_v2, %v15974_v31  ;;  %v9577_v52 = vrot.slane %v9486_v2, %v15975_v16  ;;  %v9581_v39 = vrot.slane %v9486_v2, %v15976_v18  ;;  %v9847_v45 = vrot.slane %v9839_v10, %v12510_v12 }
0x123a   : > { %v9483_v32 = vpop.xlane.xlu1 %9482  ;;  %v9585_v11 = vrot.slane %v9486_v2, %v15977_v56  ;;  %v9589_v1 = vrot.slane %v9486_v2, %v13059_v26  ;;  %v15331_v5 = vsub.f32 %v15120_v15, %v9561_v62  ;;  %v9854_v33 = vrot.slane %v9840_v44, %v12510_v12 }
0x123b   : > { %v9488_v23 = vmul.f32 0.0078125, %v9483_v32  ;;  %v15335_v38 = vsub.f32 %v15124_v24, %v9565_v57  ;;  %v15338_v50 = vsub.f32 %v15127_v19, %v9569_v14  ;;  %v15341_v30 = vsub.f32 %v15135_v20, %v9573_v34 }
0x123c   : > { %v15344_v42 = vsub.f32 %v15132_v13, %v9577_v52  ;;  %v15347_v2 = vsub.f32 %v15138_v46, %v9581_v39  ;;  %v15350_v15 = vsub.f32 %v15144_v22, %v9585_v11  ;;  %v9855_v53 = vcombine.low %v9847_v45, %v9854_v33 }
0x123d   : > { %v9625_v63 = vrot.slane %v9488_v23, %v13008_v60  ;;  %v15354_v24 = vsub.f32 %v15147_v35, %v9589_v1  ;;  %v9708_v19 = vmul.f32 %v15331_v5, %v15331_v5  ;;  %v9709_v20 = vmul.f32 %v15335_v38, %v15335_v38 }
0x123e   : > { %15978 = vst [vmem:[#allocation31_spill] sm:$0xff] %v15344_v42  ;;  %15979 = vst [vmem:[#allocation37_spill] sm:$0xff] %v15347_v2  ;;  %v9710_v13 = vmul.f32 %v15338_v50, %v15338_v50  ;;  %v9711_v46 = vmul.f32 %v15341_v30, %v15341_v30  ;;  %v9712_v22 = vmul.f32 %v15344_v42, %v15344_v42  ;;  %9975 = vadd.xlane.f32.xlu1 %v9855_v53 }
0x123f   : > { %15980 = vst [vmem:[#allocation40_spill] sm:$0xff] %v15350_v15  ;;  %15981 = vst [vmem:[#allocation41_spill] sm:$0xff] %v15354_v24  ;;  %v15367_v10 = vsub.f32 %v15189_v29, %v9625_v63  ;;  %v9713_v35 = vmul.f32 %v15347_v2, %v15347_v2  ;;  %v9714_v62 = vmul.f32 %v15350_v15, %v15350_v15 }
0x1240   : > { %v9715_v57 = vmul.f32 %v15354_v24, %v15354_v24  ;;  %v9480_v14 = vpop.xlane.xlu0 %9479  ;;  %v9856_v44 = vcombine.low %v9708_v19, %v9709_v20  ;;  %v9857_v34 = vcombine.low %v9710_v13, %v9711_v46 }
0x1241   : > { %15982 = vst [vmem:[#allocation42_spill] sm:$0xff] %v15367_v10  ;;  %v9487_v52 = vmul.f32 0.0078125, %v9480_v14  ;;  %v9858_v39 = vcombine.low %v9712_v22, %v9713_v35  ;;  %v9724_v11 = vmul.f32 %v15367_v10, %v15367_v10 }
0x1242   : > { %v9859_v32 = vcombine.low %v9714_v62, %v9715_v57  ;;  %v9866_v45 = vrot.slane %v9856_v44, %v12510_v12  ;;  %v9873_v29 = vrot.slane %v9857_v34, %v12510_v12 }
0x1243   : > { %v9880_v1 = vrot.slane %v9858_v39, %v12510_v12  ;;  %v9593_v33 = vrot.slane %v9487_v52, %v13008_v60  ;;  %v9597_v63 = vrot.slane %v9487_v52, %v13005_v59  ;;  %v9601_v19 = vrot.slane %v9487_v52, %v15973_v41 }
0x1244   : > { %v9887_v23 = vrot.slane %v9859_v32, %v12510_v12  ;;  %v9888_v53 = vcombine.low %v9866_v45, %v9873_v29  ;;  %v9605_v20 = vrot.slane %v9487_v52, %v15974_v31  ;;  %v9609_v13 = vrot.slane %v9487_v52, %v15975_v16 }
0x1245   : > { %v9613_v22 = vrot.slane %v9487_v52, %v15976_v18  ;;  %v9617_v35 = vrot.slane %v9487_v52, %v15977_v56  ;;  %v9621_v62 = vrot.slane %v9487_v52, %v13059_v26  ;;  %v15391_v14 = vsub.f32 %v15166_v43, %v9593_v33 }
0x1246   : > { %v9889_v46 = vcombine.low %v9880_v1, %v9887_v23  ;;  %v9896_v57 = vrot.slane %v9888_v53, %v12510_v12  ;;  %v15394_v44 = vsub.f32 %v15171_v27, %v9597_v63  ;;  %v15397_v34 = vsub.f32 %v15174_v37, %v9601_v19 }
0x1247   : > { %15983 = vst [vmem:[#allocation45_spill] sm:$0xff] %v15391_v14  ;;  %v15401_v32 = vsub.f32 %v15183_v9, %v9605_v20  ;;  %v15404_v45 = vsub.f32 %v15180_v48, %v9609_v13  ;;  %v15407_v52 = vsub.f32 %v15186_v25, %v9613_v22  ;;  %v15410_v43 = vsub.f32 %v15194_v28, %v9617_v35 }
0x1248   : > { %15984 = vst [vmem:[#allocation43_spill] sm:$0xff] %v15394_v44  ;;  %15985 = vst [vmem:[#allocation46_spill] sm:$0xff] %v15397_v34  ;;  %v9903_v39 = vrot.slane %v9889_v46, %v12510_v12  ;;  %v15413_v27 = vsub.f32 %v15197_v47, %v9621_v62  ;;  %v9716_v37 = vmul.f32 %v15391_v14, %v15391_v14 }
0x1249   : > { %15986 = vst [vmem:[#allocation44_spill] sm:$0xff] %v15401_v32  ;;  %15987 = vst [vmem:[#allocation39_spill] sm:$0xff] %v15404_v45  ;;  %v9717_v29 = vmul.f32 %v15394_v44, %v15394_v44  ;;  %v9718_v48 = vmul.f32 %v15397_v34, %v15397_v34  ;;  %v9719_v25 = vmul.f32 %v15401_v32, %v15401_v32 }
0x124a   : > { %15988 = vst [vmem:[#allocation49_spill] sm:$0xff] %v15407_v52  ;;  %15989 = vst [vmem:[#allocation56_spill] sm:$0xff] %v15410_v43  ;;  %v9904_v9 = vcombine.low %v9896_v57, %v9903_v39  ;;  %v9720_v28 = vmul.f32 %v15404_v45, %v15404_v45  ;;  %v9721_v47 = vmul.f32 %v15407_v52, %v15407_v52 }
0x124b   : > { %15990 = vst [vmem:[#allocation51_spill] sm:$0xff] %v15413_v27  ;;  %v9722_v1 = vmul.f32 %v15410_v43, %v15410_v43  ;;  %v9723_v23 = vmul.f32 %v15413_v27, %v15413_v27  ;;  %v9905_v33 = vcombine.low %v9716_v37, %v9717_v29  ;;  %v9906_v63 = vcombine.low %v9718_v48, %v9719_v25  ;;  %v10897_v48 = vld [vmem:[%s12330_s20] ss:$0 sm:$0xff] }
0x124c   : > { %9977 = vadd.xlane.f32.xlu0 %v9904_v9  ;;  %v9960_v53 = vrot.slane %v9724_v11, %v12510_v12  ;;  %v9907_v19 = vcombine.low %v9720_v28, %v9721_v47  ;;  %v10898_v25 = vld [vmem:[%s12335_s27] ss:$0 sm:$0xff]  ;;  %v10208_v28 = vcombine.high %v10897_v48, %v10897_v48 }
0x124d   : > { %v9908_v20 = vcombine.low %v9722_v1, %v9723_v23  ;;  %v9915_v13 = vrot.slane %v9905_v33, %v12510_v12  ;;  %v9922_v46 = vrot.slane %v9906_v63, %v12510_v12  ;;  %v10304_v47 = vcombine.high %v10898_v25, %v10898_v25 }
0x124e   : > { %v9967_v22 = vrot.slane %v9960_v53, %v12510_v12  ;;  %v9929_v35 = vrot.slane %v9907_v19, %v12510_v12  ;;  %v10215_v33 = vrot.slane %v10897_v48, %v12510_v12  ;;  %v10222_v63 = vrot.slane %v10208_v28, %v12510_v12 }
0x124f   : > { %v9936_v62 = vrot.slane %v9908_v20, %v12510_v12  ;;  %v9937_v57 = vcombine.low %v9915_v13, %v9922_v46  ;;  %v10311_v19 = vrot.slane %v10898_v25, %v12510_v12  ;;  %v10318_v20 = vrot.slane %v10304_v47, %v12510_v12 }
0x1250   : > { %v9981_v39 = vsel %vm7424_vm13, %v9967_v22, 0.0  ;;  %v10223_v13 = vcombine.high %v10215_v33, %v10215_v33  ;;  %v10224_v46 = vcombine.high %v10222_v63, %v10222_v63 }
0x1251   : > { %v9938_v37 = vcombine.low %v9929_v35, %v9936_v62  ;;  %9982 = vadd.xlane.f32.xlu0 %v9981_v39  ;;  %v9945_v11 = vrot.slane %v9937_v57, %v12510_v12  ;;  %v10319_v22 = vcombine.high %v10311_v19, %v10311_v19  ;;  %v10320_v35 = vcombine.high %v10318_v20, %v10318_v20 }
0x1252   : > { %v15447_v62 = vrot.slane %v10215_v33, %v12510_v12  ;;  %v15450_v57 = vrot.slane %v10222_v63, %v12510_v12  ;;  %v15453_v39 = vrot.slane %v10223_v13, %v12510_v12 }
0x1253   : > { %v9952_v29 = vrot.slane %v9938_v37, %v12510_v12  ;;  %v15456_v37 = vrot.slane %v10224_v46, %v12510_v12  ;;  %v15468_v48 = vrot.slane %v10320_v35, %v12510_v12 }
0x1254   : > { %v15472_v25 = vcombine.high %v15447_v62, %v15447_v62  ;;  %v15476_v28 = vcombine.high %v15450_v57, %v15450_v57  ;;  %v15480_v47 = vcombine.high %v15453_v39, %v15453_v39 }
0x1255   : > { %v9953_v9 = vcombine.low %v9945_v11, %v9952_v29  ;;  %v15459_v11 = vrot.slane %v10311_v19, %v12510_v12  ;;  %v15462_v29 = vrot.slane %v10318_v20, %v12510_v12  ;;  %v15500_v20 = vcombine.high %v15468_v48, %v15468_v48 }
0x1257   : > { %9979 = vadd.xlane.f32.xlu1 %v9953_v9  ;;  %v15465_v9 = vrot.slane %v10319_v22, %v12510_v12  ;;  %v15488_v63 = vcombine.high %v15459_v11, %v15459_v11 }
0x1259   : > { %v15496_v19 = vcombine.high %v15465_v9, %v15465_v9 }
0x12bb   : > { %v9974_v1 = vpop.xlane.xlu0 %9973 }
0x12bc   : > { %v9984_v23 = vmul.f32 0.0078125, %v9974_v1  ;;  %v15484_v1 = vcombine.high %v15456_v37, %v15456_v37 }
0x12be   : > { %v9989_v53 = vadd.f32 1e-05, %v9984_v23 }
0x12c0   : > { %11914 = vrsqrt.f32 %v9989_v53  ;;  %v15492_v53 = vcombine.high %v15462_v29, %v15462_v29 }
0x12ca   : > { %v11915_v23 = vpop.eup %11914 }
0x12cb   : > { %v9976_v33 = vpop.xlane.xlu1 %9975  ;;  %v10007_v46 = vrot.slane %v11915_v23, %v13008_v60  ;;  %v10011_v22 = vrot.slane %v11915_v23, %v13005_v59  ;;  %v10015_v35 = vrot.slane %v11915_v23, %v15973_v41  ;;  %v10019_v27 = vrot.slane %v11915_v23, %v15974_v31 }
0x12cc   : > { %v9985_v13 = vmul.f32 0.0078125, %v9976_v33  ;;  %v10023_v43 = vrot.slane %v11915_v23, %v15975_v16  ;;  %v10027_v52 = vrot.slane %v11915_v23, %v15976_v18  ;;  %v10031_v45 = vrot.slane %v11915_v23, %v15977_v56 }
0x12cd   : > { %v10035_v34 = vrot.slane %v11915_v23, %v13059_v26  ;;  %v10169_v44 = vmul.f32 %v10007_v46, %v15224_v40  ;;  %v10170_v33 = vmul.f32 %v10011_v22, %v15227_v61  ;;  %v10171_v14 = vmul.f32 %v10015_v35, %v15230_v0 }
0x12ce   : > { %v9990_v32 = vadd.f32 1e-05, %v9985_v13  ;;  %v10172_v10 = vmul.f32 %v10019_v27, %v15233_v49  ;;  %v10173_v24 = vmul.f32 %v10023_v43, %v15236_v4  ;;  %v10174_v15 = vmul.f32 %v10027_v52, %v15239_v51 }
0x12cf   : > { %v10175_v2 = vmul.f32 %v10031_v45, %v15242_v3  ;;  %v10176_v42 = vmul.f32 %v10035_v34, %v15245_v6  ;;  %v10265_v13 = vmul.f32 %v15447_v62, %v10169_v44  ;;  %v10266_v23 = vmul.f32 %v15453_v39, %v10170_v33 }
0x12d0   : > { %11916 = vrsqrt.f32 %v9990_v32  ;;  %v10267_v40 = vmul.f32 %v15472_v25, %v10171_v14  ;;  %v10268_v61 = vmul.f32 %v15480_v47, %v10172_v10  ;;  %v10269_v0 = vmul.f32 %v15450_v57, %v10173_v24 }
0x12d1   : > { %v10270_v49 = vmul.f32 %v15456_v37, %v10174_v15  ;;  %v10271_v4 = vmul.f32 %v15476_v28, %v10175_v2  ;;  %v10272_v51 = vmul.f32 %v15484_v1, %v10176_v42  ;;  %v10361_v3 = vadd.f32 %v15459_v11, %v10265_v13 }
0x12d2   : > { %v10362_v6 = vadd.f32 %v15465_v9, %v10266_v23  ;;  %v10363_v44 = vadd.f32 %v15488_v63, %v10267_v40  ;;  %v10364_v34 = vadd.f32 %v15496_v19, %v10268_v61  ;;  %v10365_v14 = vadd.f32 %v15462_v29, %v10269_v0 }
0x12d3   : > { %v10366_v10 = vadd.f32 %v15468_v48, %v10270_v49  ;;  %v10367_v24 = vadd.f32 %v15492_v53, %v10271_v4  ;;  %v10368_v15 = vadd.f32 %v15500_v20, %v10272_v51 }
0x12d4   : > { %v10427_v32 = vcombine.low %v10361_v3, %v10362_v6  ;;  %v10428_v2 = vcombine.low %v10363_v44, %v10364_v34 }
0x12d5   : > { %v10429_v45 = vcombine.low %v10365_v14, %v10366_v10  ;;  %v10430_v42 = vcombine.low %v10367_v24, %v10368_v15 }
0x12d6   : > { %v10437_v43 = vrot.slane %v10427_v32, %v12510_v12  ;;  %v10444_v27 = vrot.slane %v10428_v2, %v12510_v12 }
0x12d7   : > { %v10451_v22 = vrot.slane %v10429_v45, %v12510_v12  ;;  %v10458_v35 = vrot.slane %v10430_v42, %v12510_v12 }
0x12d8   : > { %v10459_v33 = vcombine.low %v10437_v43, %v10444_v27 }
0x12d9   : > { %v9978_v52 = vpop.xlane.xlu0 %9977  ;;  %v10460_v40 = vcombine.low %v10451_v22, %v10458_v35 }
0x12da   : > { %v9986_v46 = vmul.f32 0.0078125, %v9978_v52  ;;  %v11917_v13 = vpop.eup %11916  ;;  %v10467_v61 = vrot.slane %v10459_v33, %v12510_v12 }
0x12db   : > { %v10039_v0 = vrot.slane %v11917_v13, %v13008_v60  ;;  %v10043_v49 = vrot.slane %v11917_v13, %v13005_v59  ;;  %v10047_v4 = vrot.slane %v11917_v13, %v15973_v41  ;;  %v10474_v51 = vrot.slane %v10460_v40, %v12510_v12 }
0x12dc   : > { %v9991_v23 = vadd.f32 1e-05, %v9986_v46  ;;  %v10051_v6 = vrot.slane %v11917_v13, %v15974_v31  ;;  %v10055_v44 = vrot.slane %v11917_v13, %v15975_v16  ;;  %v10059_v14 = vrot.slane %v11917_v13, %v15976_v18 }
0x12dd   : > { %v10063_v10 = vrot.slane %v11917_v13, %v15977_v56  ;;  %v10067_v24 = vrot.slane %v11917_v13, %v13059_v26  ;;  %v10475_v15 = vcombine.low %v10467_v61, %v10474_v51  ;;  %v10177_v32 = vmul.f32 %v10039_v0, %v15278_v36 }
0x12de   : > { %11918 = vrsqrt.f32 %v9991_v23  ;;  %v9983_v3 = vpop.xlane.xlu0 %9982  ;;  %v10178_v2 = vmul.f32 %v10043_v49, %v15281_v55  ;;  %v10179_v45 = vmul.f32 %v10047_v4, %v15284_v8  ;;  %v10180_v52 = vmul.f32 %v10051_v6, %v15287_v54 }
0x12df   : > { %v9988_v34 = vmul.f32 0.0078125, %v9983_v3  ;;  %v10181_v43 = vmul.f32 %v10055_v44, %v15290_v21  ;;  %v10182_v27 = vmul.f32 %v10059_v14, %v15293_v58  ;;  %10649 = vst [vmem:[%s15548_s10] sm:$0xff] %v10475_v15  ;;  %v10183_v46 = vmul.f32 %v10063_v10, %v15296_v17 }
0x12e0   : > { %v10184_v22 = vmul.f32 %v10067_v24, %v15299_v7  ;;  %v10273_v35 = vmul.f32 %v15447_v62, %v10177_v32  ;;  %v10274_v36 = vmul.f32 %v15453_v39, %v10178_v2  ;;  %v10275_v55 = vmul.f32 %v15472_v25, %v10179_v45 }
0x12e1   : > { %v9993_v42 = vadd.f32 1e-05, %v9988_v34  ;;  %v10276_v8 = vmul.f32 %v15480_v47, %v10180_v52  ;;  %v10277_v33 = vmul.f32 %v15450_v57, %v10181_v43  ;;  %v10278_v54 = vmul.f32 %v15456_v37, %v10182_v27  ;;  %v15991_v43 = vld [vmem:[#allocation31_spill] sm:$0xff] }
0x12e2   : > { %v10279_v21 = vmul.f32 %v15476_v28, %v10183_v46  ;;  %v10280_v58 = vmul.f32 %v15484_v1, %v10184_v22  ;;  %v10369_v17 = vadd.f32 %v15459_v11, %v10273_v35  ;;  %v10370_v7 = vadd.f32 %v15465_v9, %v10274_v36  ;;  %v15992_v46 = vld [vmem:[#allocation37_spill] sm:$0xff] }
0x12e3   : > { %11920 = vrsqrt.f32 %v9993_v42  ;;  %v10371_v13 = vadd.f32 %v15488_v63, %v10275_v55  ;;  %v10372_v23 = vadd.f32 %v15496_v19, %v10276_v8  ;;  %v10373_v0 = vadd.f32 %v15462_v29, %v10277_v33 }
0x12e4   : > { %v9980_v40 = vpop.xlane.xlu1 %9979  ;;  %v10374_v49 = vadd.f32 %v15468_v48, %v10278_v54  ;;  %v10375_v4 = vadd.f32 %v15492_v53, %v10279_v21  ;;  %v10376_v51 = vadd.f32 %v15500_v20, %v10280_v58  ;;  %v10476_v24 = vcombine.low %v10369_v17, %v10370_v7 }
0x12e5   : > { %v9987_v15 = vmul.f32 0.0078125, %v9980_v40  ;;  %v10499_v35 = vcombine.low %v10372_v23, %v10373_v0 }
0x12e6   : > { %v10500_v33 = vcombine.low %v10374_v49, %v10375_v4  ;;  %v10483_v49 = vrot.slane %v10476_v24, %v12510_v12 }
0x12e7   : > { %v9992_v0 = vadd.f32 1e-05, %v9987_v15 }
0x12e8   : > { %v11919_v61 = vpop.eup %11918 }
0x12e9   : > { %v10071_v3 = vrot.slane %v11919_v61, %v13008_v60  ;;  %v10075_v6 = vrot.slane %v11919_v61, %v13005_v59  ;;  %v10079_v44 = vrot.slane %v11919_v61, %v15973_v41  ;;  %v10083_v34 = vrot.slane %v11919_v61, %v15974_v31 }
0x12ea   : > { %v10087_v14 = vrot.slane %v11919_v61, %v15975_v16  ;;  %v10091_v10 = vrot.slane %v11919_v61, %v15976_v18  ;;  %v10095_v52 = vrot.slane %v11919_v61, %v15977_v56  ;;  %11922 = vrsqrt.f32 %v9992_v0 }
0x12eb   : > { %v10185_v32 = vmul.f32 %v10071_v3, %v15331_v5  ;;  %v10186_v2 = vmul.f32 %v10075_v6, %v15335_v38  ;;  %v10187_v45 = vmul.f32 %v10079_v44, %v15338_v50  ;;  %v10188_v42 = vmul.f32 %v10083_v34, %v15341_v30  ;;  %v15993_v3 = vld [vmem:[#allocation40_spill] sm:$0xff]  ;;  %v15994_v34 = vld [vmem:[#allocation41_spill] sm:$0xff] }
0x12ec   : > { %v10189_v27 = vmul.f32 %v10087_v14, %v15991_v43  ;;  %v10190_v22 = vmul.f32 %v10091_v10, %v15992_v46  ;;  %v10099_v38 = vrot.slane %v11919_v61, %v13059_v26  ;;  %v10490_v61 = vrot.slane %v10371_v13, %v12510_v12 }
0x12ed   : > { %v10281_v36 = vmul.f32 %v15447_v62, %v10185_v32  ;;  %v10282_v55 = vmul.f32 %v15453_v39, %v10186_v2  ;;  %v10283_v8 = vmul.f32 %v15472_v25, %v10187_v45  ;;  %v10284_v5 = vmul.f32 %v15480_v47, %v10188_v42  ;;  %v11921_v54 = vpop.eup %11920 }
0x12ee   : > { %v10285_v50 = vmul.f32 %v15450_v57, %v10189_v27  ;;  %v10286_v30 = vmul.f32 %v15456_v37, %v10190_v22  ;;  %v10191_v6 = vmul.f32 %v10095_v52, %v15993_v3  ;;  %v10192_v14 = vmul.f32 %v10099_v38, %v15994_v34  ;;  %v15995_v22 = vld [vmem:[#allocation42_spill] sm:$0xff] }
0x12ef   : > { %v10377_v21 = vadd.f32 %v15459_v11, %v10281_v36  ;;  %v10378_v58 = vadd.f32 %v15465_v9, %v10282_v55  ;;  %v10379_v17 = vadd.f32 %v15488_v63, %v10283_v8  ;;  %v10380_v7 = vadd.f32 %v15496_v19, %v10284_v5  ;;  %v15998_v34 = vld [vmem:[#allocation46_spill] sm:$0xff] }
0x12f0   : > { %v10381_v23 = vadd.f32 %v15462_v29, %v10285_v50  ;;  %v10382_v40 = vadd.f32 %v15468_v48, %v10286_v30  ;;  %v10135_v32 = vrot.slane %v11921_v54, %v13008_v60  ;;  %v10509_v2 = vrot.slane %v10499_v35, %v12510_v12 }
0x12f1   : > { %v10502_v44 = vcombine.low %v10378_v58, %v10379_v17  ;;  %v10501_v4 = vcombine.low %v10376_v51, %v10377_v21  ;;  %v10491_v42 = vcombine.low %v10483_v49, %v10490_v61  ;;  %v10516_v13 = vrot.slane %v10500_v33, %v12510_v12  ;;  %v15997_v49 = vld [vmem:[#allocation43_spill] sm:$0xff] }
0x12f2   : > { %v10548_v10 = vcombine.low %v10380_v7, %v10381_v23  ;;  %v10562_v52 = vrot.slane %v10382_v40, %v12510_v12  ;;  %v10287_v51 = vmul.f32 %v15476_v28, %v10191_v6  ;;  %v10288_v27 = vmul.f32 %v15484_v1, %v10192_v14  ;;  %v15996_v6 = vld [vmem:[#allocation45_spill] sm:$0xff]  ;;  %v15999_v14 = vld [vmem:[#allocation44_spill] sm:$0xff] }
0x12f3   : > { %v10530_v45 = vrot.slane %v10502_v44, %v12510_v12  ;;  %v10523_v24 = vrot.slane %v10501_v4, %v12510_v12  ;;  %v10531_v43 = vcombine.low %v10509_v2, %v10516_v13  ;;  %10899 = vst.sshfl [vmem:[%s15548_s10 + $0x8] sm:$0x15 pattern:$0x73625140] %v10491_v42  ;;  %v10201_v35 = vmul.f32 %v10135_v32, %v15995_v22  ;;  %v16001_v32 = vld [vmem:[#allocation49_spill] sm:$0xff]  ;;  %v16002_v2 = vld [vmem:[#allocation56_spill] sm:$0xff] }
0x12f4   : > { %v10555_v15 = vrot.slane %v10548_v10, %v12510_v12  ;;  %v10383_v5 = vadd.f32 %v15492_v53, %v10287_v51  ;;  %v10384_v38 = vadd.f32 %v15500_v20, %v10288_v27  ;;  %v11923_v33 = vpop.eup %11922  ;;  %v16000_v10 = vld [vmem:[#allocation39_spill] sm:$0xff] }
0x12f5   : > { %v10532_v36 = vcombine.low %v10523_v24, %v10530_v45  ;;  %v10539_v55 = vrot.slane %v10531_v43, %v12510_v12  ;;  %v10297_v50 = vmul.f32 %v15447_v62, %v10201_v35  ;;  %v10103_v58 = vrot.slane %v11923_v33, %v13008_v60  ;;  %v16003_v45 = vld [vmem:[#allocation51_spill] sm:$0xff] }
0x12f6   : > { %v10563_v46 = vcombine.low %v10555_v15, %v10562_v52  ;;  %v10571_v54 = vcombine.low %v10383_v5, %v10384_v38  ;;  %v10107_v17 = vrot.slane %v11923_v33, %v13005_v59  ;;  %v10111_v7 = vrot.slane %v11923_v33, %v15973_v41 }
0x12f7   : > { %v10546_v8 = vrot.slane %v10532_v36, %v12510_v12  ;;  %v10393_v21 = vadd.f32 %v15459_v11, %v10297_v50  ;;  %v10115_v23 = vrot.slane %v11923_v33, %v15974_v31  ;;  %v10119_v40 = vrot.slane %v11923_v33, %v15975_v16 }
0x12f8   : > { %10900 = vst.sshfl [vmem:[%s15548_s10 + $0x18] sm:$0x15 pattern:$0x73625140] %v10563_v46  ;;  %v10123_v61 = vrot.slane %v11923_v33, %v15976_v18  ;;  %v10127_v0 = vrot.slane %v11923_v33, %v15977_v56  ;;  %v10131_v3 = vrot.slane %v11923_v33, %v13059_v26  ;;  %v10193_v44 = vmul.f32 %v10103_v58, %v15996_v6 }
0x12f9   : > { %v10547_v30 = vcombine.low %v10539_v55, %v10546_v8  ;;  %v10194_v4 = vmul.f32 %v10107_v17, %v15997_v49  ;;  %v10195_v60 = vmul.f32 %v10111_v7, %v15998_v34  ;;  %v10196_v59 = vmul.f32 %v10115_v23, %v15999_v14 }
0x12fa   : > { %v10197_v41 = vmul.f32 %v10119_v40, %v16000_v10  ;;  %v10198_v31 = vmul.f32 %v10123_v61, %v16001_v32  ;;  %v10199_v16 = vmul.f32 %v10127_v0, %v16002_v2  ;;  %v10200_v18 = vmul.f32 %v10131_v3, %v16003_v45 }
0x12fb   : > { %10651 = vst [vmem:[%s15548_s10 + $0x10] sm:$0xff] %v10547_v30  ;;  %v10289_v56 = vmul.f32 %v15447_v62, %v10193_v44  ;;  %v10290_v26 = vmul.f32 %v15453_v39, %v10194_v4  ;;  %v10291_v42 = vmul.f32 %v15472_v25, %v10195_v60  ;;  %v10292_v13 = vmul.f32 %v15480_v47, %v10196_v59 }
0x12fc   : > { %v10293_v15 = vmul.f32 %v15450_v57, %v10197_v41  ;;  %v10294_v52 = vmul.f32 %v15456_v37, %v10198_v31  ;;  %v10295_v24 = vmul.f32 %v15476_v28, %v10199_v16  ;;  %v10296_v51 = vmul.f32 %v15484_v1, %v10200_v18 }
0x12fd   : > { %v10385_v43 = vadd.f32 %v15459_v11, %v10289_v56  ;;  %v10386_v27 = vadd.f32 %v15465_v9, %v10290_v26  ;;  %v10387_v62 = vadd.f32 %v15488_v63, %v10291_v42  ;;  %v10388_v39 = vadd.f32 %v15496_v19, %v10292_v13 }
0x12fe   : > { %v10389_v25 = vadd.f32 %v15462_v29, %v10293_v15  ;;  %v10390_v47 = vadd.f32 %v15468_v48, %v10294_v52  ;;  %v10391_v57 = vadd.f32 %v15492_v53, %v10295_v24  ;;  %v10392_v37 = vadd.f32 %v15500_v20, %v10296_v51 }
0x12ff   : > { %v10572_v28 = vcombine.low %v10385_v43, %v10386_v27  ;;  %v10573_v46 = vcombine.low %v10387_v62, %v10388_v39  ;;  %v10581_v9 = vrot.slane %v10571_v54, %v12510_v12  ;;  %v10634_v29 = vrot.slane %v10393_v21, %v12510_v12 }
0x1300   : > { %v10574_v1 = vcombine.low %v10389_v25, %v10390_v47  ;;  %v10620_v11 = vcombine.low %v10391_v57, %v10392_v37 }
0x1301   : > { %v10588_v63 = vrot.slane %v10572_v28, %v12510_v12  ;;  %v10595_v19 = vrot.slane %v10573_v46, %v12510_v12 }
0x1302   : > { %v10602_v48 = vrot.slane %v10574_v1, %v12510_v12  ;;  %v10627_v53 = vrot.slane %v10620_v11, %v12510_v12 }
0x1303   : > { %v10603_v22 = vcombine.low %v10581_v9, %v10588_v63 }
0x1304   : > { %v10604_v20 = vcombine.low %v10595_v19, %v10602_v48  ;;  %v10635_v35 = vcombine.low %v10627_v53, %v10634_v29 }
0x1305   : > { %v10611_v36 = vrot.slane %v10603_v22, %v12510_v12 }
0x1306   : > { %v10618_v55 = vrot.slane %v10604_v20, %v12510_v12  ;;  %10901 = vst.sshfl [vmem:[%s15548_s10 + $0x28] sm:$0x15 pattern:$0x73625140] %v10635_v35 }
0x1308   : > { %v10619_v8 = vcombine.low %v10611_v36, %v10618_v55 }
0x130a   : > { %10653 = vst [vmem:[%s15548_s10 + $0x20] sm:$0xff] %v10619_v8 }
0x130b PF: > { %s73_s7 = sadd.s32 1, %s12142_s7  }
0x130c   : > { %p70_p7 = scmp.ge.s32.totalorder %s73_s7, 4  }
0x130e   :  { %72 = sbr.rel (!%p70_p7) target bundleno = 53 (0x35), region = 224 }
0x1315   :  { %10679 = vsyncpa [#allocation3], 1 }
0x1316   :  { %10681 = vsyncpa [#allocation3 + $0x1], 1 }
0x1317   :  { %10682 = vsyncpa [#allocation5], 1 }
0x1318   :  { %10683 = vsyncpa [#allocation8], 1 }
0x1319   :  { %10684 = vsyncpa [#allocation11], 1 }

</bundles_post_ra>
